<compile_context>
chip_gen: v7x
topology: tpu7x:2x2x1
jax: 0.10.0
libtpu: 0.0.40
codegen_flags: <defaults>
</compile_context>

<pallas_src>
import functools
import math

import jax
import jax.numpy as jnp
from jax import lax
from jax.experimental import pallas as pl
from jax.experimental.pallas import tpu as pltpu


# Raises v5e's 16 MiB scoped-VMEM default; well under v7x's 64 MiB physical VMEM.
_VMEM_LIMIT = 32 * 1024 * 1024


# =============================================================================
# Pallas kernels
# =============================================================================

def _matmul_bias_kernel(a_ref, w_ref, b_ref, o_ref, *, relu):
    """o = act(a @ w + b): conv-as-GEMM (bf16 operands, f32 accumulate, BN folded)."""
    acc = jnp.dot(a_ref[...], w_ref[...], preferred_element_type=jnp.float32)
    acc = acc + b_ref[...]
    if relu:
        acc = jnp.maximum(acc, 0.0)
    o_ref[...] = acc.astype(o_ref.dtype)


def matmul_bias(a, w, b, *, relu=False, out_dtype=jnp.float32, tm=512):
    """(M, K) @ (K, N) + b with optional ReLU, tiled over M ("parallel" grid).

    M is zero-padded to a tile multiple (robust to arbitrary row counts); the
    pad rows are sliced off afterwards.  Output dtype is configurable so conv
    outputs that only feed bf16 GEMMs are written back at half width.
    """
    M, K = a.shape
    _, N = w.shape
    tm = min(tm, M)
    Mp = pl.cdiv(M, tm) * tm
    if Mp != M:
        a = jnp.pad(a, ((0, Mp - M), (0, 0)))
    cost = pl.CostEstimate(
        flops=2 * Mp * K * N,
        transcendentals=0,
        bytes_accessed=(Mp * K * a.dtype.itemsize + K * N * w.dtype.itemsize
                        + Mp * N * jnp.dtype(out_dtype).itemsize),
    )
    out = pl.pallas_call(
        functools.partial(_matmul_bias_kernel, relu=relu),
        out_shape=jax.ShapeDtypeStruct((Mp, N), out_dtype),
        grid=(Mp // tm,),
        in_specs=[
            pl.BlockSpec((tm, K), lambda i: (i, 0)),
            pl.BlockSpec((K, N), lambda i: (0, 0)),
            pl.BlockSpec((1, N), lambda i: (0, 0)),
        ],
        out_specs=pl.BlockSpec((tm, N), lambda i: (i, 0)),
        compiler_params=pltpu.CompilerParams(
            dimension_semantics=("parallel",), vmem_limit_bytes=_VMEM_LIMIT),
        cost_estimate=cost,
    )(a, w, b.reshape(1, N))
    return out[:M] if Mp != M else out


def _se_stage_kernel(p2_ref, xr_ref, w2_ref, w3_ref, wd_ref, w1_ref, w2se_ref,
                     bias_ref, o_ref, *, planes, cr):
    """Fused bottleneck tail for ONE sample (grid step = batch index):

      conv2 (3x3 as GEMM over im2col patches) + BN + ReLU
      conv3 (1x1) + BN
      SE: global-avg-pool (row mean) -> FC -> ReLU -> FC -> sigmoid -> gate
      residual 1x1 downsample + BN
      out = ReLU(gate * conv3 + residual)

    All heavy operands are bf16 (MXU single-pass path); accumulation, bias,
    ReLU, sigmoid and the final combine stay f32.  Biases for all five affine
    ops arrive packed in one (8, Cout) slab (one DMA descriptor).
    """
    bias = bias_ref[...]
    b2 = bias[0:1, :planes]
    b3 = bias[1:2, :]
    bd = bias[2:3, :]
    b1 = bias[3:4, :cr]
    b2s = bias[4:5, :]

    # conv2 (bf16 MXU, f32 accumulate) + BN + ReLU
    a = jnp.dot(p2_ref[0], w2_ref[...], preferred_element_type=jnp.float32)
    a = jnp.maximum(a + b2, 0.0)                                        # (HW, planes)
    # conv3 (1x1) + BN
    y = jnp.dot(a.astype(jnp.bfloat16), w3_ref[...],
                preferred_element_type=jnp.float32) + b3                # (HW, Cout)
    # residual 1x1 downsample + BN
    r = jnp.dot(xr_ref[0], wd_ref[...],
                preferred_element_type=jnp.float32) + bd                # (HW, Cout)
    # SE squeeze: per-sample global average pool = row mean (no pool matmul)
    s = jnp.mean(y, axis=0, keepdims=True)                              # (1, Cout)
    z = jnp.maximum(jnp.dot(s.astype(jnp.bfloat16), w1_ref[...],
                            preferred_element_type=jnp.float32) + b1, 0.0)
    t = jnp.dot(z.astype(jnp.bfloat16), w2se_ref[...],
                preferred_element_type=jnp.float32) + b2s               # (1, Cout)
    g = 1.0 / (1.0 + jnp.exp(-t))                                       # exact sigmoid
    # SE excite (lane-aligned broadcast) + residual + ReLU
    o_ref[0] = jnp.maximum(y * g + r, 0.0)


# =============================================================================
# Plain-JAX glue: BN folding, im2col, layout plumbing
# =============================================================================

def _fold_bn(p):
    """Fold eval-mode BatchNorm into conv weights/bias (f32)."""
    scale = p["gamma"] / jnp.sqrt(p["var"] + 1e-5)
    return p["w"] * scale[None, :], p["beta"] - p["mean"] * scale


def _extract_patches(x, k, stride, pad):
    """x: (N, H, W, C) NHWC -> patches (N, Ho, Wo, k*k, C) (im2col, XLA side)."""
    x = jnp.pad(x, ((0, 0), (pad, pad), (pad, pad), (0, 0)))
    N, H, W, C = x.shape
    Ho = (H - k) // stride + 1
    Wo = (W - k) // stride + 1
    cols = []
    for di in range(k):
        for dj in range(k):
            cols.append(x[:, di:di + Ho * stride:stride, dj:dj + Wo * stride:stride, :])
    return jnp.stack(cols, axis=3), (N, Ho, Wo)


def maxpool3x3_s2(x):
    # TODO(synk): stem 3x3/s2 maxpool stays in XLA (lax.reduce_window): an in-kernel
    # Pallas version needs strided sublane windowing, and the previous 9x-im2col
    # Pallas kernel cost ~9x HBM read bandwidth for a purely memory-bound op.
    init = jnp.asarray(-jnp.inf, dtype=x.dtype)
    return lax.reduce_window(x, init, lax.max, (1, 3, 3, 1), (1, 2, 2, 1),
                             ((0, 0), (1, 1), (1, 1), (0, 0)))


def se_bottleneck(x, p, *, stride):
    """SE bottleneck = conv1 GEMM (bf16 out) + ONE fused pallas_call gridded over batch."""
    N, H, W, Cin = x.shape

    # conv1 (1x1 + BN + ReLU); its output feeds a spatial im2col, so it materializes
    # — but directly in bf16 (its only consumer is a bf16 GEMM).
    w1c, b1c = _fold_bn(p["conv1"])
    planes = w1c.shape[1]
    a1 = matmul_bias(x.reshape(N * H * W, Cin).astype(jnp.bfloat16),
                     w1c.astype(jnp.bfloat16), b1c, relu=True,
                     out_dtype=jnp.bfloat16).reshape(N, H, W, planes)

    # im2col for conv2 (XLA layout plumbing, bf16)
    patches, (_, Ho, Wo) = _extract_patches(a1, 3, stride, 1)
    HW = Ho * Wo
    p2 = patches.reshape(N, HW, 9 * planes)

    # strided residual input for the 1x1 downsample
    xr = x[:, ::stride, ::stride, :] if stride > 1 else x
    xr = xr.reshape(N, HW, Cin).astype(jnp.bfloat16)

    # fold BN into the three convs
    w2, b2 = _fold_bn(p["conv2"])
    w3, b3 = _fold_bn(p["conv3"])
    wd, bd = _fold_bn(p["down"])
    Cout = w3.shape[1]
    se = p["se"]
    cr = se["w1"].shape[1]

    # pack all five bias vectors into one (8, Cout) f32 slab
    bias = jnp.zeros((8, Cout), jnp.float32)
    bias = bias.at[0, :planes].set(b2)
    bias = bias.at[1, :].set(b3)
    bias = bias.at[2, :].set(bd)
    bias = bias.at[3, :cr].set(se["b1"])
    bias = bias.at[4, :].set(se["b2"])

    flops = N * (2 * HW * (9 * planes) * planes + 2 * HW * planes * Cout
                 + 2 * HW * Cin * Cout + 2 * Cout * cr + 2 * cr * Cout)
    bytes_acc = (2 * (p2.size + xr.size + w2.size + w3.size + wd.size
                      + se["w1"].size + se["w2"].size)
                 + 4 * (bias.size + N * HW * Cout))
    cost = pl.CostEstimate(flops=flops, transcendentals=N * Cout, bytes_accessed=bytes_acc)

    out = pl.pallas_call(
        functools.partial(_se_stage_kernel, planes=planes, cr=cr),
        out_shape=jax.ShapeDtypeStruct((N, HW, Cout), jnp.float32),
        grid=(N,),
        in_specs=[
            pl.BlockSpec((1, HW, 9 * planes), lambda n: (n, 0, 0)),
            pl.BlockSpec((1, HW, Cin), lambda n: (n, 0, 0)),
            pl.BlockSpec((9 * planes, planes), lambda n: (0, 0)),
            pl.BlockSpec((planes, Cout), lambda n: (0, 0)),
            pl.BlockSpec((Cin, Cout), lambda n: (0, 0)),
            pl.BlockSpec((Cout, cr), lambda n: (0, 0)),
            pl.BlockSpec((cr, Cout), lambda n: (0, 0)),
            pl.BlockSpec((8, Cout), lambda n: (0, 0)),
        ],
        out_specs=pl.BlockSpec((1, HW, Cout), lambda n: (n, 0, 0)),
        compiler_params=pltpu.CompilerParams(
            dimension_semantics=("parallel",), vmem_limit_bytes=_VMEM_LIMIT),
        cost_estimate=cost,
    )(p2, xr,
      w2.astype(jnp.bfloat16), w3.astype(jnp.bfloat16), wd.astype(jnp.bfloat16),
      se["w1"].astype(jnp.bfloat16), se["w2"].astype(jnp.bfloat16),
      bias)
    return out.reshape(N, Ho, Wo, Cout)


def e_senet_forward(x_nchw, params):
    """Mirrors E_senet.forward: returns (x_block1, x_block2, x_block3, x_block4), NCHW."""
    x = jnp.transpose(x_nchw, (0, 2, 3, 1)).astype(jnp.float32)   # NCHW -> NHWC
    # base[0]: stem conv 3x3/s2 + BN + ReLU (Pallas GEMM, bf16 output) + maxpool
    ws, bs = _fold_bn(params["stem"])
    patches, (N, Ho, Wo) = _extract_patches(x, 3, 2, 1)
    a = patches.reshape(N * Ho * Wo, -1).astype(jnp.bfloat16)
    xs = matmul_bias(a, ws.astype(jnp.bfloat16), bs, relu=True,
                     out_dtype=jnp.bfloat16).reshape(N, Ho, Wo, -1)
    xs = maxpool3x3_s2(xs)
    # base[1..4]: SE bottleneck stages
    feats = []
    out = xs
    for i, stage in enumerate(params["stages"]):
        out = se_bottleneck(out, stage, stride=(1 if i == 0 else 2))
        feats.append(jnp.transpose(out, (0, 3, 1, 2)))            # NHWC -> NCHW
    return tuple(feats)


# =============================================================================
# Deterministic synthetic parameters (stand-in for the pretrained SENet)
# =============================================================================

def init_conv_bn(key, cin, cout, k):
    kw, kg, kb, km, kv = jax.random.split(key, 5)
    fan_in = k * k * cin
    return dict(
        w=jax.random.normal(kw, (fan_in, cout), jnp.float32) / math.sqrt(fan_in),
        gamma=1.0 + 0.05 * jax.random.normal(kg, (cout,), jnp.float32),
        beta=0.05 * jax.random.normal(kb, (cout,), jnp.float32),
        mean=0.05 * jax.random.normal(km, (cout,), jnp.float32),
        var=1.0 + 0.05 * jnp.abs(jax.random.normal(kv, (cout,), jnp.float32)),
    )


def init_se(key, c, reduction=4):
    cr = max(c // reduction, 8)
    k1, k2, k3, k4 = jax.random.split(key, 4)
    return dict(
        w1=jax.random.normal(k1, (c, cr), jnp.float32) / math.sqrt(c),
        b1=0.05 * jax.random.normal(k2, (cr,), jnp.float32),
        w2=jax.random.normal(k3, (cr, c), jnp.float32) / math.sqrt(cr),
        b2=0.05 * jax.random.normal(k4, (c,), jnp.float32),
    )


def init_params(key, *, stem_c=16, planes=(8, 16, 32, 64), expansion=4):
    keys = jax.random.split(key, 1 + 5 * len(planes))
    params = {"stem": init_conv_bn(keys[0], 3, stem_c, 3), "stages": []}
    cin = stem_c
    ki = 1
    for p in planes:
        cout = p * expansion
        stage = dict(
            conv1=init_conv_bn(keys[ki + 0], cin, p, 1),
            conv2=init_conv_bn(keys[ki + 1], p, p, 3),
            conv3=init_conv_bn(keys[ki + 2], p, cout, 1),
            down=init_conv_bn(keys[ki + 3], cin, cout, 1),
            se=init_se(keys[ki + 4], cout),
        )
        params["stages"].append(stage)
        cin = cout
        ki += 5
    return params


# =============================================================================
# Main
# =============================================================================

if __name__ == "__main__":
    root = jax.random.PRNGKey(0)
    k_x, k_p = jax.random.split(root)

    # Small synthetic input consistent with an image backbone (NCHW like PyTorch).
    x = jax.random.normal(k_x, (2, 3, 64, 64), jnp.float32)
    params = init_params(k_p)

    fwd = jax.jit(e_senet_forward)
    x1, x2, x3, x4 = fwd(x, params)
    for t in (x1, x2, x3, x4):
        jax.block_until_ready(t)

    # Expected shapes: (2,32,16,16) (2,64,8,8) (2,128,4,4) (2,256,2,2)
    assert x1.shape == (2, 32, 16, 16)
    assert x2.shape == (2, 64, 8, 8)
    assert x3.shape == (2, 128, 4, 4)
    assert x4.shape == (2, 256, 2, 2)
    assert all(bool(jnp.isfinite(t).all()) for t in (x1, x2, x3, x4))

    print("KERNEL_OK")
</pallas_src>

<mosaic_0001>
module attributes {stable_mosaic.version = 11 : i64} {
  func.func @_matmul_bias_kernel(%arg0: i32, %arg1: memref<512x27xbf16, #tpu.memory_space<vmem>>, %arg2: memref<27x16xbf16, #tpu.memory_space<vmem>>, %arg3: memref<1x16xf32, #tpu.memory_space<vmem>>, %arg4: memref<512x16xbf16, #tpu.memory_space<vmem>>) attributes {dimension_semantics = [#tpu.dimension_semantics<parallel>], iteration_bounds = array<i64: 4>, scalar_prefetch = 0 : i64, scratch_operands = 0 : i64, tpu.core_type = #tpu.core_type<tc>, window_params = [{transform_indices = @transform_0, window_bounds = array<i64: 512, 27>}, {pipeline_mode = #tpu.pipeline_mode<synchronous>, transform_indices = @transform_1, window_bounds = array<i64: 27, 16>}, {pipeline_mode = #tpu.pipeline_mode<synchronous>, transform_indices = @transform_2, window_bounds = array<i64: 1, 16>}, {transform_indices = @transform_3, window_bounds = array<i64: 512, 16>}]} {
    %c0 = arith.constant 0 : index
    %c0_0 = arith.constant 0 : index
    %0 = vector.load %arg1[%c0, %c0_0] : memref<512x27xbf16, #tpu.memory_space<vmem>>, vector<512x27xbf16>
    %c0_1 = arith.constant 0 : index
    %c0_2 = arith.constant 0 : index
    %1 = vector.load %arg2[%c0_1, %c0_2] : memref<27x16xbf16, #tpu.memory_space<vmem>>, vector<27x16xbf16>
    %cst = arith.constant dense<0.000000e+00> : vector<512x16xf32>
    %2 = tpu.matmul %0, %1, %cst {dimension_numbers = #tpu.dot_dimension_numbers<[1], [0], [0], [1], [0, 0, 1, 1], [], []>} : vector<512x27xbf16>, vector<27x16xbf16>, vector<512x16xf32> -> vector<512x16xf32>
    %c0_3 = arith.constant 0 : index
    %c0_4 = arith.constant 0 : index
    %3 = vector.load %arg3[%c0_3, %c0_4] : memref<1x16xf32, #tpu.memory_space<vmem>>, vector<1x16xf32>
    %4 = vector.broadcast %3 : vector<1x16xf32> to vector<512x16xf32>
    %5 = arith.addf %2, %4 : vector<512x16xf32>
    %cst_5 = arith.constant 0.000000e+00 : f32
    %6 = vector.broadcast %cst_5 : f32 to vector<512x16xf32>
    %7 = arith.maximumf %5, %6 : vector<512x16xf32>
    %8 = arith.truncf %7 : vector<512x16xf32> to vector<512x16xbf16>
    %c0_6 = arith.constant 0 : index
    %c0_7 = arith.constant 0 : index
    %9 = vector.load %arg4[%c0_6, %c0_7] : memref<512x16xbf16, #tpu.memory_space<vmem>>, vector<512x16xbf16>
    tpu.vector_store %arg4[%c0_6, %c0_7], %8 {strides = array<i32>} : memref<512x16xbf16, #tpu.memory_space<vmem>>, vector<512x16xbf16>,
    return
  }
  func.func @transform_0(%arg0: i32) -> (i32, i32) {
    %c0_i32 = arith.constant 0 : i32
    %c0_i32_0 = arith.constant 0 : i32
    return %arg0, %c0_i32 : i32, i32
  }
  func.func @transform_1(%arg0: i32) -> (i32, i32) {
    %c0_i32 = arith.constant 0 : i32
    %c0_i32_0 = arith.constant 0 : i32
    %c0_i32_1 = arith.constant 0 : i32
    return %c0_i32, %c0_i32_0 : i32, i32
  }
  func.func @transform_2(%arg0: i32) -> (i32, i32) {
    %c0_i32 = arith.constant 0 : i32
    %c0_i32_0 = arith.constant 0 : i32
    %c0_i32_1 = arith.constant 0 : i32
    return %c0_i32, %c0_i32_0 : i32, i32
  }
  func.func @transform_3(%arg0: i32) -> (i32, i32) {
    %c0_i32 = arith.constant 0 : i32
    %c0_i32_0 = arith.constant 0 : i32
    return %arg0, %c0_i32 : i32, i32
  }
}

module attributes {stable_mosaic.version = 11 : i64} {
  func.func @_matmul_bias_kernel(%arg0: i32, %arg1: memref<512x16xbf16, #tpu.memory_space<vmem>>, %arg2: memref<16x8xbf16, #tpu.memory_space<vmem>>, %arg3: memref<1x8xf32, #tpu.memory_space<vmem>>, %arg4: memref<512x8xbf16, #tpu.memory_space<vmem>>) attributes {dimension_semantics = [#tpu.dimension_semantics<parallel>], iteration_bounds = array<i64: 1>, scalar_prefetch = 0 : i64, scratch_operands = 0 : i64, tpu.core_type = #tpu.core_type<tc>, window_params = [{transform_indices = @transform_0, window_bounds = array<i64: 512, 16>}, {pipeline_mode = #tpu.pipeline_mode<synchronous>, transform_indices = @transform_1, window_bounds = array<i64: 16, 8>}, {pipeline_mode = #tpu.pipeline_mode<synchronous>, transform_indices = @transform_2, window_bounds = array<i64: 1, 8>}, {transform_indices = @transform_3, window_bounds = array<i64: 512, 8>}]} {
    %c0 = arith.constant 0 : index
    %c0_0 = arith.constant 0 : index
    %0 = vector.load %arg1[%c0, %c0_0] : memref<512x16xbf16, #tpu.memory_space<vmem>>, vector<512x16xbf16>
    %c0_1 = arith.constant 0 : index
    %c0_2 = arith.constant 0 : index
    %1 = vector.load %arg2[%c0_1, %c0_2] : memref<16x8xbf16, #tpu.memory_space<vmem>>, vector<16x8xbf16>
    %cst = arith.constant dense<0.000000e+00> : vector<512x8xf32>
    %2 = tpu.matmul %0, %1, %cst {dimension_numbers = #tpu.dot_dimension_numbers<[1], [0], [0], [1], [0, 0, 1, 1], [], []>} : vector<512x16xbf16>, vector<16x8xbf16>, vector<512x8xf32> -> vector<512x8xf32>
    %c0_3 = arith.constant 0 : index
    %c0_4 = arith.constant 0 : index
    %3 = vector.load %arg3[%c0_3, %c0_4] : memref<1x8xf32, #tpu.memory_space<vmem>>, vector<1x8xf32>
    %4 = vector.broadcast %3 : vector<1x8xf32> to vector<512x8xf32>
    %5 = arith.addf %2, %4 : vector<512x8xf32>
    %cst_5 = arith.constant 0.000000e+00 : f32
    %6 = vector.broadcast %cst_5 : f32 to vector<512x8xf32>
    %7 = arith.maximumf %5, %6 : vector<512x8xf32>
    %8 = arith.truncf %7 : vector<512x8xf32> to vector<512x8xbf16>
    %c0_6 = arith.constant 0 : index
    %c0_7 = arith.constant 0 : index
    %9 = vector.load %arg4[%c0_6, %c0_7] : memref<512x8xbf16, #tpu.memory_space<vmem>>, vector<512x8xbf16>
    tpu.vector_store %arg4[%c0_6, %c0_7], %8 {strides = array<i32>} : memref<512x8xbf16, #tpu.memory_space<vmem>>, vector<512x8xbf16>,
    return
  }
  func.func @transform_0(%arg0: i32) -> (i32, i32) {
    %c0_i32 = arith.constant 0 : i32
    %c0_i32_0 = arith.constant 0 : i32
    return %arg0, %c0_i32 : i32, i32
  }
  func.func @transform_1(%arg0: i32) -> (i32, i32) {
    %c0_i32 = arith.constant 0 : i32
    %c0_i32_0 = arith.constant 0 : i32
    %c0_i32_1 = arith.constant 0 : i32
    return %c0_i32, %c0_i32_0 : i32, i32
  }
  func.func @transform_2(%arg0: i32) -> (i32, i32) {
    %c0_i32 = arith.constant 0 : i32
    %c0_i32_0 = arith.constant 0 : i32
    %c0_i32_1 = arith.constant 0 : i32
    return %c0_i32, %c0_i32_0 : i32, i32
  }
  func.func @transform_3(%arg0: i32) -> (i32, i32) {
    %c0_i32 = arith.constant 0 : i32
    %c0_i32_0 = arith.constant 0 : i32
    return %arg0, %c0_i32 : i32, i32
  }
}

module attributes {stable_mosaic.version = 11 : i64} {
  func.func @_se_stage_kernel(%arg0: i32, %arg1: memref<1x256x72xbf16, #tpu.memory_space<vmem>>, %arg2: memref<1x256x16xbf16, #tpu.memory_space<vmem>>, %arg3: memref<72x8xbf16, #tpu.memory_space<vmem>>, %arg4: memref<8x32xbf16, #tpu.memory_space<vmem>>, %arg5: memref<16x32xbf16, #tpu.memory_space<vmem>>, %arg6: memref<32x8xbf16, #tpu.memory_space<vmem>>, %arg7: memref<8x32xbf16, #tpu.memory_space<vmem>>, %arg8: memref<8x32xf32, #tpu.memory_space<vmem>>, %arg9: memref<1x256x32xf32, #tpu.memory_space<vmem>>) attributes {dimension_semantics = [#tpu.dimension_semantics<parallel>], iteration_bounds = array<i64: 2>, scalar_prefetch = 0 : i64, scratch_operands = 0 : i64, tpu.core_type = #tpu.core_type<tc>, window_params = [{transform_indices = @transform_0, window_bounds = array<i64: 1, 256, 72>}, {transform_indices = @transform_1, window_bounds = array<i64: 1, 256, 16>}, {pipeline_mode = #tpu.pipeline_mode<synchronous>, transform_indices = @transform_2, window_bounds = array<i64: 72, 8>}, {pipeline_mode = #tpu.pipeline_mode<synchronous>, transform_indices = @transform_3, window_bounds = array<i64: 8, 32>}, {pipeline_mode = #tpu.pipeline_mode<synchronous>, transform_indices = @transform_4, window_bounds = array<i64: 16, 32>}, {pipeline_mode = #tpu.pipeline_mode<synchronous>, transform_indices = @transform_5, window_bounds = array<i64: 32, 8>}, {pipeline_mode = #tpu.pipeline_mode<synchronous>, transform_indices = @transform_6, window_bounds = array<i64: 8, 32>}, {pipeline_mode = #tpu.pipeline_mode<synchronous>, transform_indices = @transform_7, window_bounds = array<i64: 8, 32>}, {transform_indices = @transform_8, window_bounds = array<i64: 1, 256, 32>}]} {
    %c0 = arith.constant 0 : index
    %c0_0 = arith.constant 0 : index
    %0 = vector.load %arg8[%c0, %c0_0] : memref<8x32xf32, #tpu.memory_space<vmem>>, vector<8x32xf32>
    %1 = vector.extract_strided_slice %0 {offsets = [0, 0], sizes = [1, 8], strides = [1, 1]} : vector<8x32xf32> to vector<1x8xf32>
    %2 = vector.extract_strided_slice %0 {offsets = [1, 0], sizes = [1, 32], strides = [1, 1]} : vector<8x32xf32> to vector<1x32xf32>
    %3 = vector.extract_strided_slice %0 {offsets = [2, 0], sizes = [1, 32], strides = [1, 1]} : vector<8x32xf32> to vector<1x32xf32>
    %4 = vector.extract_strided_slice %0 {offsets = [3, 0], sizes = [1, 8], strides = [1, 1]} : vector<8x32xf32> to vector<1x8xf32>
    %5 = vector.extract_strided_slice %0 {offsets = [4, 0], sizes = [1, 32], strides = [1, 1]} : vector<8x32xf32> to vector<1x32xf32>
    %c0_1 = arith.constant 0 : index
    %c0_2 = arith.constant 0 : index
    %c0_3 = arith.constant 0 : index
    %6 = vector.load %arg1[%c0_1, %c0_2, %c0_3] : memref<1x256x72xbf16, #tpu.memory_space<vmem>>, vector<1x256x72xbf16>
    %7 = vector.shape_cast %6 : vector<1x256x72xbf16> to vector<256x72xbf16>
    %c0_4 = arith.constant 0 : index
    %c0_5 = arith.constant 0 : index
    %8 = vector.load %arg3[%c0_4, %c0_5] : memref<72x8xbf16, #tpu.memory_space<vmem>>, vector<72x8xbf16>
    %cst = arith.constant dense<0.000000e+00> : vector<256x8xf32>
    %9 = tpu.matmul %7, %8, %cst {dimension_numbers = #tpu.dot_dimension_numbers<[1], [0], [0], [1], [0, 0, 1, 1], [], []>} : vector<256x72xbf16>, vector<72x8xbf16>, vector<256x8xf32> -> vector<256x8xf32>
    %10 = vector.broadcast %1 : vector<1x8xf32> to vector<256x8xf32>
    %11 = arith.addf %9, %10 : vector<256x8xf32>
    %cst_6 = arith.constant 0.000000e+00 : f32
    %12 = vector.broadcast %cst_6 : f32 to vector<256x8xf32>
    %13 = arith.maximumf %11, %12 : vector<256x8xf32>
    %14 = arith.truncf %13 : vector<256x8xf32> to vector<256x8xbf16>
    %c0_7 = arith.constant 0 : index
    %c0_8 = arith.constant 0 : index
    %15 = vector.load %arg4[%c0_7, %c0_8] : memref<8x32xbf16, #tpu.memory_space<vmem>>, vector<8x32xbf16>
    %cst_9 = arith.constant dense<0.000000e+00> : vector<256x32xf32>
    %16 = tpu.matmul %14, %15, %cst_9 {dimension_numbers = #tpu.dot_dimension_numbers<[1], [0], [0], [1], [0, 0, 1, 1], [], []>} : vector<256x8xbf16>, vector<8x32xbf16>, vector<256x32xf32> -> vector<256x32xf32>
    %17 = vector.broadcast %2 : vector<1x32xf32> to vector<256x32xf32>
    %18 = arith.addf %16, %17 : vector<256x32xf32>
    %c0_10 = arith.constant 0 : index
    %c0_11 = arith.constant 0 : index
    %c0_12 = arith.constant 0 : index
    %19 = vector.load %arg2[%c0_10, %c0_11, %c0_12] : memref<1x256x16xbf16, #tpu.memory_space<vmem>>, vector<1x256x16xbf16>
    %20 = vector.shape_cast %19 : vector<1x256x16xbf16> to vector<256x16xbf16>
    %c0_13 = arith.constant 0 : index
    %c0_14 = arith.constant 0 : index
    %21 = vector.load %arg5[%c0_13, %c0_14] : memref<16x32xbf16, #tpu.memory_space<vmem>>, vector<16x32xbf16>
    %cst_15 = arith.constant dense<0.000000e+00> : vector<256x32xf32>
    %22 = tpu.matmul %20, %21, %cst_15 {dimension_numbers = #tpu.dot_dimension_numbers<[1], [0], [0], [1], [0, 0, 1, 1], [], []>} : vector<256x16xbf16>, vector<16x32xbf16>, vector<256x32xf32> -> vector<256x32xf32>
    %23 = vector.broadcast %3 : vector<1x32xf32> to vector<256x32xf32>
    %24 = arith.addf %22, %23 : vector<256x32xf32>
    %cst_16 = arith.constant dense<0.000000e+00> : vector<32xf32>
    %25 = vector.multi_reduction <add>, %18, %cst_16 [0] : vector<256x32xf32> to vector<32xf32>
    %26 = vector.shape_cast %25 : vector<32xf32> to vector<1x32xf32>
    %cst_17 = arith.constant 2.560000e+02 : f32
    %27 = vector.broadcast %cst_17 : f32 to vector<1x32xf32>
    %28 = arith.divf %26, %27 : vector<1x32xf32>
    %29 = arith.truncf %28 : vector<1x32xf32> to vector<1x32xbf16>
    %c0_18 = arith.constant 0 : index
    %c0_19 = arith.constant 0 : index
    %30 = vector.load %arg6[%c0_18, %c0_19] : memref<32x8xbf16, #tpu.memory_space<vmem>>, vector<32x8xbf16>
    %cst_20 = arith.constant dense<0.000000e+00> : vector<1x8xf32>
    %31 = tpu.matmul %29, %30, %cst_20 {dimension_numbers = #tpu.dot_dimension_numbers<[1], [0], [0], [1], [0, 0, 1, 1], [], []>} : vector<1x32xbf16>, vector<32x8xbf16>, vector<1x8xf32> -> vector<1x8xf32>
    %32 = arith.addf %31, %4 : vector<1x8xf32>
    %cst_21 = arith.constant 0.000000e+00 : f32
    %33 = vector.broadcast %cst_21 : f32 to vector<1x8xf32>
    %34 = arith.maximumf %32, %33 : vector<1x8xf32>
    %35 = arith.truncf %34 : vector<1x8xf32> to vector<1x8xbf16>
    %c0_22 = arith.constant 0 : index
    %c0_23 = arith.constant 0 : index
    %36 = vector.load %arg7[%c0_22, %c0_23] : memref<8x32xbf16, #tpu.memory_space<vmem>>, vector<8x32xbf16>
    %cst_24 = arith.constant dense<0.000000e+00> : vector<1x32xf32>
    %37 = tpu.matmul %35, %36, %cst_24 {dimension_numbers = #tpu.dot_dimension_numbers<[1], [0], [0], [1], [0, 0, 1, 1], [], []>} : vector<1x8xbf16>, vector<8x32xbf16>, vector<1x32xf32> -> vector<1x32xf32>
    %38 = arith.addf %37, %5 : vector<1x32xf32>
    %cst_25 = arith.constant 0.000000e+00 : f32
    %39 = vector.broadcast %cst_25 : f32 to vector<1x32xf32>
    %40 = arith.subf %39, %38 : vector<1x32xf32>
    %41 = math.exp %40 : vector<1x32xf32>
    %cst_26 = arith.constant 1.000000e+00 : f32
    %42 = vector.broadcast %cst_26 : f32 to vector<1x32xf32>
    %43 = arith.addf %42, %41 : vector<1x32xf32>
    %cst_27 = arith.constant 1.000000e+00 : f32
    %44 = vector.broadcast %cst_27 : f32 to vector<1x32xf32>
    %45 = arith.divf %44, %43 : vector<1x32xf32>
    %46 = vector.broadcast %45 : vector<1x32xf32> to vector<256x32xf32>
    %47 = arith.mulf %18, %46 : vector<256x32xf32>
    %48 = arith.addf %47, %24 : vector<256x32xf32>
    %cst_28 = arith.constant 0.000000e+00 : f32
    %49 = vector.broadcast %cst_28 : f32 to vector<256x32xf32>
    %50 = arith.maximumf %48, %49 : vector<256x32xf32>
    %c0_29 = arith.constant 0 : index
    %c0_30 = arith.constant 0 : index
    %c0_31 = arith.constant 0 : index
    %51 = vector.load %arg9[%c0_29, %c0_30, %c0_31] : memref<1x256x32xf32, #tpu.memory_space<vmem>>, vector<1x256x32xf32>
    %52 = vector.shape_cast %51 : vector<1x256x32xf32> to vector<256x32xf32>
    %53 = vector.shape_cast %50 : vector<256x32xf32> to vector<1x256x32xf32>
    tpu.vector_store %arg9[%c0_29, %c0_30, %c0_31], %53 {strides = array<i32>} : memref<1x256x32xf32, #tpu.memory_space<vmem>>, vector<1x256x32xf32>,
    return
  }
  func.func @transform_0(%arg0: i32) -> (i32, i32, i32) {
    %c0_i32 = arith.constant 0 : i32
    %c0_i32_0 = arith.constant 0 : i32
    %c0_i32_1 = arith.constant 0 : i32
    return %arg0, %c0_i32, %c0_i32_0 : i32, i32, i32
  }
  func.func @transform_1(%arg0: i32) -> (i32, i32, i32) {
    %c0_i32 = arith.constant 0 : i32
    %c0_i32_0 = arith.constant 0 : i32
    %c0_i32_1 = arith.constant 0 : i32
    return %arg0, %c0_i32, %c0_i32_0 : i32, i32, i32
  }
  func.func @transform_2(%arg0: i32) -> (i32, i32) {
    %c0_i32 = arith.constant 0 : i32
    %c0_i32_0 = arith.constant 0 : i32
    %c0_i32_1 = arith.constant 0 : i32
    return %c0_i32, %c0_i32_0 : i32, i32
  }
  func.func @transform_3(%arg0: i32) -> (i32, i32) {
    %c0_i32 = arith.constant 0 : i32
    %c0_i32_0 = arith.constant 0 : i32
    %c0_i32_1 = arith.constant 0 : i32
    return %c0_i32, %c0_i32_0 : i32, i32
  }
  func.func @transform_4(%arg0: i32) -> (i32, i32) {
    %c0_i32 = arith.constant 0 : i32
    %c0_i32_0 = arith.constant 0 : i32
    %c0_i32_1 = arith.constant 0 : i32
    return %c0_i32, %c0_i32_0 : i32, i32
  }
  func.func @transform_5(%arg0: i32) -> (i32, i32) {
    %c0_i32 = arith.constant 0 : i32
    %c0_i32_0 = arith.constant 0 : i32
    %c0_i32_1 = arith.constant 0 : i32
    return %c0_i32, %c0_i32_0 : i32, i32
  }
  func.func @transform_6(%arg0: i32) -> (i32, i32) {
    %c0_i32 = arith.constant 0 : i32
    %c0_i32_0 = arith.constant 0 : i32
    %c0_i32_1 = arith.constant 0 : i32
    return %c0_i32, %c0_i32_0 : i32, i32
  }
  func.func @transform_7(%arg0: i32) -> (i32, i32) {
    %c0_i32 = arith.constant 0 : i32
    %c0_i32_0 = arith.constant 0 : i32
    %c0_i32_1 = arith.constant 0 : i32
    return %c0_i32, %c0_i32_0 : i32, i32
  }
  func.func @transform_8(%arg0: i32) -> (i32, i32, i32) {
    %c0_i32 = arith.constant 0 : i32
    %c0_i32_0 = arith.constant 0 : i32
    %c0_i32_1 = arith.constant 0 : i32
    return %arg0, %c0_i32, %c0_i32_0 : i32, i32, i32
  }
}

module attributes {stable_mosaic.version = 11 : i64} {
  func.func @_matmul_bias_kernel(%arg0: i32, %arg1: memref<512x32xbf16, #tpu.memory_space<vmem>>, %arg2: memref<32x16xbf16, #tpu.memory_space<vmem>>, %arg3: memref<1x16xf32, #tpu.memory_space<vmem>>, %arg4: memref<512x16xbf16, #tpu.memory_space<vmem>>) attributes {dimension_semantics = [#tpu.dimension_semantics<parallel>], iteration_bounds = array<i64: 1>, scalar_prefetch = 0 : i64, scratch_operands = 0 : i64, tpu.core_type = #tpu.core_type<tc>, window_params = [{transform_indices = @transform_0, window_bounds = array<i64: 512, 32>}, {pipeline_mode = #tpu.pipeline_mode<synchronous>, transform_indices = @transform_1, window_bounds = array<i64: 32, 16>}, {pipeline_mode = #tpu.pipeline_mode<synchronous>, transform_indices = @transform_2, window_bounds = array<i64: 1, 16>}, {transform_indices = @transform_3, window_bounds = array<i64: 512, 16>}]} {
    %c0 = arith.constant 0 : index
    %c0_0 = arith.constant 0 : index
    %0 = vector.load %arg1[%c0, %c0_0] : memref<512x32xbf16, #tpu.memory_space<vmem>>, vector<512x32xbf16>
    %c0_1 = arith.constant 0 : index
    %c0_2 = arith.constant 0 : index
    %1 = vector.load %arg2[%c0_1, %c0_2] : memref<32x16xbf16, #tpu.memory_space<vmem>>, vector<32x16xbf16>
    %cst = arith.constant dense<0.000000e+00> : vector<512x16xf32>
    %2 = tpu.matmul %0, %1, %cst {dimension_numbers = #tpu.dot_dimension_numbers<[1], [0], [0], [1], [0, 0, 1, 1], [], []>} : vector<512x32xbf16>, vector<32x16xbf16>, vector<512x16xf32> -> vector<512x16xf32>
    %c0_3 = arith.constant 0 : index
    %c0_4 = arith.constant 0 : index
    %3 = vector.load %arg3[%c0_3, %c0_4] : memref<1x16xf32, #tpu.memory_space<vmem>>, vector<1x16xf32>
    %4 = vector.broadcast %3 : vector<1x16xf32> to vector<512x16xf32>
    %5 = arith.addf %2, %4 : vector<512x16xf32>
    %cst_5 = arith.constant 0.000000e+00 : f32
    %6 = vector.broadcast %cst_5 : f32 to vector<512x16xf32>
    %7 = arith.maximumf %5, %6 : vector<512x16xf32>
    %8 = arith.truncf %7 : vector<512x16xf32> to vector<512x16xbf16>
    %c0_6 = arith.constant 0 : index
    %c0_7 = arith.constant 0 : index
    %9 = vector.load %arg4[%c0_6, %c0_7] : memref<512x16xbf16, #tpu.memory_space<vmem>>, vector<512x16xbf16>
    tpu.vector_store %arg4[%c0_6, %c0_7], %8 {strides = array<i32>} : memref<512x16xbf16, #tpu.memory_space<vmem>>, vector<512x16xbf16>,
    return
  }
  func.func @transform_0(%arg0: i32) -> (i32, i32) {
    %c0_i32 = arith.constant 0 : i32
    %c0_i32_0 = arith.constant 0 : i32
    return %arg0, %c0_i32 : i32, i32
  }
  func.func @transform_1(%arg0: i32) -> (i32, i32) {
    %c0_i32 = arith.constant 0 : i32
    %c0_i32_0 = arith.constant 0 : i32
    %c0_i32_1 = arith.constant 0 : i32
    return %c0_i32, %c0_i32_0 : i32, i32
  }
  func.func @transform_2(%arg0: i32) -> (i32, i32) {
    %c0_i32 = arith.constant 0 : i32
    %c0_i32_0 = arith.constant 0 : i32
    %c0_i32_1 = arith.constant 0 : i32
    return %c0_i32, %c0_i32_0 : i32, i32
  }
  func.func @transform_3(%arg0: i32) -> (i32, i32) {
    %c0_i32 = arith.constant 0 : i32
    %c0_i32_0 = arith.constant 0 : i32
    return %arg0, %c0_i32 : i32, i32
  }
}

module attributes {stable_mosaic.version = 11 : i64} {
  func.func @_se_stage_kernel(%arg0: i32, %arg1: memref<1x64x144xbf16, #tpu.memory_space<vmem>>, %arg2: memref<1x64x32xbf16, #tpu.memory_space<vmem>>, %arg3: memref<144x16xbf16, #tpu.memory_space<vmem>>, %arg4: memref<16x64xbf16, #tpu.memory_space<vmem>>, %arg5: memref<32x64xbf16, #tpu.memory_space<vmem>>, %arg6: memref<64x16xbf16, #tpu.memory_space<vmem>>, %arg7: memref<16x64xbf16, #tpu.memory_space<vmem>>, %arg8: memref<8x64xf32, #tpu.memory_space<vmem>>, %arg9: memref<1x64x64xf32, #tpu.memory_space<vmem>>) attributes {dimension_semantics = [#tpu.dimension_semantics<parallel>], iteration_bounds = array<i64: 2>, scalar_prefetch = 0 : i64, scratch_operands = 0 : i64, tpu.core_type = #tpu.core_type<tc>, window_params = [{transform_indices = @transform_0, window_bounds = array<i64: 1, 64, 144>}, {transform_indices = @transform_1, window_bounds = array<i64: 1, 64, 32>}, {pipeline_mode = #tpu.pipeline_mode<synchronous>, transform_indices = @transform_2, window_bounds = array<i64: 144, 16>}, {pipeline_mode = #tpu.pipeline_mode<synchronous>, transform_indices = @transform_3, window_bounds = array<i64: 16, 64>}, {pipeline_mode = #tpu.pipeline_mode<synchronous>, transform_indices = @transform_4, window_bounds = array<i64: 32, 64>}, {pipeline_mode = #tpu.pipeline_mode<synchronous>, transform_indices = @transform_5, window_bounds = array<i64: 64, 16>}, {pipeline_mode = #tpu.pipeline_mode<synchronous>, transform_indices = @transform_6, window_bounds = array<i64: 16, 64>}, {pipeline_mode = #tpu.pipeline_mode<synchronous>, transform_indices = @transform_7, window_bounds = array<i64: 8, 64>}, {transform_indices = @transform_8, window_bounds = array<i64: 1, 64, 64>}]} {
    %c0 = arith.constant 0 : index
    %c0_0 = arith.constant 0 : index
    %0 = vector.load %arg8[%c0, %c0_0] : memref<8x64xf32, #tpu.memory_space<vmem>>, vector<8x64xf32>
    %1 = vector.extract_strided_slice %0 {offsets = [0, 0], sizes = [1, 16], strides = [1, 1]} : vector<8x64xf32> to vector<1x16xf32>
    %2 = vector.extract_strided_slice %0 {offsets = [1, 0], sizes = [1, 64], strides = [1, 1]} : vector<8x64xf32> to vector<1x64xf32>
    %3 = vector.extract_strided_slice %0 {offsets = [2, 0], sizes = [1, 64], strides = [1, 1]} : vector<8x64xf32> to vector<1x64xf32>
    %4 = vector.extract_strided_slice %0 {offsets = [3, 0], sizes = [1, 16], strides = [1, 1]} : vector<8x64xf32> to vector<1x16xf32>
    %5 = vector.extract_strided_slice %0 {offsets = [4, 0], sizes = [1, 64], strides = [1, 1]} : vector<8x64xf32> to vector<1x64xf32>
    %c0_1 = arith.constant 0 : index
    %c0_2 = arith.constant 0 : index
    %c0_3 = arith.constant 0 : index
    %6 = vector.load %arg1[%c0_1, %c0_2, %c0_3] : memref<1x64x144xbf16, #tpu.memory_space<vmem>>, vector<1x64x144xbf16>
    %7 = vector.shape_cast %6 : vector<1x64x144xbf16> to vector<64x144xbf16>
    %c0_4 = arith.constant 0 : index
    %c0_5 = arith.constant 0 : index
    %8 = vector.load %arg3[%c0_4, %c0_5] : memref<144x16xbf16, #tpu.memory_space<vmem>>, vector<144x16xbf16>
    %cst = arith.constant dense<0.000000e+00> : vector<64x16xf32>
    %9 = tpu.matmul %7, %8, %cst {dimension_numbers = #tpu.dot_dimension_numbers<[1], [0], [0], [1], [0, 0, 1, 1], [], []>} : vector<64x144xbf16>, vector<144x16xbf16>, vector<64x16xf32> -> vector<64x16xf32>
    %10 = vector.broadcast %1 : vector<1x16xf32> to vector<64x16xf32>
    %11 = arith.addf %9, %10 : vector<64x16xf32>
    %cst_6 = arith.constant 0.000000e+00 : f32
    %12 = vector.broadcast %cst_6 : f32 to vector<64x16xf32>
    %13 = arith.maximumf %11, %12 : vector<64x16xf32>
    %14 = arith.truncf %13 : vector<64x16xf32> to vector<64x16xbf16>
    %c0_7 = arith.constant 0 : index
    %c0_8 = arith.constant 0 : index
    %15 = vector.load %arg4[%c0_7, %c0_8] : memref<16x64xbf16, #tpu.memory_space<vmem>>, vector<16x64xbf16>
    %cst_9 = arith.constant dense<0.000000e+00> : vector<64x64xf32>
    %16 = tpu.matmul %14, %15, %cst_9 {dimension_numbers = #tpu.dot_dimension_numbers<[1], [0], [0], [1], [0, 0, 1, 1], [], []>} : vector<64x16xbf16>, vector<16x64xbf16>, vector<64x64xf32> -> vector<64x64xf32>
    %17 = vector.broadcast %2 : vector<1x64xf32> to vector<64x64xf32>
    %18 = arith.addf %16, %17 : vector<64x64xf32>
    %c0_10 = arith.constant 0 : index
    %c0_11 = arith.constant 0 : index
    %c0_12 = arith.constant 0 : index
    %19 = vector.load %arg2[%c0_10, %c0_11, %c0_12] : memref<1x64x32xbf16, #tpu.memory_space<vmem>>, vector<1x64x32xbf16>
    %20 = vector.shape_cast %19 : vector<1x64x32xbf16> to vector<64x32xbf16>
    %c0_13 = arith.constant 0 : index
    %c0_14 = arith.constant 0 : index
    %21 = vector.load %arg5[%c0_13, %c0_14] : memref<32x64xbf16, #tpu.memory_space<vmem>>, vector<32x64xbf16>
    %cst_15 = arith.constant dense<0.000000e+00> : vector<64x64xf32>
    %22 = tpu.matmul %20, %21, %cst_15 {dimension_numbers = #tpu.dot_dimension_numbers<[1], [0], [0], [1], [0, 0, 1, 1], [], []>} : vector<64x32xbf16>, vector<32x64xbf16>, vector<64x64xf32> -> vector<64x64xf32>
    %23 = vector.broadcast %3 : vector<1x64xf32> to vector<64x64xf32>
    %24 = arith.addf %22, %23 : vector<64x64xf32>
    %cst_16 = arith.constant dense<0.000000e+00> : vector<64xf32>
    %25 = vector.multi_reduction <add>, %18, %cst_16 [0] : vector<64x64xf32> to vector<64xf32>
    %26 = vector.shape_cast %25 : vector<64xf32> to vector<1x64xf32>
    %cst_17 = arith.constant 6.400000e+01 : f32
    %27 = vector.broadcast %cst_17 : f32 to vector<1x64xf32>
    %28 = arith.divf %26, %27 : vector<1x64xf32>
    %29 = arith.truncf %28 : vector<1x64xf32> to vector<1x64xbf16>
    %c0_18 = arith.constant 0 : index
    %c0_19 = arith.constant 0 : index
    %30 = vector.load %arg6[%c0_18, %c0_19] : memref<64x16xbf16, #tpu.memory_space<vmem>>, vector<64x16xbf16>
    %cst_20 = arith.constant dense<0.000000e+00> : vector<1x16xf32>
    %31 = tpu.matmul %29, %30, %cst_20 {dimension_numbers = #tpu.dot_dimension_numbers<[1], [0], [0], [1], [0, 0, 1, 1], [], []>} : vector<1x64xbf16>, vector<64x16xbf16>, vector<1x16xf32> -> vector<1x16xf32>
    %32 = arith.addf %31, %4 : vector<1x16xf32>
    %cst_21 = arith.constant 0.000000e+00 : f32
    %33 = vector.broadcast %cst_21 : f32 to vector<1x16xf32>
    %34 = arith.maximumf %32, %33 : vector<1x16xf32>
    %35 = arith.truncf %34 : vector<1x16xf32> to vector<1x16xbf16>
    %c0_22 = arith.constant 0 : index
    %c0_23 = arith.constant 0 : index
    %36 = vector.load %arg7[%c0_22, %c0_23] : memref<16x64xbf16, #tpu.memory_space<vmem>>, vector<16x64xbf16>
    %cst_24 = arith.constant dense<0.000000e+00> : vector<1x64xf32>
    %37 = tpu.matmul %35, %36, %cst_24 {dimension_numbers = #tpu.dot_dimension_numbers<[1], [0], [0], [1], [0, 0, 1, 1], [], []>} : vector<1x16xbf16>, vector<16x64xbf16>, vector<1x64xf32> -> vector<1x64xf32>
    %38 = arith.addf %37, %5 : vector<1x64xf32>
    %cst_25 = arith.constant 0.000000e+00 : f32
    %39 = vector.broadcast %cst_25 : f32 to vector<1x64xf32>
    %40 = arith.subf %39, %38 : vector<1x64xf32>
    %41 = math.exp %40 : vector<1x64xf32>
    %cst_26 = arith.constant 1.000000e+00 : f32
    %42 = vector.broadcast %cst_26 : f32 to vector<1x64xf32>
    %43 = arith.addf %42, %41 : vector<1x64xf32>
    %cst_27 = arith.constant 1.000000e+00 : f32
    %44 = vector.broadcast %cst_27 : f32 to vector<1x64xf32>
    %45 = arith.divf %44, %43 : vector<1x64xf32>
    %46 = vector.broadcast %45 : vector<1x64xf32> to vector<64x64xf32>
    %47 = arith.mulf %18, %46 : vector<64x64xf32>
    %48 = arith.addf %47, %24 : vector<64x64xf32>
    %cst_28 = arith.constant 0.000000e+00 : f32
    %49 = vector.broadcast %cst_28 : f32 to vector<64x64xf32>
    %50 = arith.maximumf %48, %49 : vector<64x64xf32>
    %c0_29 = arith.constant 0 : index
    %c0_30 = arith.constant 0 : index
    %c0_31 = arith.constant 0 : index
    %51 = vector.load %arg9[%c0_29, %c0_30, %c0_31] : memref<1x64x64xf32, #tpu.memory_space<vmem>>, vector<1x64x64xf32>
    %52 = vector.shape_cast %51 : vector<1x64x64xf32> to vector<64x64xf32>
    %53 = vector.shape_cast %50 : vector<64x64xf32> to vector<1x64x64xf32>
    tpu.vector_store %arg9[%c0_29, %c0_30, %c0_31], %53 {strides = array<i32>} : memref<1x64x64xf32, #tpu.memory_space<vmem>>, vector<1x64x64xf32>,
    return
  }
  func.func @transform_0(%arg0: i32) -> (i32, i32, i32) {
    %c0_i32 = arith.constant 0 : i32
    %c0_i32_0 = arith.constant 0 : i32
    %c0_i32_1 = arith.constant 0 : i32
    return %arg0, %c0_i32, %c0_i32_0 : i32, i32, i32
  }
  func.func @transform_1(%arg0: i32) -> (i32, i32, i32) {
    %c0_i32 = arith.constant 0 : i32
    %c0_i32_0 = arith.constant 0 : i32
    %c0_i32_1 = arith.constant 0 : i32
    return %arg0, %c0_i32, %c0_i32_0 : i32, i32, i32
  }
  func.func @transform_2(%arg0: i32) -> (i32, i32) {
    %c0_i32 = arith.constant 0 : i32
    %c0_i32_0 = arith.constant 0 : i32
    %c0_i32_1 = arith.constant 0 : i32
    return %c0_i32, %c0_i32_0 : i32, i32
  }
  func.func @transform_3(%arg0: i32) -> (i32, i32) {
    %c0_i32 = arith.constant 0 : i32
    %c0_i32_0 = arith.constant 0 : i32
    %c0_i32_1 = arith.constant 0 : i32
    return %c0_i32, %c0_i32_0 : i32, i32
  }
  func.func @transform_4(%arg0: i32) -> (i32, i32) {
    %c0_i32 = arith.constant 0 : i32
    %c0_i32_0 = arith.constant 0 : i32
    %c0_i32_1 = arith.constant 0 : i32
    return %c0_i32, %c0_i32_0 : i32, i32
  }
  func.func @transform_5(%arg0: i32) -> (i32, i32) {
    %c0_i32 = arith.constant 0 : i32
    %c0_i32_0 = arith.constant 0 : i32
    %c0_i32_1 = arith.constant 0 : i32
    return %c0_i32, %c0_i32_0 : i32, i32
  }
  func.func @transform_6(%arg0: i32) -> (i32, i32) {
    %c0_i32 = arith.constant 0 : i32
    %c0_i32_0 = arith.constant 0 : i32
    %c0_i32_1 = arith.constant 0 : i32
    return %c0_i32, %c0_i32_0 : i32, i32
  }
  func.func @transform_7(%arg0: i32) -> (i32, i32) {
    %c0_i32 = arith.constant 0 : i32
    %c0_i32_0 = arith.constant 0 : i32
    %c0_i32_1 = arith.constant 0 : i32
    return %c0_i32, %c0_i32_0 : i32, i32
  }
  func.func @transform_8(%arg0: i32) -> (i32, i32, i32) {
    %c0_i32 = arith.constant 0 : i32
    %c0_i32_0 = arith.constant 0 : i32
    %c0_i32_1 = arith.constant 0 : i32
    return %arg0, %c0_i32, %c0_i32_0 : i32, i32, i32
  }
}

module attributes {stable_mosaic.version = 11 : i64} {
  func.func @_matmul_bias_kernel(%arg0: i32, %arg1: memref<128x64xbf16, #tpu.memory_space<vmem>>, %arg2: memref<64x32xbf16, #tpu.memory_space<vmem>>, %arg3: memref<1x32xf32, #tpu.memory_space<vmem>>, %arg4: memref<128x32xbf16, #tpu.memory_space<vmem>>) attributes {dimension_semantics = [#tpu.dimension_semantics<parallel>], iteration_bounds = array<i64: 1>, scalar_prefetch = 0 : i64, scratch_operands = 0 : i64, tpu.core_type = #tpu.core_type<tc>, window_params = [{transform_indices = @transform_0, window_bounds = array<i64: 128, 64>}, {pipeline_mode = #tpu.pipeline_mode<synchronous>, transform_indices = @transform_1, window_bounds = array<i64: 64, 32>}, {pipeline_mode = #tpu.pipeline_mode<synchronous>, transform_indices = @transform_2, window_bounds = array<i64: 1, 32>}, {transform_indices = @transform_3, window_bounds = array<i64: 128, 32>}]} {
    %c0 = arith.constant 0 : index
    %c0_0 = arith.constant 0 : index
    %0 = vector.load %arg1[%c0, %c0_0] : memref<128x64xbf16, #tpu.memory_space<vmem>>, vector<128x64xbf16>
    %c0_1 = arith.constant 0 : index
    %c0_2 = arith.constant 0 : index
    %1 = vector.load %arg2[%c0_1, %c0_2] : memref<64x32xbf16, #tpu.memory_space<vmem>>, vector<64x32xbf16>
    %cst = arith.constant dense<0.000000e+00> : vector<128x32xf32>
    %2 = tpu.matmul %0, %1, %cst {dimension_numbers = #tpu.dot_dimension_numbers<[1], [0], [0], [1], [0, 0, 1, 1], [], []>} : vector<128x64xbf16>, vector<64x32xbf16>, vector<128x32xf32> -> vector<128x32xf32>
    %c0_3 = arith.constant 0 : index
    %c0_4 = arith.constant 0 : index
    %3 = vector.load %arg3[%c0_3, %c0_4] : memref<1x32xf32, #tpu.memory_space<vmem>>, vector<1x32xf32>
    %4 = vector.broadcast %3 : vector<1x32xf32> to vector<128x32xf32>
    %5 = arith.addf %2, %4 : vector<128x32xf32>
    %cst_5 = arith.constant 0.000000e+00 : f32
    %6 = vector.broadcast %cst_5 : f32 to vector<128x32xf32>
    %7 = arith.maximumf %5, %6 : vector<128x32xf32>
    %8 = arith.truncf %7 : vector<128x32xf32> to vector<128x32xbf16>
    %c0_6 = arith.constant 0 : index
    %c0_7 = arith.constant 0 : index
    %9 = vector.load %arg4[%c0_6, %c0_7] : memref<128x32xbf16, #tpu.memory_space<vmem>>, vector<128x32xbf16>
    tpu.vector_store %arg4[%c0_6, %c0_7], %8 {strides = array<i32>} : memref<128x32xbf16, #tpu.memory_space<vmem>>, vector<128x32xbf16>,
    return
  }
  func.func @transform_0(%arg0: i32) -> (i32, i32) {
    %c0_i32 = arith.constant 0 : i32
    %c0_i32_0 = arith.constant 0 : i32
    return %arg0, %c0_i32 : i32, i32
  }
  func.func @transform_1(%arg0: i32) -> (i32, i32) {
    %c0_i32 = arith.constant 0 : i32
    %c0_i32_0 = arith.constant 0 : i32
    %c0_i32_1 = arith.constant 0 : i32
    return %c0_i32, %c0_i32_0 : i32, i32
  }
  func.func @transform_2(%arg0: i32) -> (i32, i32) {
    %c0_i32 = arith.constant 0 : i32
    %c0_i32_0 = arith.constant 0 : i32
    %c0_i32_1 = arith.constant 0 : i32
    return %c0_i32, %c0_i32_0 : i32, i32
  }
  func.func @transform_3(%arg0: i32) -> (i32, i32) {
    %c0_i32 = arith.constant 0 : i32
    %c0_i32_0 = arith.constant 0 : i32
    return %arg0, %c0_i32 : i32, i32
  }
}

module attributes {stable_mosaic.version = 11 : i64} {
  func.func @_se_stage_kernel(%arg0: i32, %arg1: memref<1x16x288xbf16, #tpu.memory_space<vmem>>, %arg2: memref<1x16x64xbf16, #tpu.memory_space<vmem>>, %arg3: memref<288x32xbf16, #tpu.memory_space<vmem>>, %arg4: memref<32x128xbf16, #tpu.memory_space<vmem>>, %arg5: memref<64x128xbf16, #tpu.memory_space<vmem>>, %arg6: memref<128x32xbf16, #tpu.memory_space<vmem>>, %arg7: memref<32x128xbf16, #tpu.memory_space<vmem>>, %arg8: memref<8x128xf32, #tpu.memory_space<vmem>>, %arg9: memref<1x16x128xf32, #tpu.memory_space<vmem>>) attributes {dimension_semantics = [#tpu.dimension_semantics<parallel>], iteration_bounds = array<i64: 2>, scalar_prefetch = 0 : i64, scratch_operands = 0 : i64, tpu.core_type = #tpu.core_type<tc>, window_params = [{transform_indices = @transform_0, window_bounds = array<i64: 1, 16, 288>}, {transform_indices = @transform_1, window_bounds = array<i64: 1, 16, 64>}, {pipeline_mode = #tpu.pipeline_mode<synchronous>, transform_indices = @transform_2, window_bounds = array<i64: 288, 32>}, {pipeline_mode = #tpu.pipeline_mode<synchronous>, transform_indices = @transform_3, window_bounds = array<i64: 32, 128>}, {pipeline_mode = #tpu.pipeline_mode<synchronous>, transform_indices = @transform_4, window_bounds = array<i64: 64, 128>}, {pipeline_mode = #tpu.pipeline_mode<synchronous>, transform_indices = @transform_5, window_bounds = array<i64: 128, 32>}, {pipeline_mode = #tpu.pipeline_mode<synchronous>, transform_indices = @transform_6, window_bounds = array<i64: 32, 128>}, {pipeline_mode = #tpu.pipeline_mode<synchronous>, transform_indices = @transform_7, window_bounds = array<i64: 8, 128>}, {transform_indices = @transform_8, window_bounds = array<i64: 1, 16, 128>}]} {
    %c0 = arith.constant 0 : index
    %c0_0 = arith.constant 0 : index
    %0 = vector.load %arg8[%c0, %c0_0] : memref<8x128xf32, #tpu.memory_space<vmem>>, vector<8x128xf32>
    %1 = vector.extract_strided_slice %0 {offsets = [0, 0], sizes = [1, 32], strides = [1, 1]} : vector<8x128xf32> to vector<1x32xf32>
    %2 = vector.extract_strided_slice %0 {offsets = [1, 0], sizes = [1, 128], strides = [1, 1]} : vector<8x128xf32> to vector<1x128xf32>
    %3 = vector.extract_strided_slice %0 {offsets = [2, 0], sizes = [1, 128], strides = [1, 1]} : vector<8x128xf32> to vector<1x128xf32>
    %4 = vector.extract_strided_slice %0 {offsets = [3, 0], sizes = [1, 32], strides = [1, 1]} : vector<8x128xf32> to vector<1x32xf32>
    %5 = vector.extract_strided_slice %0 {offsets = [4, 0], sizes = [1, 128], strides = [1, 1]} : vector<8x128xf32> to vector<1x128xf32>
    %c0_1 = arith.constant 0 : index
    %c0_2 = arith.constant 0 : index
    %c0_3 = arith.constant 0 : index
    %6 = vector.load %arg1[%c0_1, %c0_2, %c0_3] : memref<1x16x288xbf16, #tpu.memory_space<vmem>>, vector<1x16x288xbf16>
    %7 = vector.shape_cast %6 : vector<1x16x288xbf16> to vector<16x288xbf16>
    %c0_4 = arith.constant 0 : index
    %c0_5 = arith.constant 0 : index
    %8 = vector.load %arg3[%c0_4, %c0_5] : memref<288x32xbf16, #tpu.memory_space<vmem>>, vector<288x32xbf16>
    %cst = arith.constant dense<0.000000e+00> : vector<16x32xf32>
    %9 = tpu.matmul %7, %8, %cst {dimension_numbers = #tpu.dot_dimension_numbers<[1], [0], [0], [1], [0, 0, 1, 1], [], []>} : vector<16x288xbf16>, vector<288x32xbf16>, vector<16x32xf32> -> vector<16x32xf32>
    %10 = vector.broadcast %1 : vector<1x32xf32> to vector<16x32xf32>
    %11 = arith.addf %9, %10 : vector<16x32xf32>
    %cst_6 = arith.constant 0.000000e+00 : f32
    %12 = vector.broadcast %cst_6 : f32 to vector<16x32xf32>
    %13 = arith.maximumf %11, %12 : vector<16x32xf32>
    %14 = arith.truncf %13 : vector<16x32xf32> to vector<16x32xbf16>
    %c0_7 = arith.constant 0 : index
    %c0_8 = arith.constant 0 : index
    %15 = vector.load %arg4[%c0_7, %c0_8] : memref<32x128xbf16, #tpu.memory_space<vmem>>, vector<32x128xbf16>
    %cst_9 = arith.constant dense<0.000000e+00> : vector<16x128xf32>
    %16 = tpu.matmul %14, %15, %cst_9 {dimension_numbers = #tpu.dot_dimension_numbers<[1], [0], [0], [1], [0, 0, 1, 1], [], []>} : vector<16x32xbf16>, vector<32x128xbf16>, vector<16x128xf32> -> vector<16x128xf32>
    %17 = vector.broadcast %2 : vector<1x128xf32> to vector<16x128xf32>
    %18 = arith.addf %16, %17 : vector<16x128xf32>
    %c0_10 = arith.constant 0 : index
    %c0_11 = arith.constant 0 : index
    %c0_12 = arith.constant 0 : index
    %19 = vector.load %arg2[%c0_10, %c0_11, %c0_12] : memref<1x16x64xbf16, #tpu.memory_space<vmem>>, vector<1x16x64xbf16>
    %20 = vector.shape_cast %19 : vector<1x16x64xbf16> to vector<16x64xbf16>
    %c0_13 = arith.constant 0 : index
    %c0_14 = arith.constant 0 : index
    %21 = vector.load %arg5[%c0_13, %c0_14] : memref<64x128xbf16, #tpu.memory_space<vmem>>, vector<64x128xbf16>
    %cst_15 = arith.constant dense<0.000000e+00> : vector<16x128xf32>
    %22 = tpu.matmul %20, %21, %cst_15 {dimension_numbers = #tpu.dot_dimension_numbers<[1], [0], [0], [1], [0, 0, 1, 1], [], []>} : vector<16x64xbf16>, vector<64x128xbf16>, vector<16x128xf32> -> vector<16x128xf32>
    %23 = vector.broadcast %3 : vector<1x128xf32> to vector<16x128xf32>
    %24 = arith.addf %22, %23 : vector<16x128xf32>
    %cst_16 = arith.constant dense<0.000000e+00> : vector<128xf32>
    %25 = vector.multi_reduction <add>, %18, %cst_16 [0] : vector<16x128xf32> to vector<128xf32>
    %26 = vector.shape_cast %25 : vector<128xf32> to vector<1x128xf32>
    %cst_17 = arith.constant 1.600000e+01 : f32
    %27 = vector.broadcast %cst_17 : f32 to vector<1x128xf32>
    %28 = arith.divf %26, %27 : vector<1x128xf32>
    %29 = arith.truncf %28 : vector<1x128xf32> to vector<1x128xbf16>
    %c0_18 = arith.constant 0 : index
    %c0_19 = arith.constant 0 : index
    %30 = vector.load %arg6[%c0_18, %c0_19] : memref<128x32xbf16, #tpu.memory_space<vmem>>, vector<128x32xbf16>
    %cst_20 = arith.constant dense<0.000000e+00> : vector<1x32xf32>
    %31 = tpu.matmul %29, %30, %cst_20 {dimension_numbers = #tpu.dot_dimension_numbers<[1], [0], [0], [1], [0, 0, 1, 1], [], []>} : vector<1x128xbf16>, vector<128x32xbf16>, vector<1x32xf32> -> vector<1x32xf32>
    %32 = arith.addf %31, %4 : vector<1x32xf32>
    %cst_21 = arith.constant 0.000000e+00 : f32
    %33 = vector.broadcast %cst_21 : f32 to vector<1x32xf32>
    %34 = arith.maximumf %32, %33 : vector<1x32xf32>
    %35 = arith.truncf %34 : vector<1x32xf32> to vector<1x32xbf16>
    %c0_22 = arith.constant 0 : index
    %c0_23 = arith.constant 0 : index
    %36 = vector.load %arg7[%c0_22, %c0_23] : memref<32x128xbf16, #tpu.memory_space<vmem>>, vector<32x128xbf16>
    %cst_24 = arith.constant dense<0.000000e+00> : vector<1x128xf32>
    %37 = tpu.matmul %35, %36, %cst_24 {dimension_numbers = #tpu.dot_dimension_numbers<[1], [0], [0], [1], [0, 0, 1, 1], [], []>} : vector<1x32xbf16>, vector<32x128xbf16>, vector<1x128xf32> -> vector<1x128xf32>
    %38 = arith.addf %37, %5 : vector<1x128xf32>
    %cst_25 = arith.constant 0.000000e+00 : f32
    %39 = vector.broadcast %cst_25 : f32 to vector<1x128xf32>
    %40 = arith.subf %39, %38 : vector<1x128xf32>
    %41 = math.exp %40 : vector<1x128xf32>
    %cst_26 = arith.constant 1.000000e+00 : f32
    %42 = vector.broadcast %cst_26 : f32 to vector<1x128xf32>
    %43 = arith.addf %42, %41 : vector<1x128xf32>
    %cst_27 = arith.constant 1.000000e+00 : f32
    %44 = vector.broadcast %cst_27 : f32 to vector<1x128xf32>
    %45 = arith.divf %44, %43 : vector<1x128xf32>
    %46 = vector.broadcast %45 : vector<1x128xf32> to vector<16x128xf32>
    %47 = arith.mulf %18, %46 : vector<16x128xf32>
    %48 = arith.addf %47, %24 : vector<16x128xf32>
    %cst_28 = arith.constant 0.000000e+00 : f32
    %49 = vector.broadcast %cst_28 : f32 to vector<16x128xf32>
    %50 = arith.maximumf %48, %49 : vector<16x128xf32>
    %c0_29 = arith.constant 0 : index
    %c0_30 = arith.constant 0 : index
    %c0_31 = arith.constant 0 : index
    %51 = vector.load %arg9[%c0_29, %c0_30, %c0_31] : memref<1x16x128xf32, #tpu.memory_space<vmem>>, vector<1x16x128xf32>
    %52 = vector.shape_cast %51 : vector<1x16x128xf32> to vector<16x128xf32>
    %53 = vector.shape_cast %50 : vector<16x128xf32> to vector<1x16x128xf32>
    tpu.vector_store %arg9[%c0_29, %c0_30, %c0_31], %53 {strides = array<i32>} : memref<1x16x128xf32, #tpu.memory_space<vmem>>, vector<1x16x128xf32>,
    return
  }
  func.func @transform_0(%arg0: i32) -> (i32, i32, i32) {
    %c0_i32 = arith.constant 0 : i32
    %c0_i32_0 = arith.constant 0 : i32
    %c0_i32_1 = arith.constant 0 : i32
    return %arg0, %c0_i32, %c0_i32_0 : i32, i32, i32
  }
  func.func @transform_1(%arg0: i32) -> (i32, i32, i32) {
    %c0_i32 = arith.constant 0 : i32
    %c0_i32_0 = arith.constant 0 : i32
    %c0_i32_1 = arith.constant 0 : i32
    return %arg0, %c0_i32, %c0_i32_0 : i32, i32, i32
  }
  func.func @transform_2(%arg0: i32) -> (i32, i32) {
    %c0_i32 = arith.constant 0 : i32
    %c0_i32_0 = arith.constant 0 : i32
    %c0_i32_1 = arith.constant 0 : i32
    return %c0_i32, %c0_i32_0 : i32, i32
  }
  func.func @transform_3(%arg0: i32) -> (i32, i32) {
    %c0_i32 = arith.constant 0 : i32
    %c0_i32_0 = arith.constant 0 : i32
    %c0_i32_1 = arith.constant 0 : i32
    return %c0_i32, %c0_i32_0 : i32, i32
  }
  func.func @transform_4(%arg0: i32) -> (i32, i32) {
    %c0_i32 = arith.constant 0 : i32
    %c0_i32_0 = arith.constant 0 : i32
    %c0_i32_1 = arith.constant 0 : i32
    return %c0_i32, %c0_i32_0 : i32, i32
  }
  func.func @transform_5(%arg0: i32) -> (i32, i32) {
    %c0_i32 = arith.constant 0 : i32
    %c0_i32_0 = arith.constant 0 : i32
    %c0_i32_1 = arith.constant 0 : i32
    return %c0_i32, %c0_i32_0 : i32, i32
  }
  func.func @transform_6(%arg0: i32) -> (i32, i32) {
    %c0_i32 = arith.constant 0 : i32
    %c0_i32_0 = arith.constant 0 : i32
    %c0_i32_1 = arith.constant 0 : i32
    return %c0_i32, %c0_i32_0 : i32, i32
  }
  func.func @transform_7(%arg0: i32) -> (i32, i32) {
    %c0_i32 = arith.constant 0 : i32
    %c0_i32_0 = arith.constant 0 : i32
    %c0_i32_1 = arith.constant 0 : i32
    return %c0_i32, %c0_i32_0 : i32, i32
  }
  func.func @transform_8(%arg0: i32) -> (i32, i32, i32) {
    %c0_i32 = arith.constant 0 : i32
    %c0_i32_0 = arith.constant 0 : i32
    %c0_i32_1 = arith.constant 0 : i32
    return %arg0, %c0_i32, %c0_i32_0 : i32, i32, i32
  }
}

module attributes {stable_mosaic.version = 11 : i64} {
  func.func @_matmul_bias_kernel(%arg0: i32, %arg1: memref<32x128xbf16, #tpu.memory_space<vmem>>, %arg2: memref<128x64xbf16, #tpu.memory_space<vmem>>, %arg3: memref<1x64xf32, #tpu.memory_space<vmem>>, %arg4: memref<32x64xbf16, #tpu.memory_space<vmem>>) attributes {dimension_semantics = [#tpu.dimension_semantics<parallel>], iteration_bounds = array<i64: 1>, scalar_prefetch = 0 : i64, scratch_operands = 0 : i64, tpu.core_type = #tpu.core_type<tc>, window_params = [{transform_indices = @transform_0, window_bounds = array<i64: 32, 128>}, {pipeline_mode = #tpu.pipeline_mode<synchronous>, transform_indices = @transform_1, window_bounds = array<i64: 128, 64>}, {pipeline_mode = #tpu.pipeline_mode<synchronous>, transform_indices = @transform_2, window_bounds = array<i64: 1, 64>}, {transform_indices = @transform_3, window_bounds = array<i64: 32, 64>}]} {
    %c0 = arith.constant 0 : index
    %c0_0 = arith.constant 0 : index
    %0 = vector.load %arg1[%c0, %c0_0] : memref<32x128xbf16, #tpu.memory_space<vmem>>, vector<32x128xbf16>
    %c0_1 = arith.constant 0 : index
    %c0_2 = arith.constant 0 : index
    %1 = vector.load %arg2[%c0_1, %c0_2] : memref<128x64xbf16, #tpu.memory_space<vmem>>, vector<128x64xbf16>
    %cst = arith.constant dense<0.000000e+00> : vector<32x64xf32>
    %2 = tpu.matmul %0, %1, %cst {dimension_numbers = #tpu.dot_dimension_numbers<[1], [0], [0], [1], [0, 0, 1, 1], [], []>} : vector<32x128xbf16>, vector<128x64xbf16>, vector<32x64xf32> -> vector<32x64xf32>
    %c0_3 = arith.constant 0 : index
    %c0_4 = arith.constant 0 : index
    %3 = vector.load %arg3[%c0_3, %c0_4] : memref<1x64xf32, #tpu.memory_space<vmem>>, vector<1x64xf32>
    %4 = vector.broadcast %3 : vector<1x64xf32> to vector<32x64xf32>
    %5 = arith.addf %2, %4 : vector<32x64xf32>
    %cst_5 = arith.constant 0.000000e+00 : f32
    %6 = vector.broadcast %cst_5 : f32 to vector<32x64xf32>
    %7 = arith.maximumf %5, %6 : vector<32x64xf32>
    %8 = arith.truncf %7 : vector<32x64xf32> to vector<32x64xbf16>
    %c0_6 = arith.constant 0 : index
    %c0_7 = arith.constant 0 : index
    %9 = vector.load %arg4[%c0_6, %c0_7] : memref<32x64xbf16, #tpu.memory_space<vmem>>, vector<32x64xbf16>
    tpu.vector_store %arg4[%c0_6, %c0_7], %8 {strides = array<i32>} : memref<32x64xbf16, #tpu.memory_space<vmem>>, vector<32x64xbf16>,
    return
  }
  func.func @transform_0(%arg0: i32) -> (i32, i32) {
    %c0_i32 = arith.constant 0 : i32
    %c0_i32_0 = arith.constant 0 : i32
    return %arg0, %c0_i32 : i32, i32
  }
  func.func @transform_1(%arg0: i32) -> (i32, i32) {
    %c0_i32 = arith.constant 0 : i32
    %c0_i32_0 = arith.constant 0 : i32
    %c0_i32_1 = arith.constant 0 : i32
    return %c0_i32, %c0_i32_0 : i32, i32
  }
  func.func @transform_2(%arg0: i32) -> (i32, i32) {
    %c0_i32 = arith.constant 0 : i32
    %c0_i32_0 = arith.constant 0 : i32
    %c0_i32_1 = arith.constant 0 : i32
    return %c0_i32, %c0_i32_0 : i32, i32
  }
  func.func @transform_3(%arg0: i32) -> (i32, i32) {
    %c0_i32 = arith.constant 0 : i32
    %c0_i32_0 = arith.constant 0 : i32
    return %arg0, %c0_i32 : i32, i32
  }
}

module attributes {stable_mosaic.version = 11 : i64} {
  func.func @_se_stage_kernel(%arg0: i32, %arg1: memref<1x4x576xbf16, #tpu.memory_space<vmem>>, %arg2: memref<1x4x128xbf16, #tpu.memory_space<vmem>>, %arg3: memref<576x64xbf16, #tpu.memory_space<vmem>>, %arg4: memref<64x256xbf16, #tpu.memory_space<vmem>>, %arg5: memref<128x256xbf16, #tpu.memory_space<vmem>>, %arg6: memref<256x64xbf16, #tpu.memory_space<vmem>>, %arg7: memref<64x256xbf16, #tpu.memory_space<vmem>>, %arg8: memref<8x256xf32, #tpu.memory_space<vmem>>, %arg9: memref<1x4x256xf32, #tpu.memory_space<vmem>>) attributes {dimension_semantics = [#tpu.dimension_semantics<parallel>], iteration_bounds = array<i64: 2>, scalar_prefetch = 0 : i64, scratch_operands = 0 : i64, tpu.core_type = #tpu.core_type<tc>, window_params = [{transform_indices = @transform_0, window_bounds = array<i64: 1, 4, 576>}, {transform_indices = @transform_1, window_bounds = array<i64: 1, 4, 128>}, {pipeline_mode = #tpu.pipeline_mode<synchronous>, transform_indices = @transform_2, window_bounds = array<i64: 576, 64>}, {pipeline_mode = #tpu.pipeline_mode<synchronous>, transform_indices = @transform_3, window_bounds = array<i64: 64, 256>}, {pipeline_mode = #tpu.pipeline_mode<synchronous>, transform_indices = @transform_4, window_bounds = array<i64: 128, 256>}, {pipeline_mode = #tpu.pipeline_mode<synchronous>, transform_indices = @transform_5, window_bounds = array<i64: 256, 64>}, {pipeline_mode = #tpu.pipeline_mode<synchronous>, transform_indices = @transform_6, window_bounds = array<i64: 64, 256>}, {pipeline_mode = #tpu.pipeline_mode<synchronous>, transform_indices = @transform_7, window_bounds = array<i64: 8, 256>}, {transform_indices = @transform_8, window_bounds = array<i64: 1, 4, 256>}]} {
    %c0 = arith.constant 0 : index
    %c0_0 = arith.constant 0 : index
    %0 = vector.load %arg8[%c0, %c0_0] : memref<8x256xf32, #tpu.memory_space<vmem>>, vector<8x256xf32>
    %1 = vector.extract_strided_slice %0 {offsets = [0, 0], sizes = [1, 64], strides = [1, 1]} : vector<8x256xf32> to vector<1x64xf32>
    %2 = vector.extract_strided_slice %0 {offsets = [1, 0], sizes = [1, 256], strides = [1, 1]} : vector<8x256xf32> to vector<1x256xf32>
    %3 = vector.extract_strided_slice %0 {offsets = [2, 0], sizes = [1, 256], strides = [1, 1]} : vector<8x256xf32> to vector<1x256xf32>
    %4 = vector.extract_strided_slice %0 {offsets = [3, 0], sizes = [1, 64], strides = [1, 1]} : vector<8x256xf32> to vector<1x64xf32>
    %5 = vector.extract_strided_slice %0 {offsets = [4, 0], sizes = [1, 256], strides = [1, 1]} : vector<8x256xf32> to vector<1x256xf32>
    %c0_1 = arith.constant 0 : index
    %c0_2 = arith.constant 0 : index
    %c0_3 = arith.constant 0 : index
    %6 = vector.load %arg1[%c0_1, %c0_2, %c0_3] : memref<1x4x576xbf16, #tpu.memory_space<vmem>>, vector<1x4x576xbf16>
    %7 = vector.shape_cast %6 : vector<1x4x576xbf16> to vector<4x576xbf16>
    %c0_4 = arith.constant 0 : index
    %c0_5 = arith.constant 0 : index
    %8 = vector.load %arg3[%c0_4, %c0_5] : memref<576x64xbf16, #tpu.memory_space<vmem>>, vector<576x64xbf16>
    %cst = arith.constant dense<0.000000e+00> : vector<4x64xf32>
    %9 = tpu.matmul %7, %8, %cst {dimension_numbers = #tpu.dot_dimension_numbers<[1], [0], [0], [1], [0, 0, 1, 1], [], []>} : vector<4x576xbf16>, vector<576x64xbf16>, vector<4x64xf32> -> vector<4x64xf32>
    %10 = vector.broadcast %1 : vector<1x64xf32> to vector<4x64xf32>
    %11 = arith.addf %9, %10 : vector<4x64xf32>
    %cst_6 = arith.constant 0.000000e+00 : f32
    %12 = vector.broadcast %cst_6 : f32 to vector<4x64xf32>
    %13 = arith.maximumf %11, %12 : vector<4x64xf32>
    %14 = arith.truncf %13 : vector<4x64xf32> to vector<4x64xbf16>
    %c0_7 = arith.constant 0 : index
    %c0_8 = arith.constant 0 : index
    %15 = vector.load %arg4[%c0_7, %c0_8] : memref<64x256xbf16, #tpu.memory_space<vmem>>, vector<64x256xbf16>
    %cst_9 = arith.constant dense<0.000000e+00> : vector<4x256xf32>
    %16 = tpu.matmul %14, %15, %cst_9 {dimension_numbers = #tpu.dot_dimension_numbers<[1], [0], [0], [1], [0, 0, 1, 1], [], []>} : vector<4x64xbf16>, vector<64x256xbf16>, vector<4x256xf32> -> vector<4x256xf32>
    %17 = vector.broadcast %2 : vector<1x256xf32> to vector<4x256xf32>
    %18 = arith.addf %16, %17 : vector<4x256xf32>
    %c0_10 = arith.constant 0 : index
    %c0_11 = arith.constant 0 : index
    %c0_12 = arith.constant 0 : index
    %19 = vector.load %arg2[%c0_10, %c0_11, %c0_12] : memref<1x4x128xbf16, #tpu.memory_space<vmem>>, vector<1x4x128xbf16>
    %20 = vector.shape_cast %19 : vector<1x4x128xbf16> to vector<4x128xbf16>
    %c0_13 = arith.constant 0 : index
    %c0_14 = arith.constant 0 : index
    %21 = vector.load %arg5[%c0_13, %c0_14] : memref<128x256xbf16, #tpu.memory_space<vmem>>, vector<128x256xbf16>
    %cst_15 = arith.constant dense<0.000000e+00> : vector<4x256xf32>
    %22 = tpu.matmul %20, %21, %cst_15 {dimension_numbers = #tpu.dot_dimension_numbers<[1], [0], [0], [1], [0, 0, 1, 1], [], []>} : vector<4x128xbf16>, vector<128x256xbf16>, vector<4x256xf32> -> vector<4x256xf32>
    %23 = vector.broadcast %3 : vector<1x256xf32> to vector<4x256xf32>
    %24 = arith.addf %22, %23 : vector<4x256xf32>
    %cst_16 = arith.constant dense<0.000000e+00> : vector<256xf32>
    %25 = vector.multi_reduction <add>, %18, %cst_16 [0] : vector<4x256xf32> to vector<256xf32>
    %26 = vector.shape_cast %25 : vector<256xf32> to vector<1x256xf32>
    %cst_17 = arith.constant 4.000000e+00 : f32
    %27 = vector.broadcast %cst_17 : f32 to vector<1x256xf32>
    %28 = arith.divf %26, %27 : vector<1x256xf32>
    %29 = arith.truncf %28 : vector<1x256xf32> to vector<1x256xbf16>
    %c0_18 = arith.constant 0 : index
    %c0_19 = arith.constant 0 : index
    %30 = vector.load %arg6[%c0_18, %c0_19] : memref<256x64xbf16, #tpu.memory_space<vmem>>, vector<256x64xbf16>
    %cst_20 = arith.constant dense<0.000000e+00> : vector<1x64xf32>
    %31 = tpu.matmul %29, %30, %cst_20 {dimension_numbers = #tpu.dot_dimension_numbers<[1], [0], [0], [1], [0, 0, 1, 1], [], []>} : vector<1x256xbf16>, vector<256x64xbf16>, vector<1x64xf32> -> vector<1x64xf32>
    %32 = arith.addf %31, %4 : vector<1x64xf32>
    %cst_21 = arith.constant 0.000000e+00 : f32
    %33 = vector.broadcast %cst_21 : f32 to vector<1x64xf32>
    %34 = arith.maximumf %32, %33 : vector<1x64xf32>
    %35 = arith.truncf %34 : vector<1x64xf32> to vector<1x64xbf16>
    %c0_22 = arith.constant 0 : index
    %c0_23 = arith.constant 0 : index
    %36 = vector.load %arg7[%c0_22, %c0_23] : memref<64x256xbf16, #tpu.memory_space<vmem>>, vector<64x256xbf16>
    %cst_24 = arith.constant dense<0.000000e+00> : vector<1x256xf32>
    %37 = tpu.matmul %35, %36, %cst_24 {dimension_numbers = #tpu.dot_dimension_numbers<[1], [0], [0], [1], [0, 0, 1, 1], [], []>} : vector<1x64xbf16>, vector<64x256xbf16>, vector<1x256xf32> -> vector<1x256xf32>
    %38 = arith.addf %37, %5 : vector<1x256xf32>
    %cst_25 = arith.constant 0.000000e+00 : f32
    %39 = vector.broadcast %cst_25 : f32 to vector<1x256xf32>
    %40 = arith.subf %39, %38 : vector<1x256xf32>
    %41 = math.exp %40 : vector<1x256xf32>
    %cst_26 = arith.constant 1.000000e+00 : f32
    %42 = vector.broadcast %cst_26 : f32 to vector<1x256xf32>
    %43 = arith.addf %42, %41 : vector<1x256xf32>
    %cst_27 = arith.constant 1.000000e+00 : f32
    %44 = vector.broadcast %cst_27 : f32 to vector<1x256xf32>
    %45 = arith.divf %44, %43 : vector<1x256xf32>
    %46 = vector.broadcast %45 : vector<1x256xf32> to vector<4x256xf32>
    %47 = arith.mulf %18, %46 : vector<4x256xf32>
    %48 = arith.addf %47, %24 : vector<4x256xf32>
    %cst_28 = arith.constant 0.000000e+00 : f32
    %49 = vector.broadcast %cst_28 : f32 to vector<4x256xf32>
    %50 = arith.maximumf %48, %49 : vector<4x256xf32>
    %c0_29 = arith.constant 0 : index
    %c0_30 = arith.constant 0 : index
    %c0_31 = arith.constant 0 : index
    %51 = vector.load %arg9[%c0_29, %c0_30, %c0_31] : memref<1x4x256xf32, #tpu.memory_space<vmem>>, vector<1x4x256xf32>
    %52 = vector.shape_cast %51 : vector<1x4x256xf32> to vector<4x256xf32>
    %53 = vector.shape_cast %50 : vector<4x256xf32> to vector<1x4x256xf32>
    tpu.vector_store %arg9[%c0_29, %c0_30, %c0_31], %53 {strides = array<i32>} : memref<1x4x256xf32, #tpu.memory_space<vmem>>, vector<1x4x256xf32>,
    return
  }
  func.func @transform_0(%arg0: i32) -> (i32, i32, i32) {
    %c0_i32 = arith.constant 0 : i32
    %c0_i32_0 = arith.constant 0 : i32
    %c0_i32_1 = arith.constant 0 : i32
    return %arg0, %c0_i32, %c0_i32_0 : i32, i32, i32
  }
  func.func @transform_1(%arg0: i32) -> (i32, i32, i32) {
    %c0_i32 = arith.constant 0 : i32
    %c0_i32_0 = arith.constant 0 : i32
    %c0_i32_1 = arith.constant 0 : i32
    return %arg0, %c0_i32, %c0_i32_0 : i32, i32, i32
  }
  func.func @transform_2(%arg0: i32) -> (i32, i32) {
    %c0_i32 = arith.constant 0 : i32
    %c0_i32_0 = arith.constant 0 : i32
    %c0_i32_1 = arith.constant 0 : i32
    return %c0_i32, %c0_i32_0 : i32, i32
  }
  func.func @transform_3(%arg0: i32) -> (i32, i32) {
    %c0_i32 = arith.constant 0 : i32
    %c0_i32_0 = arith.constant 0 : i32
    %c0_i32_1 = arith.constant 0 : i32
    return %c0_i32, %c0_i32_0 : i32, i32
  }
  func.func @transform_4(%arg0: i32) -> (i32, i32) {
    %c0_i32 = arith.constant 0 : i32
    %c0_i32_0 = arith.constant 0 : i32
    %c0_i32_1 = arith.constant 0 : i32
    return %c0_i32, %c0_i32_0 : i32, i32
  }
  func.func @transform_5(%arg0: i32) -> (i32, i32) {
    %c0_i32 = arith.constant 0 : i32
    %c0_i32_0 = arith.constant 0 : i32
    %c0_i32_1 = arith.constant 0 : i32
    return %c0_i32, %c0_i32_0 : i32, i32
  }
  func.func @transform_6(%arg0: i32) -> (i32, i32) {
    %c0_i32 = arith.constant 0 : i32
    %c0_i32_0 = arith.constant 0 : i32
    %c0_i32_1 = arith.constant 0 : i32
    return %c0_i32, %c0_i32_0 : i32, i32
  }
  func.func @transform_7(%arg0: i32) -> (i32, i32) {
    %c0_i32 = arith.constant 0 : i32
    %c0_i32_0 = arith.constant 0 : i32
    %c0_i32_1 = arith.constant 0 : i32
    return %c0_i32, %c0_i32_0 : i32, i32
  }
  func.func @transform_8(%arg0: i32) -> (i32, i32, i32) {
    %c0_i32 = arith.constant 0 : i32
    %c0_i32_0 = arith.constant 0 : i32
    %c0_i32_1 = arith.constant 0 : i32
    return %arg0, %c0_i32, %c0_i32_0 : i32, i32, i32
  }
}

</mosaic_0001>

<bundles_post_ra>
// kernel: e_senet_forward.9
= control target key start
LH: loop header
LB: loop body
LE: loop exit
PB: predicated region body
PF: predicated region fallthrough
CT: control target
= control target key end

     0   :  { %s1639_s12 = smov 0   ;;  %s1934_s0 = inlined_call_operand.vmem [shape: bf16[2048,27], index: 0, kind: input, shape index: {}]   ;;  %s1935_s1 = inlined_call_operand.vmem [shape: bf16[27,16], index: 1, kind: input, shape index: {}]   ;;  %s1936_s2 = inlined_call_operand.vmem [shape: f32[1,16], index: 2, kind: input, shape index: {}]   ;;  %s1937_s3 = inlined_call_operand.vmem [shape: bf16[2048,16], index: 3, kind: output, shape index: {}]  }
   0x1 LB: > { %s1255_s13 = sadd.s32 4294967295, %s1616_s12   ;;  %p1259_p0 = scmp.ge.s32.totalorder %s1616_s12, 1  ;;  %s1616_s12 = sphi %s1639_s12, %s13_s12  }
   0x2   : > { %p138_p1 = scmp.lt.s32.totalorder %s1616_s12, 5 }
   0x4   : > { %p139_p2 = pnand %p1259_p0, %p138_p1 }
   0x5   : > { %v1576_v0 = vld [vmem:[%s1935_s1] sm:$0xff] (!%p139_p2)   ;;  %vm518_vm0 = vcmask (!%p139_p2), 1044480   ;;  %v1577_v1 = vld [vmem:[%s1935_s1 + $0x8] sm:$0x3f] (!%p139_p2)   ;;  %vm519_vm1 = vcmask (!%p139_p2), 1045504   ;;  %s1260_s18 = sshll.u32 (!%p139_p2), %s1255_s13, 6 }
   0x6   : > { %142 = sbr.rel (%p139_p2) target bundleno = 297 (0x129), region = 32  ;;  %1495 = vmatprep.subr.bf16.mxu0 (!%p139_p2), %v1576_v0  ;;  %1563 = vmatprep.subr.bf16.mxu1 (!%p139_p2), %v1576_v0  ;;  %v1618_v2 = vmov (!%p139_p2), 65535   ;;  %p163_p3 = scmp.lt.s32.totalorder (!%p139_p2), %s1260_s18, 255  ;;  %vm421_vm2 = vcmask (!%p139_p2), 220160   ;;  %v1730_v38 = vld [vmem:[%s1936_s2] ss:$0 sm:$0xff] (!%p139_p2) }
   0x7   : > { %1496 = vmatpush3.bf16.msra.mxu0 (!%p139_p2), %v1576_v0  ;;  %1565 = vmatpush3.bf16.msra.mxu1 (!%p139_p2), %v1576_v0  ;;  %v520_v3 = vsel (!%p139_p2), %vm518_vm0, 4294967295, %v1618_v2  ;;  %vm1134_vm3 = vcmask (!%p139_p2), 125952  }
   0x8   : > { %v521_v4 = vsel (!%p139_p2), %vm519_vm1, %v520_v3, 0 }
   0x9   : > { %v523_v5 = vand.u32 (!%p139_p2), %v1577_v1, %v521_v4 }
   0xb   : > { %1497 = vmatprep.subr.bf16.mxu0 (!%p139_p2), %v523_v5  ;;  %1564 = vmatprep.subr.bf16.mxu1 (!%p139_p2), %v523_v5 }
   0xc   : > { %1498 = vmatpush3.bf16.msra.mxu0 (!%p139_p2), %v523_v5  ;;  %1566 = vmatpush3.bf16.msra.mxu1 (!%p139_p2), %v523_v5 }
   0xd   : > { %s1939_s18 = smov (!%p163_p3, %s1260_s18), 255 }
   0xe   : > { %s1261_s19 = sshll.u32 %s1939_s18, 2 }
   0xf   : > { %s1661_s22 = scalar_lea.vmem %s1934_s0, %s1261_s19  ;;  %s1742_s27 = scalar_lea.vmem %s1937_s3, %s1261_s19 }
  0x10   : > { %v1578_v6 = vld [vmem:[%s1661_s22] sm:$0xff]   ;;  %v1580_v8 = vld [vmem:[%s1661_s22 + $0x8] sm:$0xff]   ;;  %v1582_v10 = vld [vmem:[%s1661_s22 + $0x10] sm:$0xff]  }
  0x11   : > { %v1579_v7 = vld [vmem:[%s1661_s22 + $0x80] sm:$0xff]   ;;  %1499 = vmatprep.mubr.msk.bf16.mxu0 %vm421_vm2, %v1578_v6  ;;  %v1581_v9 = vld [vmem:[%s1661_s22 + $0x88] sm:$0xff]   ;;  %v1583_v11 = vld [vmem:[%s1661_s22 + $0x90] sm:$0xff]  }
  0x12   : > { %1531 = vmatprep.mubr.msk.bf16.mxu1 %vm421_vm2, %v1579_v7  ;;  %1500 = vmatmul.mubr.msk.bf16.vlgmr.msra.gmra.mrb[0].mxu0 %vm421_vm2, %v1580_v8  ;;  %v1584_v12 = vld [vmem:[%s1661_s22 + $0x18] sm:$0xff]   ;;  %v1586_v14 = vld [vmem:[%s1661_s22 + $0x20] sm:$0xff]   ;;  %v1588_v16 = vld [vmem:[%s1661_s22 + $0x28] sm:$0xff]  }
  0x13   : > { %1532 = vmatmul.mubr.msk.bf16.vlgmr.msra.gmra.mrb[0].mxu1 %vm421_vm2, %v1581_v9  ;;  %1503 = vmatprep.mubr.msk.bf16.mxu0 %vm421_vm2, %v1582_v10  ;;  %v1585_v13 = vld [vmem:[%s1661_s22 + $0x98] sm:$0xff]   ;;  %v1587_v15 = vld [vmem:[%s1661_s22 + $0xa0] sm:$0xff]   ;;  %v1589_v17 = vld [vmem:[%s1661_s22 + $0xa8] sm:$0xff]  }
  0x14   : > { %1535 = vmatprep.mubr.msk.bf16.mxu1 %vm421_vm2, %v1583_v11  ;;  %v1590_v18 = vld [vmem:[%s1661_s22 + $0x30] sm:$0xff]   ;;  %v1592_v20 = vld [vmem:[%s1661_s22 + $0x38] sm:$0xff]   ;;  %v1594_v22 = vld [vmem:[%s1661_s22 + $0x40] sm:$0xff]  }
  0x15   : > { %v1591_v19 = vld [vmem:[%s1661_s22 + $0xb0] sm:$0xff]   ;;  %v1593_v21 = vld [vmem:[%s1661_s22 + $0xb8] sm:$0xff]   ;;  %v1595_v23 = vld [vmem:[%s1661_s22 + $0xc0] sm:$0xff]  }
  0x16   : > { %v1596_v24 = vld [vmem:[%s1661_s22 + $0x48] sm:$0xff]   ;;  %v1598_v26 = vld [vmem:[%s1661_s22 + $0x50] sm:$0xff]   ;;  %v1600_v28 = vld [vmem:[%s1661_s22 + $0x58] sm:$0xff]  }
  0x17   : > { %v1597_v25 = vld [vmem:[%s1661_s22 + $0xc8] sm:$0xff]   ;;  %v1599_v27 = vld [vmem:[%s1661_s22 + $0xd0] sm:$0xff]   ;;  %v1601_v29 = vld [vmem:[%s1661_s22 + $0xd8] sm:$0xff]  }
  0x18   : > { %v1602_v30 = vld [vmem:[%s1661_s22 + $0x60] sm:$0xff]   ;;  %v1604_v32 = vld [vmem:[%s1661_s22 + $0x68] sm:$0xff]   ;;  %v1606_v34 = vld [vmem:[%s1661_s22 + $0x70] sm:$0xff]  }
  0x19   : > { %v1603_v31 = vld [vmem:[%s1661_s22 + $0xe0] sm:$0xff]   ;;  %v1605_v33 = vld [vmem:[%s1661_s22 + $0xe8] sm:$0xff]   ;;  %v1607_v35 = vld [vmem:[%s1661_s22 + $0xf0] sm:$0xff]  }
  0x1a   : > { %1504 = vmatmul.mubr.msk.bf16.gmra.mrb[4].mxu0 %vm421_vm2, %v1584_v12  ;;  %v1608_v36 = vld [vmem:[%s1661_s22 + $0x78] sm:$0xff]  }
  0x1b   : > { %1536 = vmatmul.mubr.msk.bf16.gmra.mrb[4].mxu1 %vm421_vm2, %v1585_v13  ;;  %1507 = vmatprep.mubr.msk.bf16.mxu0 %vm421_vm2, %v1586_v14  ;;  %v1609_v37 = vld [vmem:[%s1661_s22 + $0xf8] sm:$0xff]  }
  0x1c   : > { %1539 = vmatprep.mubr.msk.bf16.mxu1 %vm421_vm2, %v1587_v15 }
  0x22   : > { %1508 = vmatmul.mubr.msk.bf16.gmra.mrb[8].mxu0 %vm421_vm2, %v1588_v16 }
  0x23   : > { %1540 = vmatmul.mubr.msk.bf16.gmra.mrb[8].mxu1 %vm421_vm2, %v1589_v17  ;;  %1511 = vmatprep.mubr.msk.bf16.mxu0 %vm421_vm2, %v1590_v18 }
  0x24   : > { %1543 = vmatprep.mubr.msk.bf16.mxu1 %vm421_vm2, %v1591_v19 }
  0x2a   : > { %1512 = vmatmul.mubr.msk.bf16.gmra.mrb[12].mxu0 %vm421_vm2, %v1592_v20 }
  0x2b   : > { %1544 = vmatmul.mubr.msk.bf16.gmra.mrb[12].mxu1 %vm421_vm2, %v1593_v21  ;;  %1515 = vmatprep.mubr.msk.bf16.mxu0 %vm421_vm2, %v1594_v22 }
  0x2c   : > { %1547 = vmatprep.mubr.msk.bf16.mxu1 %vm421_vm2, %v1595_v23 }
  0x32   : > { %1516 = vmatmul.mubr.msk.bf16.gmra.mrb[16].mxu0 %vm421_vm2, %v1596_v24 }
  0x33   : > { %1548 = vmatmul.mubr.msk.bf16.gmra.mrb[16].mxu1 %vm421_vm2, %v1597_v25  ;;  %1519 = vmatprep.mubr.msk.bf16.mxu0 %vm421_vm2, %v1598_v26 }
  0x34   : > { %1551 = vmatprep.mubr.msk.bf16.mxu1 %vm421_vm2, %v1599_v27 }
  0x3a   : > { %1520 = vmatmul.mubr.msk.bf16.gmra.mrb[20].mxu0 %vm421_vm2, %v1600_v28 }
  0x3b   : > { %1552 = vmatmul.mubr.msk.bf16.gmra.mrb[20].mxu1 %vm421_vm2, %v1601_v29  ;;  %1523 = vmatprep.mubr.msk.bf16.mxu0 %vm421_vm2, %v1602_v30 }
  0x3c   : > { %1555 = vmatprep.mubr.msk.bf16.mxu1 %vm421_vm2, %v1603_v31 }
  0x42   : > { %1524 = vmatmul.mubr.msk.bf16.gmra.mrb[24].mxu0 %vm421_vm2, %v1604_v32 }
  0x43   : > { %1556 = vmatmul.mubr.msk.bf16.gmra.mrb[24].mxu1 %vm421_vm2, %v1605_v33  ;;  %1527 = vmatprep.mubr.msk.bf16.mxu0 %vm421_vm2, %v1606_v34 }
  0x44   : > { %1559 = vmatprep.mubr.msk.bf16.mxu1 %vm421_vm2, %v1607_v35 }
  0x4a   : > { %1528 = vmatmul.mubr.msk.bf16.gmra.mrb[28].mxu0 %vm421_vm2, %v1608_v36 }
  0x4b   : > { %1560 = vmatmul.mubr.msk.bf16.gmra.mrb[28].mxu1 %vm421_vm2, %v1609_v37 }
  0xe5   : > { %v1501_v39 = vpop.f32.mrb[0].mxu0 }
  0xe6   : > { %v568_v40 = vadd.f32 %v1501_v39, %v1730_v38  ;;  %v1533_v41 = vpop.f32.mrb[0].mxu1  ;;  %v559_v42 = vpop.f32.mrb[1].mxu0 }
  0xe7   : > { %v696_v43 = vadd.f32 %v1533_v41, %v1730_v38  ;;  %v560_v44 = vadd.f32 %v1730_v38, %v559_v42  ;;  %v687_v45 = vpop.f32.mrb[1].mxu1  ;;  %v1502_v46 = vpop.f32.mrb[2].mxu0 }
  0xe8   : > { %v816_v47 = vmax.f32 %v568_v40, 0.0  ;;  %v688_v48 = vadd.f32 %v1730_v38, %v687_v45  ;;  %v571_v49 = vadd.f32 %v1502_v46, %v1730_v38  ;;  %v1534_v50 = vpop.f32.mrb[2].mxu1  ;;  %v562_v51 = vpop.f32.mrb[3].mxu0 }
  0xe9   : > { %v848_v52 = vmax.f32 %v696_v43, 0.0  ;;  %v814_v53 = vmax.f32 %v560_v44, 0.0  ;;  %v699_v54 = vadd.f32 %v1534_v50, %v1730_v38  ;;  %v563_v55 = vadd.f32 %v1730_v38, %v562_v51  ;;  %v690_v56 = vpop.f32.mrb[3].mxu1 }
  0xea   : > { %v1399_v57 = vpack.c.bf16 %v816_v47, %v816_v47  ;;  %v846_v58 = vmax.f32 %v688_v48, 0.0  ;;  %v817_v59 = vmax.f32 %v571_v49, 0.0  ;;  %v691_v60 = vadd.f32 %v1730_v38, %v690_v56 }
  0xeb   : > { %v1431_v61 = vpack.c.bf16 %v848_v52, %v848_v52  ;;  %v1397_v62 = vpack.c.bf16 %v814_v53, %v814_v53  ;;  %v849_v63 = vmax.f32 %v699_v54, 0.0  ;;  %v815_v0 = vmax.f32 %v563_v55, 0.0 }
  0xec   : > { %1137 = vst.msk [vmem:[%s1742_s27 + $0x8] sm:$0xf] %vm1134_vm3, %v1399_v57  ;;  %v1429_v1 = vpack.c.bf16 %v846_v58, %v846_v58  ;;  %v1400_v2 = vpack.c.bf16 %v817_v59, %v817_v59  ;;  %v847_v3 = vmax.f32 %v691_v60, 0.0 }
  0xed   : > { %1169 = vst.msk [vmem:[%s1742_s27 + $0x88] sm:$0xf] %vm1134_vm3, %v1431_v61  ;;  %1135 = vst.msk [vmem:[%s1742_s27] sm:$0xf] %vm1134_vm3, %v1397_v62  ;;  %v1432_v4 = vpack.c.bf16 %v849_v63, %v849_v63  ;;  %v1398_v5 = vpack.c.bf16 %v815_v0, %v815_v0  ;;  %v1505_v6 = vpop.f32.mrb[4].mxu0 }
  0xee   : > { %1167 = vst.msk [vmem:[%s1742_s27 + $0x80] sm:$0xf] %vm1134_vm3, %v1429_v1  ;;  %1138 = vst.msk [vmem:[%s1742_s27 + $0xc] sm:$0xf] %vm1134_vm3, %v1400_v2  ;;  %v1430_v7 = vpack.c.bf16 %v847_v3, %v847_v3  ;;  %v584_v8 = vadd.f32 %v1505_v6, %v1730_v38  ;;  %v1537_v9 = vpop.f32.mrb[4].mxu1  ;;  %v575_v10 = vpop.f32.mrb[5].mxu0 }
  0xef   : > { %1170 = vst.msk [vmem:[%s1742_s27 + $0x8c] sm:$0xf] %vm1134_vm3, %v1432_v4  ;;  %1136 = vst.msk [vmem:[%s1742_s27 + $0x4] sm:$0xf] %vm1134_vm3, %v1398_v5  ;;  %v712_v11 = vadd.f32 %v1537_v9, %v1730_v38  ;;  %v576_v12 = vadd.f32 %v1730_v38, %v575_v10  ;;  %v703_v13 = vpop.f32.mrb[5].mxu1  ;;  %v1506_v14 = vpop.f32.mrb[6].mxu0 }
  0xf0   : > { %1168 = vst.msk [vmem:[%s1742_s27 + $0x84] sm:$0xf] %vm1134_vm3, %v1430_v7  ;;  %v820_v15 = vmax.f32 %v584_v8, 0.0  ;;  %v704_v16 = vadd.f32 %v1730_v38, %v703_v13  ;;  %v587_v17 = vadd.f32 %v1506_v14, %v1730_v38  ;;  %v1538_v18 = vpop.f32.mrb[6].mxu1  ;;  %v578_v19 = vpop.f32.mrb[7].mxu0 }
  0xf1   : > { %v852_v20 = vmax.f32 %v712_v11, 0.0  ;;  %v818_v21 = vmax.f32 %v576_v12, 0.0  ;;  %v715_v22 = vadd.f32 %v1538_v18, %v1730_v38  ;;  %v579_v23 = vadd.f32 %v1730_v38, %v578_v19  ;;  %v706_v24 = vpop.f32.mrb[7].mxu1 }
  0xf2   : > { %v1403_v25 = vpack.c.bf16 %v820_v15, %v820_v15  ;;  %v850_v26 = vmax.f32 %v704_v16, 0.0  ;;  %v821_v27 = vmax.f32 %v587_v17, 0.0  ;;  %v707_v28 = vadd.f32 %v1730_v38, %v706_v24 }
  0xf3   : > { %v1435_v29 = vpack.c.bf16 %v852_v20, %v852_v20  ;;  %v1401_v30 = vpack.c.bf16 %v818_v21, %v818_v21  ;;  %v853_v31 = vmax.f32 %v715_v22, 0.0  ;;  %v819_v32 = vmax.f32 %v579_v23, 0.0 }
  0xf4   : > { %1141 = vst.msk [vmem:[%s1742_s27 + $0x18] sm:$0xf] %vm1134_vm3, %v1403_v25  ;;  %v1433_v33 = vpack.c.bf16 %v850_v26, %v850_v26  ;;  %v1404_v34 = vpack.c.bf16 %v821_v27, %v821_v27  ;;  %v851_v35 = vmax.f32 %v707_v28, 0.0 }
  0xf5   : > { %1173 = vst.msk [vmem:[%s1742_s27 + $0x98] sm:$0xf] %vm1134_vm3, %v1435_v29  ;;  %1139 = vst.msk [vmem:[%s1742_s27 + $0x10] sm:$0xf] %vm1134_vm3, %v1401_v30  ;;  %v1436_v36 = vpack.c.bf16 %v853_v31, %v853_v31  ;;  %v1402_v37 = vpack.c.bf16 %v819_v32, %v819_v32  ;;  %v1509_v39 = vpop.f32.mrb[8].mxu0 }
  0xf6   : > { %1171 = vst.msk [vmem:[%s1742_s27 + $0x90] sm:$0xf] %vm1134_vm3, %v1433_v33  ;;  %1142 = vst.msk [vmem:[%s1742_s27 + $0x1c] sm:$0xf] %vm1134_vm3, %v1404_v34  ;;  %v1434_v40 = vpack.c.bf16 %v851_v35, %v851_v35  ;;  %v600_v41 = vadd.f32 %v1509_v39, %v1730_v38  ;;  %v1541_v42 = vpop.f32.mrb[8].mxu1  ;;  %v591_v43 = vpop.f32.mrb[9].mxu0 }
  0xf7   : > { %1174 = vst.msk [vmem:[%s1742_s27 + $0x9c] sm:$0xf] %vm1134_vm3, %v1436_v36  ;;  %1140 = vst.msk [vmem:[%s1742_s27 + $0x14] sm:$0xf] %vm1134_vm3, %v1402_v37  ;;  %v728_v44 = vadd.f32 %v1541_v42, %v1730_v38  ;;  %v592_v45 = vadd.f32 %v1730_v38, %v591_v43  ;;  %v719_v46 = vpop.f32.mrb[9].mxu1  ;;  %v1510_v47 = vpop.f32.mrb[10].mxu0 }
  0xf8   : > { %1172 = vst.msk [vmem:[%s1742_s27 + $0x94] sm:$0xf] %vm1134_vm3, %v1434_v40  ;;  %v824_v48 = vmax.f32 %v600_v41, 0.0  ;;  %v720_v49 = vadd.f32 %v1730_v38, %v719_v46  ;;  %v603_v50 = vadd.f32 %v1510_v47, %v1730_v38  ;;  %v1542_v51 = vpop.f32.mrb[10].mxu1  ;;  %v594_v52 = vpop.f32.mrb[11].mxu0 }
  0xf9   : > { %v856_v53 = vmax.f32 %v728_v44, 0.0  ;;  %v822_v54 = vmax.f32 %v592_v45, 0.0  ;;  %v731_v55 = vadd.f32 %v1542_v51, %v1730_v38  ;;  %v595_v56 = vadd.f32 %v1730_v38, %v594_v52  ;;  %v722_v57 = vpop.f32.mrb[11].mxu1 }
  0xfa   : > { %v1407_v58 = vpack.c.bf16 %v824_v48, %v824_v48  ;;  %v854_v59 = vmax.f32 %v720_v49, 0.0  ;;  %v825_v60 = vmax.f32 %v603_v50, 0.0  ;;  %v723_v61 = vadd.f32 %v1730_v38, %v722_v57 }
  0xfb   : > { %v1439_v62 = vpack.c.bf16 %v856_v53, %v856_v53  ;;  %v1405_v63 = vpack.c.bf16 %v822_v54, %v822_v54  ;;  %v857_v0 = vmax.f32 %v731_v55, 0.0  ;;  %v823_v1 = vmax.f32 %v595_v56, 0.0 }
  0xfc   : > { %1145 = vst.msk [vmem:[%s1742_s27 + $0x28] sm:$0xf] %vm1134_vm3, %v1407_v58  ;;  %v1437_v2 = vpack.c.bf16 %v854_v59, %v854_v59  ;;  %v1408_v3 = vpack.c.bf16 %v825_v60, %v825_v60  ;;  %v855_v4 = vmax.f32 %v723_v61, 0.0 }
  0xfd   : > { %1177 = vst.msk [vmem:[%s1742_s27 + $0xa8] sm:$0xf] %vm1134_vm3, %v1439_v62  ;;  %1143 = vst.msk [vmem:[%s1742_s27 + $0x20] sm:$0xf] %vm1134_vm3, %v1405_v63  ;;  %v1440_v5 = vpack.c.bf16 %v857_v0, %v857_v0  ;;  %v1406_v6 = vpack.c.bf16 %v823_v1, %v823_v1  ;;  %v1513_v7 = vpop.f32.mrb[12].mxu0 }
  0xfe   : > { %1175 = vst.msk [vmem:[%s1742_s27 + $0xa0] sm:$0xf] %vm1134_vm3, %v1437_v2  ;;  %1146 = vst.msk [vmem:[%s1742_s27 + $0x2c] sm:$0xf] %vm1134_vm3, %v1408_v3  ;;  %v1438_v8 = vpack.c.bf16 %v855_v4, %v855_v4  ;;  %v616_v9 = vadd.f32 %v1513_v7, %v1730_v38  ;;  %v1545_v10 = vpop.f32.mrb[12].mxu1  ;;  %v607_v11 = vpop.f32.mrb[13].mxu0 }
  0xff   : > { %1178 = vst.msk [vmem:[%s1742_s27 + $0xac] sm:$0xf] %vm1134_vm3, %v1440_v5  ;;  %1144 = vst.msk [vmem:[%s1742_s27 + $0x24] sm:$0xf] %vm1134_vm3, %v1406_v6  ;;  %v744_v12 = vadd.f32 %v1545_v10, %v1730_v38  ;;  %v608_v13 = vadd.f32 %v1730_v38, %v607_v11  ;;  %v735_v14 = vpop.f32.mrb[13].mxu1  ;;  %v1514_v15 = vpop.f32.mrb[14].mxu0 }
 0x100   : > { %1176 = vst.msk [vmem:[%s1742_s27 + $0xa4] sm:$0xf] %vm1134_vm3, %v1438_v8  ;;  %v828_v16 = vmax.f32 %v616_v9, 0.0  ;;  %v736_v17 = vadd.f32 %v1730_v38, %v735_v14  ;;  %v619_v18 = vadd.f32 %v1514_v15, %v1730_v38  ;;  %v1546_v19 = vpop.f32.mrb[14].mxu1  ;;  %v610_v20 = vpop.f32.mrb[15].mxu0 }
 0x101   : > { %v860_v21 = vmax.f32 %v744_v12, 0.0  ;;  %v826_v22 = vmax.f32 %v608_v13, 0.0  ;;  %v747_v23 = vadd.f32 %v1546_v19, %v1730_v38  ;;  %v611_v24 = vadd.f32 %v1730_v38, %v610_v20  ;;  %v738_v25 = vpop.f32.mrb[15].mxu1 }
 0x102   : > { %v1411_v26 = vpack.c.bf16 %v828_v16, %v828_v16  ;;  %v858_v27 = vmax.f32 %v736_v17, 0.0  ;;  %v829_v28 = vmax.f32 %v619_v18, 0.0  ;;  %v739_v29 = vadd.f32 %v1730_v38, %v738_v25 }
 0x103   : > { %v1443_v30 = vpack.c.bf16 %v860_v21, %v860_v21  ;;  %v1409_v31 = vpack.c.bf16 %v826_v22, %v826_v22  ;;  %v861_v32 = vmax.f32 %v747_v23, 0.0  ;;  %v827_v33 = vmax.f32 %v611_v24, 0.0 }
 0x104   : > { %1149 = vst.msk [vmem:[%s1742_s27 + $0x38] sm:$0xf] %vm1134_vm3, %v1411_v26  ;;  %v1441_v34 = vpack.c.bf16 %v858_v27, %v858_v27  ;;  %v1412_v35 = vpack.c.bf16 %v829_v28, %v829_v28  ;;  %v859_v36 = vmax.f32 %v739_v29, 0.0 }
 0x105   : > { %1181 = vst.msk [vmem:[%s1742_s27 + $0xb8] sm:$0xf] %vm1134_vm3, %v1443_v30  ;;  %1147 = vst.msk [vmem:[%s1742_s27 + $0x30] sm:$0xf] %vm1134_vm3, %v1409_v31  ;;  %v1444_v37 = vpack.c.bf16 %v861_v32, %v861_v32  ;;  %v1410_v39 = vpack.c.bf16 %v827_v33, %v827_v33  ;;  %v1517_v40 = vpop.f32.mrb[16].mxu0 }
 0x106   : > { %1179 = vst.msk [vmem:[%s1742_s27 + $0xb0] sm:$0xf] %vm1134_vm3, %v1441_v34  ;;  %1150 = vst.msk [vmem:[%s1742_s27 + $0x3c] sm:$0xf] %vm1134_vm3, %v1412_v35  ;;  %v1442_v41 = vpack.c.bf16 %v859_v36, %v859_v36  ;;  %v632_v42 = vadd.f32 %v1517_v40, %v1730_v38  ;;  %v1549_v43 = vpop.f32.mrb[16].mxu1  ;;  %v623_v44 = vpop.f32.mrb[17].mxu0 }
 0x107   : > { %1182 = vst.msk [vmem:[%s1742_s27 + $0xbc] sm:$0xf] %vm1134_vm3, %v1444_v37  ;;  %1148 = vst.msk [vmem:[%s1742_s27 + $0x34] sm:$0xf] %vm1134_vm3, %v1410_v39  ;;  %v760_v45 = vadd.f32 %v1549_v43, %v1730_v38  ;;  %v624_v46 = vadd.f32 %v1730_v38, %v623_v44  ;;  %v751_v47 = vpop.f32.mrb[17].mxu1  ;;  %v1518_v48 = vpop.f32.mrb[18].mxu0 }
 0x108   : > { %1180 = vst.msk [vmem:[%s1742_s27 + $0xb4] sm:$0xf] %vm1134_vm3, %v1442_v41  ;;  %v832_v49 = vmax.f32 %v632_v42, 0.0  ;;  %v752_v50 = vadd.f32 %v1730_v38, %v751_v47  ;;  %v635_v51 = vadd.f32 %v1518_v48, %v1730_v38  ;;  %v1550_v52 = vpop.f32.mrb[18].mxu1  ;;  %v626_v53 = vpop.f32.mrb[19].mxu0 }
 0x109   : > { %v864_v54 = vmax.f32 %v760_v45, 0.0  ;;  %v830_v55 = vmax.f32 %v624_v46, 0.0  ;;  %v763_v56 = vadd.f32 %v1550_v52, %v1730_v38  ;;  %v627_v57 = vadd.f32 %v1730_v38, %v626_v53  ;;  %v754_v58 = vpop.f32.mrb[19].mxu1 }
 0x10a   : > { %v1415_v59 = vpack.c.bf16 %v832_v49, %v832_v49  ;;  %v862_v60 = vmax.f32 %v752_v50, 0.0  ;;  %v833_v61 = vmax.f32 %v635_v51, 0.0  ;;  %v755_v62 = vadd.f32 %v1730_v38, %v754_v58 }
 0x10b   : > { %v1447_v63 = vpack.c.bf16 %v864_v54, %v864_v54  ;;  %v1413_v0 = vpack.c.bf16 %v830_v55, %v830_v55  ;;  %v865_v1 = vmax.f32 %v763_v56, 0.0  ;;  %v831_v2 = vmax.f32 %v627_v57, 0.0 }
 0x10c   : > { %1153 = vst.msk [vmem:[%s1742_s27 + $0x48] sm:$0xf] %vm1134_vm3, %v1415_v59  ;;  %v1445_v3 = vpack.c.bf16 %v862_v60, %v862_v60  ;;  %v1416_v4 = vpack.c.bf16 %v833_v61, %v833_v61  ;;  %v863_v5 = vmax.f32 %v755_v62, 0.0 }
 0x10d   : > { %1185 = vst.msk [vmem:[%s1742_s27 + $0xc8] sm:$0xf] %vm1134_vm3, %v1447_v63  ;;  %1151 = vst.msk [vmem:[%s1742_s27 + $0x40] sm:$0xf] %vm1134_vm3, %v1413_v0  ;;  %v1448_v6 = vpack.c.bf16 %v865_v1, %v865_v1  ;;  %v1414_v7 = vpack.c.bf16 %v831_v2, %v831_v2  ;;  %v1521_v8 = vpop.f32.mrb[20].mxu0 }
 0x10e   : > { %1183 = vst.msk [vmem:[%s1742_s27 + $0xc0] sm:$0xf] %vm1134_vm3, %v1445_v3  ;;  %1154 = vst.msk [vmem:[%s1742_s27 + $0x4c] sm:$0xf] %vm1134_vm3, %v1416_v4  ;;  %v1446_v9 = vpack.c.bf16 %v863_v5, %v863_v5  ;;  %v648_v10 = vadd.f32 %v1521_v8, %v1730_v38  ;;  %v1553_v11 = vpop.f32.mrb[20].mxu1  ;;  %v639_v12 = vpop.f32.mrb[21].mxu0 }
 0x10f   : > { %1186 = vst.msk [vmem:[%s1742_s27 + $0xcc] sm:$0xf] %vm1134_vm3, %v1448_v6  ;;  %1152 = vst.msk [vmem:[%s1742_s27 + $0x44] sm:$0xf] %vm1134_vm3, %v1414_v7  ;;  %v776_v13 = vadd.f32 %v1553_v11, %v1730_v38  ;;  %v640_v14 = vadd.f32 %v1730_v38, %v639_v12  ;;  %v767_v15 = vpop.f32.mrb[21].mxu1  ;;  %v1522_v16 = vpop.f32.mrb[22].mxu0 }
 0x110   : > { %1184 = vst.msk [vmem:[%s1742_s27 + $0xc4] sm:$0xf] %vm1134_vm3, %v1446_v9  ;;  %v836_v17 = vmax.f32 %v648_v10, 0.0  ;;  %v768_v18 = vadd.f32 %v1730_v38, %v767_v15  ;;  %v651_v19 = vadd.f32 %v1522_v16, %v1730_v38  ;;  %v1554_v20 = vpop.f32.mrb[22].mxu1  ;;  %v642_v21 = vpop.f32.mrb[23].mxu0 }
 0x111   : > { %v868_v22 = vmax.f32 %v776_v13, 0.0  ;;  %v834_v23 = vmax.f32 %v640_v14, 0.0  ;;  %v779_v24 = vadd.f32 %v1554_v20, %v1730_v38  ;;  %v643_v25 = vadd.f32 %v1730_v38, %v642_v21  ;;  %v770_v26 = vpop.f32.mrb[23].mxu1 }
 0x112   : > { %v1419_v27 = vpack.c.bf16 %v836_v17, %v836_v17  ;;  %v866_v28 = vmax.f32 %v768_v18, 0.0  ;;  %v837_v29 = vmax.f32 %v651_v19, 0.0  ;;  %v771_v30 = vadd.f32 %v1730_v38, %v770_v26 }
 0x113   : > { %v1451_v31 = vpack.c.bf16 %v868_v22, %v868_v22  ;;  %v1417_v32 = vpack.c.bf16 %v834_v23, %v834_v23  ;;  %v869_v33 = vmax.f32 %v779_v24, 0.0  ;;  %v835_v34 = vmax.f32 %v643_v25, 0.0 }
 0x114   : > { %1157 = vst.msk [vmem:[%s1742_s27 + $0x58] sm:$0xf] %vm1134_vm3, %v1419_v27  ;;  %v1449_v35 = vpack.c.bf16 %v866_v28, %v866_v28  ;;  %v1420_v36 = vpack.c.bf16 %v837_v29, %v837_v29  ;;  %v867_v37 = vmax.f32 %v771_v30, 0.0 }
 0x115   : > { %1189 = vst.msk [vmem:[%s1742_s27 + $0xd8] sm:$0xf] %vm1134_vm3, %v1451_v31  ;;  %1155 = vst.msk [vmem:[%s1742_s27 + $0x50] sm:$0xf] %vm1134_vm3, %v1417_v32  ;;  %v1452_v39 = vpack.c.bf16 %v869_v33, %v869_v33  ;;  %v1418_v40 = vpack.c.bf16 %v835_v34, %v835_v34  ;;  %v1525_v41 = vpop.f32.mrb[24].mxu0 }
 0x116   : > { %1187 = vst.msk [vmem:[%s1742_s27 + $0xd0] sm:$0xf] %vm1134_vm3, %v1449_v35  ;;  %1158 = vst.msk [vmem:[%s1742_s27 + $0x5c] sm:$0xf] %vm1134_vm3, %v1420_v36  ;;  %v1450_v42 = vpack.c.bf16 %v867_v37, %v867_v37  ;;  %v664_v43 = vadd.f32 %v1525_v41, %v1730_v38  ;;  %v1557_v44 = vpop.f32.mrb[24].mxu1  ;;  %v655_v45 = vpop.f32.mrb[25].mxu0 }
 0x117   : > { %1190 = vst.msk [vmem:[%s1742_s27 + $0xdc] sm:$0xf] %vm1134_vm3, %v1452_v39  ;;  %1156 = vst.msk [vmem:[%s1742_s27 + $0x54] sm:$0xf] %vm1134_vm3, %v1418_v40  ;;  %v792_v46 = vadd.f32 %v1557_v44, %v1730_v38  ;;  %v656_v47 = vadd.f32 %v1730_v38, %v655_v45  ;;  %v783_v48 = vpop.f32.mrb[25].mxu1  ;;  %v1526_v49 = vpop.f32.mrb[26].mxu0 }
 0x118   : > { %1188 = vst.msk [vmem:[%s1742_s27 + $0xd4] sm:$0xf] %vm1134_vm3, %v1450_v42  ;;  %v840_v50 = vmax.f32 %v664_v43, 0.0  ;;  %v784_v51 = vadd.f32 %v1730_v38, %v783_v48  ;;  %v667_v52 = vadd.f32 %v1526_v49, %v1730_v38  ;;  %v1558_v53 = vpop.f32.mrb[26].mxu1  ;;  %v658_v54 = vpop.f32.mrb[27].mxu0 }
 0x119   : > { %v872_v55 = vmax.f32 %v792_v46, 0.0  ;;  %v838_v56 = vmax.f32 %v656_v47, 0.0  ;;  %v795_v57 = vadd.f32 %v1558_v53, %v1730_v38  ;;  %v659_v58 = vadd.f32 %v1730_v38, %v658_v54  ;;  %v786_v59 = vpop.f32.mrb[27].mxu1 }
 0x11a   : > { %v1423_v60 = vpack.c.bf16 %v840_v50, %v840_v50  ;;  %v870_v61 = vmax.f32 %v784_v51, 0.0  ;;  %v841_v62 = vmax.f32 %v667_v52, 0.0  ;;  %v787_v63 = vadd.f32 %v1730_v38, %v786_v59 }
 0x11b   : > { %v1455_v0 = vpack.c.bf16 %v872_v55, %v872_v55  ;;  %v1421_v1 = vpack.c.bf16 %v838_v56, %v838_v56  ;;  %v873_v2 = vmax.f32 %v795_v57, 0.0  ;;  %v839_v3 = vmax.f32 %v659_v58, 0.0 }
 0x11c   : > { %1161 = vst.msk [vmem:[%s1742_s27 + $0x68] sm:$0xf] %vm1134_vm3, %v1423_v60  ;;  %v1453_v4 = vpack.c.bf16 %v870_v61, %v870_v61  ;;  %v1424_v5 = vpack.c.bf16 %v841_v62, %v841_v62  ;;  %v871_v6 = vmax.f32 %v787_v63, 0.0 }
 0x11d   : > { %1193 = vst.msk [vmem:[%s1742_s27 + $0xe8] sm:$0xf] %vm1134_vm3, %v1455_v0  ;;  %1159 = vst.msk [vmem:[%s1742_s27 + $0x60] sm:$0xf] %vm1134_vm3, %v1421_v1  ;;  %v1456_v7 = vpack.c.bf16 %v873_v2, %v873_v2  ;;  %v1422_v8 = vpack.c.bf16 %v839_v3, %v839_v3  ;;  %v1529_v9 = vpop.f32.mrb[28].mxu0 }
 0x11e   : > { %1191 = vst.msk [vmem:[%s1742_s27 + $0xe0] sm:$0xf] %vm1134_vm3, %v1453_v4  ;;  %1162 = vst.msk [vmem:[%s1742_s27 + $0x6c] sm:$0xf] %vm1134_vm3, %v1424_v5  ;;  %v1454_v10 = vpack.c.bf16 %v871_v6, %v871_v6  ;;  %v680_v11 = vadd.f32 %v1529_v9, %v1730_v38  ;;  %v1561_v12 = vpop.f32.mrb[28].mxu1  ;;  %v671_v13 = vpop.f32.mrb[29].mxu0 }
 0x11f   : > { %1194 = vst.msk [vmem:[%s1742_s27 + $0xec] sm:$0xf] %vm1134_vm3, %v1456_v7  ;;  %1160 = vst.msk [vmem:[%s1742_s27 + $0x64] sm:$0xf] %vm1134_vm3, %v1422_v8  ;;  %v808_v14 = vadd.f32 %v1561_v12, %v1730_v38  ;;  %v672_v15 = vadd.f32 %v1730_v38, %v671_v13  ;;  %v799_v16 = vpop.f32.mrb[29].mxu1  ;;  %v1530_v17 = vpop.f32.mrb[30].mxu0 }
 0x120   : > { %1192 = vst.msk [vmem:[%s1742_s27 + $0xe4] sm:$0xf] %vm1134_vm3, %v1454_v10  ;;  %v844_v18 = vmax.f32 %v680_v11, 0.0  ;;  %v800_v19 = vadd.f32 %v1730_v38, %v799_v16  ;;  %v683_v20 = vadd.f32 %v1530_v17, %v1730_v38  ;;  %v1562_v21 = vpop.f32.mrb[30].mxu1  ;;  %v674_v22 = vpop.f32.mrb[31].mxu0 }
 0x121   : > { %v876_v23 = vmax.f32 %v808_v14, 0.0  ;;  %v842_v24 = vmax.f32 %v672_v15, 0.0  ;;  %v811_v25 = vadd.f32 %v1562_v21, %v1730_v38  ;;  %v675_v26 = vadd.f32 %v1730_v38, %v674_v22  ;;  %v802_v27 = vpop.f32.mrb[31].mxu1 }
 0x122   : > { %v1427_v28 = vpack.c.bf16 %v844_v18, %v844_v18  ;;  %v874_v29 = vmax.f32 %v800_v19, 0.0  ;;  %v845_v30 = vmax.f32 %v683_v20, 0.0  ;;  %v803_v31 = vadd.f32 %v1730_v38, %v802_v27 }
 0x123   : > { %v1459_v32 = vpack.c.bf16 %v876_v23, %v876_v23  ;;  %v1425_v33 = vpack.c.bf16 %v842_v24, %v842_v24  ;;  %v877_v34 = vmax.f32 %v811_v25, 0.0  ;;  %v843_v35 = vmax.f32 %v675_v26, 0.0 }
 0x124   : > { %1165 = vst.msk [vmem:[%s1742_s27 + $0x78] sm:$0xf] %vm1134_vm3, %v1427_v28  ;;  %v1457_v36 = vpack.c.bf16 %v874_v29, %v874_v29  ;;  %v1428_v37 = vpack.c.bf16 %v845_v30, %v845_v30  ;;  %v875_v39 = vmax.f32 %v803_v31, 0.0 }
 0x125   : > { %1197 = vst.msk [vmem:[%s1742_s27 + $0xf8] sm:$0xf] %vm1134_vm3, %v1459_v32  ;;  %1163 = vst.msk [vmem:[%s1742_s27 + $0x70] sm:$0xf] %vm1134_vm3, %v1425_v33  ;;  %v1460_v40 = vpack.c.bf16 %v877_v34, %v877_v34  ;;  %v1426_v41 = vpack.c.bf16 %v843_v35, %v843_v35 }
 0x126   : > { %1195 = vst.msk [vmem:[%s1742_s27 + $0xf0] sm:$0xf] %vm1134_vm3, %v1457_v36  ;;  %1166 = vst.msk [vmem:[%s1742_s27 + $0x7c] sm:$0xf] %vm1134_vm3, %v1428_v37  ;;  %v1458_v38 = vpack.c.bf16 %v875_v39, %v875_v39 }
 0x127   : > { %1198 = vst.msk [vmem:[%s1742_s27 + $0xfc] sm:$0xf] %vm1134_vm3, %v1460_v40  ;;  %1164 = vst.msk [vmem:[%s1742_s27 + $0x74] sm:$0xf] %vm1134_vm3, %v1426_v41 }
 0x128   : > { %1196 = vst.msk [vmem:[%s1742_s27 + $0xf4] sm:$0xf] %vm1134_vm3, %v1458_v38 }
 0x129 PF: > { %s13_s12 = sadd.s32 1, %s1616_s12  }
 0x12a   : > { %p10_p4 = scmp.ge.s32.totalorder %s13_s12, 6  }
 0x12c   :  { %12 = sbr.rel (!%p10_p4) target bundleno = 1 (0x1), region = 62 }

// kernel: e_senet_forward.10
= control target key start
LH: loop header
LB: loop body
LE: loop exit
PB: predicated region body
PF: predicated region fallthrough
CT: control target
= control target key end

     0   :  { %vm254_vm0 = vcmask 130048   ;;  %vm960_vm1 = vcmask 60416   ;;  %s1833_s1 = inlined_call_operand.vmem [shape: bf16[16,8], index: 1, kind: input, shape index: {}]   ;;  %s1834_s0 = inlined_call_operand.vmem [shape: bf16[512,16], index: 0, kind: input, shape index: {}]   ;;  %s1835_s2 = inlined_call_operand.vmem [shape: f32[1,8], index: 2, kind: input, shape index: {}]   ;;  %s1836_s3 = inlined_call_operand.vmem [shape: bf16[512,8], index: 3, kind: output, shape index: {}]  }
   0x1   :  { %v1324_v0 = vld [vmem:[%s1833_s1] sm:$0xff]   ;;  %v1327_v3 = vld [vmem:[%s1834_s0 + $0x8] sm:$0xff]   ;;  %v1329_v5 = vld [vmem:[%s1834_s0 + $0x10] sm:$0xff]  }
   0x2   :  { %v1325_v1 = vld [vmem:[%s1834_s0] sm:$0xff]   ;;  %1256 = vmatprep.subr.bf16.mxu0 %v1324_v0  ;;  %1322 = vmatprep.subr.bf16.mxu1 %v1324_v0  ;;  %v1328_v4 = vld [vmem:[%s1834_s0 + $0x88] sm:$0xff]   ;;  %v1330_v6 = vld [vmem:[%s1834_s0 + $0x90] sm:$0xff]  }
   0x3   :  { %v1326_v2 = vld [vmem:[%s1834_s0 + $0x80] sm:$0xff]   ;;  %1257 = vmatpush3.bf16.msra.mxu0 %v1324_v0  ;;  %1323 = vmatpush3.bf16.msra.mxu1 %v1324_v0  ;;  %v1331_v7 = vld [vmem:[%s1834_s0 + $0x18] sm:$0xff]   ;;  %v1335_v11 = vld [vmem:[%s1834_s0 + $0x28] sm:$0xff]  }
   0x4   :  { %1258 = vmatprep.mubr.msk.bf16.mxu0 %vm254_vm0, %v1325_v1  ;;  %1290 = vmatprep.mubr.msk.bf16.mxu1 %vm254_vm0, %v1326_v2  ;;  %v1332_v8 = vld [vmem:[%s1834_s0 + $0x98] sm:$0xff]   ;;  %v1333_v9 = vld [vmem:[%s1834_s0 + $0x20] sm:$0xff]   ;;  %v1336_v12 = vld [vmem:[%s1834_s0 + $0xa8] sm:$0xff]  }
   0x5   :  { %v1334_v10 = vld [vmem:[%s1834_s0 + $0xa0] sm:$0xff]   ;;  %v1337_v13 = vld [vmem:[%s1834_s0 + $0x30] sm:$0xff]   ;;  %v1339_v15 = vld [vmem:[%s1834_s0 + $0x38] sm:$0xff]  }
   0x6   :  { %1259 = vmatmul.mubr.msk.bf16.vlgmr.msra.gmra.mrb[0].mxu0 %vm254_vm0, %v1327_v3  ;;  %1291 = vmatmul.mubr.msk.bf16.vlgmr.msra.gmra.mrb[0].mxu1 %vm254_vm0, %v1328_v4  ;;  %v1338_v14 = vld [vmem:[%s1834_s0 + $0xb0] sm:$0xff]   ;;  %v1340_v16 = vld [vmem:[%s1834_s0 + $0xb8] sm:$0xff]   ;;  %v1341_v17 = vld [vmem:[%s1834_s0 + $0x40] sm:$0xff]  }
   0x7   :  { %1262 = vmatprep.mubr.msk.bf16.mxu0 %vm254_vm0, %v1329_v5  ;;  %1294 = vmatprep.mubr.msk.bf16.mxu1 %vm254_vm0, %v1330_v6  ;;  %v1342_v18 = vld [vmem:[%s1834_s0 + $0xc0] sm:$0xff]   ;;  %v1343_v19 = vld [vmem:[%s1834_s0 + $0x48] sm:$0xff]   ;;  %v1345_v21 = vld [vmem:[%s1834_s0 + $0x50] sm:$0xff]  }
   0x8   :  { %v1344_v20 = vld [vmem:[%s1834_s0 + $0xc8] sm:$0xff]   ;;  %v1346_v22 = vld [vmem:[%s1834_s0 + $0xd0] sm:$0xff]   ;;  %v1347_v23 = vld [vmem:[%s1834_s0 + $0x58] sm:$0xff]  }
   0x9   :  { %v1348_v24 = vld [vmem:[%s1834_s0 + $0xd8] sm:$0xff]   ;;  %v1349_v25 = vld [vmem:[%s1834_s0 + $0x60] sm:$0xff]   ;;  %v1351_v27 = vld [vmem:[%s1834_s0 + $0x68] sm:$0xff]  }
   0xa   :  { %v1350_v26 = vld [vmem:[%s1834_s0 + $0xe0] sm:$0xff]   ;;  %v1352_v28 = vld [vmem:[%s1834_s0 + $0xe8] sm:$0xff]   ;;  %v1353_v29 = vld [vmem:[%s1834_s0 + $0x70] sm:$0xff]  }
   0xb   :  { %v1354_v30 = vld [vmem:[%s1834_s0 + $0xf0] sm:$0xff]   ;;  %v1355_v31 = vld [vmem:[%s1834_s0 + $0x78] sm:$0xff]   ;;  %v1511_v33 = vld [vmem:[%s1835_s2] ss:$0 sm:$0xff] }
   0xc   :  { %v1356_v32 = vld [vmem:[%s1834_s0 + $0xf8] sm:$0xff]  }
   0xe   :  { %1263 = vmatmul.mubr.msk.bf16.gmra.mrb[4].mxu0 %vm254_vm0, %v1331_v7  ;;  %1295 = vmatmul.mubr.msk.bf16.gmra.mrb[4].mxu1 %vm254_vm0, %v1332_v8 }
   0xf   :  { %1266 = vmatprep.mubr.msk.bf16.mxu0 %vm254_vm0, %v1333_v9  ;;  %1298 = vmatprep.mubr.msk.bf16.mxu1 %vm254_vm0, %v1334_v10 }
  0x16   :  { %1267 = vmatmul.mubr.msk.bf16.gmra.mrb[8].mxu0 %vm254_vm0, %v1335_v11  ;;  %1299 = vmatmul.mubr.msk.bf16.gmra.mrb[8].mxu1 %vm254_vm0, %v1336_v12 }
  0x17   :  { %1270 = vmatprep.mubr.msk.bf16.mxu0 %vm254_vm0, %v1337_v13  ;;  %1302 = vmatprep.mubr.msk.bf16.mxu1 %vm254_vm0, %v1338_v14 }
  0x1e   :  { %1271 = vmatmul.mubr.msk.bf16.gmra.mrb[12].mxu0 %vm254_vm0, %v1339_v15  ;;  %1303 = vmatmul.mubr.msk.bf16.gmra.mrb[12].mxu1 %vm254_vm0, %v1340_v16 }
  0x1f   :  { %1274 = vmatprep.mubr.msk.bf16.mxu0 %vm254_vm0, %v1341_v17  ;;  %1306 = vmatprep.mubr.msk.bf16.mxu1 %vm254_vm0, %v1342_v18 }
  0x26   :  { %1275 = vmatmul.mubr.msk.bf16.gmra.mrb[16].mxu0 %vm254_vm0, %v1343_v19  ;;  %1307 = vmatmul.mubr.msk.bf16.gmra.mrb[16].mxu1 %vm254_vm0, %v1344_v20 }
  0x27   :  { %1278 = vmatprep.mubr.msk.bf16.mxu0 %vm254_vm0, %v1345_v21  ;;  %1310 = vmatprep.mubr.msk.bf16.mxu1 %vm254_vm0, %v1346_v22 }
  0x2e   :  { %1279 = vmatmul.mubr.msk.bf16.gmra.mrb[20].mxu0 %vm254_vm0, %v1347_v23  ;;  %1311 = vmatmul.mubr.msk.bf16.gmra.mrb[20].mxu1 %vm254_vm0, %v1348_v24 }
  0x2f   :  { %1282 = vmatprep.mubr.msk.bf16.mxu0 %vm254_vm0, %v1349_v25  ;;  %1314 = vmatprep.mubr.msk.bf16.mxu1 %vm254_vm0, %v1350_v26 }
  0x36   :  { %1283 = vmatmul.mubr.msk.bf16.gmra.mrb[24].mxu0 %vm254_vm0, %v1351_v27  ;;  %1315 = vmatmul.mubr.msk.bf16.gmra.mrb[24].mxu1 %vm254_vm0, %v1352_v28 }
  0x37   :  { %1286 = vmatprep.mubr.msk.bf16.mxu0 %vm254_vm0, %v1353_v29  ;;  %1318 = vmatprep.mubr.msk.bf16.mxu1 %vm254_vm0, %v1354_v30 }
  0x3e   :  { %1287 = vmatmul.mubr.msk.bf16.gmra.mrb[28].mxu0 %vm254_vm0, %v1355_v31  ;;  %1319 = vmatmul.mubr.msk.bf16.gmra.mrb[28].mxu1 %vm254_vm0, %v1356_v32 }
  0xd9   :  { %v1260_v34 = vpop.f32.mrb[0].mxu0  ;;  %v1292_v35 = vpop.f32.mrb[0].mxu1 }
  0xda   :  { %v394_v36 = vadd.f32 %v1260_v34, %v1511_v33  ;;  %v522_v37 = vadd.f32 %v1292_v35, %v1511_v33  ;;  %v385_v38 = vpop.f32.mrb[1].mxu0  ;;  %v513_v39 = vpop.f32.mrb[1].mxu1 }
  0xdb   :  { %v386_v40 = vadd.f32 %v1511_v33, %v385_v38  ;;  %v514_v41 = vadd.f32 %v1511_v33, %v513_v39  ;;  %v1261_v42 = vpop.f32.mrb[2].mxu0  ;;  %v1293_v43 = vpop.f32.mrb[2].mxu1 }
  0xdc   :  { %v642_v44 = vmax.f32 %v394_v36, 0.0  ;;  %v674_v45 = vmax.f32 %v522_v37, 0.0  ;;  %v397_v46 = vadd.f32 %v1261_v42, %v1511_v33  ;;  %v525_v47 = vadd.f32 %v1293_v43, %v1511_v33  ;;  %v388_v48 = vpop.f32.mrb[3].mxu0  ;;  %v516_v49 = vpop.f32.mrb[3].mxu1 }
  0xdd   :  { %v640_v50 = vmax.f32 %v386_v40, 0.0  ;;  %v672_v51 = vmax.f32 %v514_v41, 0.0  ;;  %v389_v52 = vadd.f32 %v1511_v33, %v388_v48  ;;  %v517_v53 = vadd.f32 %v1511_v33, %v516_v49 }
  0xde   :  { %v1161_v54 = vpack.c.bf16 %v642_v44, %v642_v44  ;;  %v1193_v55 = vpack.c.bf16 %v674_v45, %v674_v45  ;;  %v643_v56 = vmax.f32 %v397_v46, 0.0  ;;  %v675_v57 = vmax.f32 %v525_v47, 0.0 }
  0xdf   :  { %v1159_v58 = vpack.c.bf16 %v640_v50, %v640_v50  ;;  %v1191_v59 = vpack.c.bf16 %v672_v51, %v672_v51  ;;  %v641_v60 = vmax.f32 %v389_v52, 0.0  ;;  %v673_v61 = vmax.f32 %v517_v53, 0.0 }
  0xe0   :  { %963 = vst.msk [vmem:[%s1836_s3 + $0x8] sm:$0xf] %vm960_vm1, %v1161_v54  ;;  %995 = vst.msk [vmem:[%s1836_s3 + $0x88] sm:$0xf] %vm960_vm1, %v1193_v55  ;;  %v1162_v62 = vpack.c.bf16 %v643_v56, %v643_v56  ;;  %v1194_v63 = vpack.c.bf16 %v675_v57, %v675_v57 }
  0xe1   :  { %961 = vst.msk [vmem:[%s1836_s3] sm:$0xf] %vm960_vm1, %v1159_v58  ;;  %993 = vst.msk [vmem:[%s1836_s3 + $0x80] sm:$0xf] %vm960_vm1, %v1191_v59  ;;  %v1160_v0 = vpack.c.bf16 %v641_v60, %v641_v60  ;;  %v1192_v1 = vpack.c.bf16 %v673_v61, %v673_v61  ;;  %v1264_v2 = vpop.f32.mrb[4].mxu0  ;;  %v1296_v3 = vpop.f32.mrb[4].mxu1 }
  0xe2   :  { %964 = vst.msk [vmem:[%s1836_s3 + $0xc] sm:$0xf] %vm960_vm1, %v1162_v62  ;;  %996 = vst.msk [vmem:[%s1836_s3 + $0x8c] sm:$0xf] %vm960_vm1, %v1194_v63  ;;  %v410_v4 = vadd.f32 %v1264_v2, %v1511_v33  ;;  %v538_v5 = vadd.f32 %v1296_v3, %v1511_v33  ;;  %v401_v6 = vpop.f32.mrb[5].mxu0  ;;  %v529_v7 = vpop.f32.mrb[5].mxu1 }
  0xe3   :  { %962 = vst.msk [vmem:[%s1836_s3 + $0x4] sm:$0xf] %vm960_vm1, %v1160_v0  ;;  %994 = vst.msk [vmem:[%s1836_s3 + $0x84] sm:$0xf] %vm960_vm1, %v1192_v1  ;;  %v402_v8 = vadd.f32 %v1511_v33, %v401_v6  ;;  %v530_v9 = vadd.f32 %v1511_v33, %v529_v7  ;;  %v1265_v10 = vpop.f32.mrb[6].mxu0  ;;  %v1297_v11 = vpop.f32.mrb[6].mxu1 }
  0xe4   :  { %v646_v12 = vmax.f32 %v410_v4, 0.0  ;;  %v678_v13 = vmax.f32 %v538_v5, 0.0  ;;  %v413_v14 = vadd.f32 %v1265_v10, %v1511_v33  ;;  %v541_v15 = vadd.f32 %v1297_v11, %v1511_v33  ;;  %v404_v16 = vpop.f32.mrb[7].mxu0  ;;  %v532_v17 = vpop.f32.mrb[7].mxu1 }
  0xe5   :  { %v644_v18 = vmax.f32 %v402_v8, 0.0  ;;  %v676_v19 = vmax.f32 %v530_v9, 0.0  ;;  %v405_v20 = vadd.f32 %v1511_v33, %v404_v16  ;;  %v533_v21 = vadd.f32 %v1511_v33, %v532_v17 }
  0xe6   :  { %v1165_v22 = vpack.c.bf16 %v646_v12, %v646_v12  ;;  %v1197_v23 = vpack.c.bf16 %v678_v13, %v678_v13  ;;  %v647_v24 = vmax.f32 %v413_v14, 0.0  ;;  %v679_v25 = vmax.f32 %v541_v15, 0.0 }
  0xe7   :  { %v1163_v26 = vpack.c.bf16 %v644_v18, %v644_v18  ;;  %v1195_v27 = vpack.c.bf16 %v676_v19, %v676_v19  ;;  %v645_v28 = vmax.f32 %v405_v20, 0.0  ;;  %v677_v29 = vmax.f32 %v533_v21, 0.0 }
  0xe8   :  { %967 = vst.msk [vmem:[%s1836_s3 + $0x18] sm:$0xf] %vm960_vm1, %v1165_v22  ;;  %999 = vst.msk [vmem:[%s1836_s3 + $0x98] sm:$0xf] %vm960_vm1, %v1197_v23  ;;  %v1166_v30 = vpack.c.bf16 %v647_v24, %v647_v24  ;;  %v1198_v31 = vpack.c.bf16 %v679_v25, %v679_v25 }
  0xe9   :  { %965 = vst.msk [vmem:[%s1836_s3 + $0x10] sm:$0xf] %vm960_vm1, %v1163_v26  ;;  %997 = vst.msk [vmem:[%s1836_s3 + $0x90] sm:$0xf] %vm960_vm1, %v1195_v27  ;;  %v1164_v32 = vpack.c.bf16 %v645_v28, %v645_v28  ;;  %v1196_v34 = vpack.c.bf16 %v677_v29, %v677_v29  ;;  %v1268_v35 = vpop.f32.mrb[8].mxu0  ;;  %v1300_v36 = vpop.f32.mrb[8].mxu1 }
  0xea   :  { %968 = vst.msk [vmem:[%s1836_s3 + $0x1c] sm:$0xf] %vm960_vm1, %v1166_v30  ;;  %1000 = vst.msk [vmem:[%s1836_s3 + $0x9c] sm:$0xf] %vm960_vm1, %v1198_v31  ;;  %v426_v37 = vadd.f32 %v1268_v35, %v1511_v33  ;;  %v554_v38 = vadd.f32 %v1300_v36, %v1511_v33  ;;  %v417_v39 = vpop.f32.mrb[9].mxu0  ;;  %v545_v40 = vpop.f32.mrb[9].mxu1 }
  0xeb   :  { %966 = vst.msk [vmem:[%s1836_s3 + $0x14] sm:$0xf] %vm960_vm1, %v1164_v32  ;;  %998 = vst.msk [vmem:[%s1836_s3 + $0x94] sm:$0xf] %vm960_vm1, %v1196_v34  ;;  %v418_v41 = vadd.f32 %v1511_v33, %v417_v39  ;;  %v546_v42 = vadd.f32 %v1511_v33, %v545_v40  ;;  %v1269_v43 = vpop.f32.mrb[10].mxu0  ;;  %v1301_v44 = vpop.f32.mrb[10].mxu1 }
  0xec   :  { %v650_v45 = vmax.f32 %v426_v37, 0.0  ;;  %v682_v46 = vmax.f32 %v554_v38, 0.0  ;;  %v429_v47 = vadd.f32 %v1269_v43, %v1511_v33  ;;  %v557_v48 = vadd.f32 %v1301_v44, %v1511_v33  ;;  %v420_v49 = vpop.f32.mrb[11].mxu0  ;;  %v548_v50 = vpop.f32.mrb[11].mxu1 }
  0xed   :  { %v648_v51 = vmax.f32 %v418_v41, 0.0  ;;  %v680_v52 = vmax.f32 %v546_v42, 0.0  ;;  %v421_v53 = vadd.f32 %v1511_v33, %v420_v49  ;;  %v549_v54 = vadd.f32 %v1511_v33, %v548_v50 }
  0xee   :  { %v1169_v55 = vpack.c.bf16 %v650_v45, %v650_v45  ;;  %v1201_v56 = vpack.c.bf16 %v682_v46, %v682_v46  ;;  %v651_v57 = vmax.f32 %v429_v47, 0.0  ;;  %v683_v58 = vmax.f32 %v557_v48, 0.0 }
  0xef   :  { %v1167_v59 = vpack.c.bf16 %v648_v51, %v648_v51  ;;  %v1199_v60 = vpack.c.bf16 %v680_v52, %v680_v52  ;;  %v649_v61 = vmax.f32 %v421_v53, 0.0  ;;  %v681_v62 = vmax.f32 %v549_v54, 0.0 }
  0xf0   :  { %971 = vst.msk [vmem:[%s1836_s3 + $0x28] sm:$0xf] %vm960_vm1, %v1169_v55  ;;  %1003 = vst.msk [vmem:[%s1836_s3 + $0xa8] sm:$0xf] %vm960_vm1, %v1201_v56  ;;  %v1170_v63 = vpack.c.bf16 %v651_v57, %v651_v57  ;;  %v1202_v0 = vpack.c.bf16 %v683_v58, %v683_v58 }
  0xf1   :  { %969 = vst.msk [vmem:[%s1836_s3 + $0x20] sm:$0xf] %vm960_vm1, %v1167_v59  ;;  %1001 = vst.msk [vmem:[%s1836_s3 + $0xa0] sm:$0xf] %vm960_vm1, %v1199_v60  ;;  %v1168_v1 = vpack.c.bf16 %v649_v61, %v649_v61  ;;  %v1200_v2 = vpack.c.bf16 %v681_v62, %v681_v62  ;;  %v1272_v3 = vpop.f32.mrb[12].mxu0  ;;  %v1304_v4 = vpop.f32.mrb[12].mxu1 }
  0xf2   :  { %972 = vst.msk [vmem:[%s1836_s3 + $0x2c] sm:$0xf] %vm960_vm1, %v1170_v63  ;;  %1004 = vst.msk [vmem:[%s1836_s3 + $0xac] sm:$0xf] %vm960_vm1, %v1202_v0  ;;  %v442_v5 = vadd.f32 %v1272_v3, %v1511_v33  ;;  %v570_v6 = vadd.f32 %v1304_v4, %v1511_v33  ;;  %v433_v7 = vpop.f32.mrb[13].mxu0  ;;  %v561_v8 = vpop.f32.mrb[13].mxu1 }
  0xf3   :  { %970 = vst.msk [vmem:[%s1836_s3 + $0x24] sm:$0xf] %vm960_vm1, %v1168_v1  ;;  %1002 = vst.msk [vmem:[%s1836_s3 + $0xa4] sm:$0xf] %vm960_vm1, %v1200_v2  ;;  %v434_v9 = vadd.f32 %v1511_v33, %v433_v7  ;;  %v562_v10 = vadd.f32 %v1511_v33, %v561_v8  ;;  %v1273_v11 = vpop.f32.mrb[14].mxu0  ;;  %v1305_v12 = vpop.f32.mrb[14].mxu1 }
  0xf4   :  { %v654_v13 = vmax.f32 %v442_v5, 0.0  ;;  %v686_v14 = vmax.f32 %v570_v6, 0.0  ;;  %v445_v15 = vadd.f32 %v1273_v11, %v1511_v33  ;;  %v573_v16 = vadd.f32 %v1305_v12, %v1511_v33  ;;  %v436_v17 = vpop.f32.mrb[15].mxu0  ;;  %v564_v18 = vpop.f32.mrb[15].mxu1 }
  0xf5   :  { %v652_v19 = vmax.f32 %v434_v9, 0.0  ;;  %v684_v20 = vmax.f32 %v562_v10, 0.0  ;;  %v437_v21 = vadd.f32 %v1511_v33, %v436_v17  ;;  %v565_v22 = vadd.f32 %v1511_v33, %v564_v18 }
  0xf6   :  { %v1173_v23 = vpack.c.bf16 %v654_v13, %v654_v13  ;;  %v1205_v24 = vpack.c.bf16 %v686_v14, %v686_v14  ;;  %v655_v25 = vmax.f32 %v445_v15, 0.0  ;;  %v687_v26 = vmax.f32 %v573_v16, 0.0 }
  0xf7   :  { %v1171_v27 = vpack.c.bf16 %v652_v19, %v652_v19  ;;  %v1203_v28 = vpack.c.bf16 %v684_v20, %v684_v20  ;;  %v653_v29 = vmax.f32 %v437_v21, 0.0  ;;  %v685_v30 = vmax.f32 %v565_v22, 0.0 }
  0xf8   :  { %975 = vst.msk [vmem:[%s1836_s3 + $0x38] sm:$0xf] %vm960_vm1, %v1173_v23  ;;  %1007 = vst.msk [vmem:[%s1836_s3 + $0xb8] sm:$0xf] %vm960_vm1, %v1205_v24  ;;  %v1174_v31 = vpack.c.bf16 %v655_v25, %v655_v25  ;;  %v1206_v32 = vpack.c.bf16 %v687_v26, %v687_v26 }
  0xf9   :  { %973 = vst.msk [vmem:[%s1836_s3 + $0x30] sm:$0xf] %vm960_vm1, %v1171_v27  ;;  %1005 = vst.msk [vmem:[%s1836_s3 + $0xb0] sm:$0xf] %vm960_vm1, %v1203_v28  ;;  %v1172_v34 = vpack.c.bf16 %v653_v29, %v653_v29  ;;  %v1204_v35 = vpack.c.bf16 %v685_v30, %v685_v30  ;;  %v1276_v36 = vpop.f32.mrb[16].mxu0  ;;  %v1308_v37 = vpop.f32.mrb[16].mxu1 }
  0xfa   :  { %976 = vst.msk [vmem:[%s1836_s3 + $0x3c] sm:$0xf] %vm960_vm1, %v1174_v31  ;;  %1008 = vst.msk [vmem:[%s1836_s3 + $0xbc] sm:$0xf] %vm960_vm1, %v1206_v32  ;;  %v458_v38 = vadd.f32 %v1276_v36, %v1511_v33  ;;  %v586_v39 = vadd.f32 %v1308_v37, %v1511_v33  ;;  %v449_v40 = vpop.f32.mrb[17].mxu0  ;;  %v577_v41 = vpop.f32.mrb[17].mxu1 }
  0xfb   :  { %974 = vst.msk [vmem:[%s1836_s3 + $0x34] sm:$0xf] %vm960_vm1, %v1172_v34  ;;  %1006 = vst.msk [vmem:[%s1836_s3 + $0xb4] sm:$0xf] %vm960_vm1, %v1204_v35  ;;  %v450_v42 = vadd.f32 %v1511_v33, %v449_v40  ;;  %v578_v43 = vadd.f32 %v1511_v33, %v577_v41  ;;  %v1277_v44 = vpop.f32.mrb[18].mxu0  ;;  %v1309_v45 = vpop.f32.mrb[18].mxu1 }
  0xfc   :  { %v658_v46 = vmax.f32 %v458_v38, 0.0  ;;  %v690_v47 = vmax.f32 %v586_v39, 0.0  ;;  %v461_v48 = vadd.f32 %v1277_v44, %v1511_v33  ;;  %v589_v49 = vadd.f32 %v1309_v45, %v1511_v33  ;;  %v452_v50 = vpop.f32.mrb[19].mxu0  ;;  %v580_v51 = vpop.f32.mrb[19].mxu1 }
  0xfd   :  { %v656_v52 = vmax.f32 %v450_v42, 0.0  ;;  %v688_v53 = vmax.f32 %v578_v43, 0.0  ;;  %v453_v54 = vadd.f32 %v1511_v33, %v452_v50  ;;  %v581_v55 = vadd.f32 %v1511_v33, %v580_v51 }
  0xfe   :  { %v1177_v56 = vpack.c.bf16 %v658_v46, %v658_v46  ;;  %v1209_v57 = vpack.c.bf16 %v690_v47, %v690_v47  ;;  %v659_v58 = vmax.f32 %v461_v48, 0.0  ;;  %v691_v59 = vmax.f32 %v589_v49, 0.0 }
  0xff   :  { %v1175_v60 = vpack.c.bf16 %v656_v52, %v656_v52  ;;  %v1207_v61 = vpack.c.bf16 %v688_v53, %v688_v53  ;;  %v657_v62 = vmax.f32 %v453_v54, 0.0  ;;  %v689_v63 = vmax.f32 %v581_v55, 0.0 }
 0x100   :  { %979 = vst.msk [vmem:[%s1836_s3 + $0x48] sm:$0xf] %vm960_vm1, %v1177_v56  ;;  %1011 = vst.msk [vmem:[%s1836_s3 + $0xc8] sm:$0xf] %vm960_vm1, %v1209_v57  ;;  %v1178_v0 = vpack.c.bf16 %v659_v58, %v659_v58  ;;  %v1210_v1 = vpack.c.bf16 %v691_v59, %v691_v59 }
 0x101   :  { %977 = vst.msk [vmem:[%s1836_s3 + $0x40] sm:$0xf] %vm960_vm1, %v1175_v60  ;;  %1009 = vst.msk [vmem:[%s1836_s3 + $0xc0] sm:$0xf] %vm960_vm1, %v1207_v61  ;;  %v1176_v2 = vpack.c.bf16 %v657_v62, %v657_v62  ;;  %v1208_v3 = vpack.c.bf16 %v689_v63, %v689_v63  ;;  %v1280_v4 = vpop.f32.mrb[20].mxu0  ;;  %v1312_v5 = vpop.f32.mrb[20].mxu1 }
 0x102   :  { %980 = vst.msk [vmem:[%s1836_s3 + $0x4c] sm:$0xf] %vm960_vm1, %v1178_v0  ;;  %1012 = vst.msk [vmem:[%s1836_s3 + $0xcc] sm:$0xf] %vm960_vm1, %v1210_v1  ;;  %v474_v6 = vadd.f32 %v1280_v4, %v1511_v33  ;;  %v602_v7 = vadd.f32 %v1312_v5, %v1511_v33  ;;  %v465_v8 = vpop.f32.mrb[21].mxu0  ;;  %v593_v9 = vpop.f32.mrb[21].mxu1 }
 0x103   :  { %978 = vst.msk [vmem:[%s1836_s3 + $0x44] sm:$0xf] %vm960_vm1, %v1176_v2  ;;  %1010 = vst.msk [vmem:[%s1836_s3 + $0xc4] sm:$0xf] %vm960_vm1, %v1208_v3  ;;  %v466_v10 = vadd.f32 %v1511_v33, %v465_v8  ;;  %v594_v11 = vadd.f32 %v1511_v33, %v593_v9  ;;  %v1281_v12 = vpop.f32.mrb[22].mxu0  ;;  %v1313_v13 = vpop.f32.mrb[22].mxu1 }
 0x104   :  { %v662_v14 = vmax.f32 %v474_v6, 0.0  ;;  %v694_v15 = vmax.f32 %v602_v7, 0.0  ;;  %v477_v16 = vadd.f32 %v1281_v12, %v1511_v33  ;;  %v605_v17 = vadd.f32 %v1313_v13, %v1511_v33  ;;  %v468_v18 = vpop.f32.mrb[23].mxu0  ;;  %v596_v19 = vpop.f32.mrb[23].mxu1 }
 0x105   :  { %v660_v20 = vmax.f32 %v466_v10, 0.0  ;;  %v692_v21 = vmax.f32 %v594_v11, 0.0  ;;  %v469_v22 = vadd.f32 %v1511_v33, %v468_v18  ;;  %v597_v23 = vadd.f32 %v1511_v33, %v596_v19 }
 0x106   :  { %v1181_v24 = vpack.c.bf16 %v662_v14, %v662_v14  ;;  %v1213_v25 = vpack.c.bf16 %v694_v15, %v694_v15  ;;  %v663_v26 = vmax.f32 %v477_v16, 0.0  ;;  %v695_v27 = vmax.f32 %v605_v17, 0.0 }
 0x107   :  { %v1179_v28 = vpack.c.bf16 %v660_v20, %v660_v20  ;;  %v1211_v29 = vpack.c.bf16 %v692_v21, %v692_v21  ;;  %v661_v30 = vmax.f32 %v469_v22, 0.0  ;;  %v693_v31 = vmax.f32 %v597_v23, 0.0 }
 0x108   :  { %983 = vst.msk [vmem:[%s1836_s3 + $0x58] sm:$0xf] %vm960_vm1, %v1181_v24  ;;  %1015 = vst.msk [vmem:[%s1836_s3 + $0xd8] sm:$0xf] %vm960_vm1, %v1213_v25  ;;  %v1182_v32 = vpack.c.bf16 %v663_v26, %v663_v26  ;;  %v1214_v34 = vpack.c.bf16 %v695_v27, %v695_v27 }
 0x109   :  { %981 = vst.msk [vmem:[%s1836_s3 + $0x50] sm:$0xf] %vm960_vm1, %v1179_v28  ;;  %1013 = vst.msk [vmem:[%s1836_s3 + $0xd0] sm:$0xf] %vm960_vm1, %v1211_v29  ;;  %v1180_v35 = vpack.c.bf16 %v661_v30, %v661_v30  ;;  %v1212_v36 = vpack.c.bf16 %v693_v31, %v693_v31  ;;  %v1284_v37 = vpop.f32.mrb[24].mxu0  ;;  %v1316_v38 = vpop.f32.mrb[24].mxu1 }
 0x10a   :  { %984 = vst.msk [vmem:[%s1836_s3 + $0x5c] sm:$0xf] %vm960_vm1, %v1182_v32  ;;  %1016 = vst.msk [vmem:[%s1836_s3 + $0xdc] sm:$0xf] %vm960_vm1, %v1214_v34  ;;  %v490_v39 = vadd.f32 %v1284_v37, %v1511_v33  ;;  %v618_v40 = vadd.f32 %v1316_v38, %v1511_v33  ;;  %v481_v41 = vpop.f32.mrb[25].mxu0  ;;  %v609_v42 = vpop.f32.mrb[25].mxu1 }
 0x10b   :  { %982 = vst.msk [vmem:[%s1836_s3 + $0x54] sm:$0xf] %vm960_vm1, %v1180_v35  ;;  %1014 = vst.msk [vmem:[%s1836_s3 + $0xd4] sm:$0xf] %vm960_vm1, %v1212_v36  ;;  %v482_v43 = vadd.f32 %v1511_v33, %v481_v41  ;;  %v610_v44 = vadd.f32 %v1511_v33, %v609_v42  ;;  %v1285_v45 = vpop.f32.mrb[26].mxu0  ;;  %v1317_v46 = vpop.f32.mrb[26].mxu1 }
 0x10c   :  { %v666_v47 = vmax.f32 %v490_v39, 0.0  ;;  %v698_v48 = vmax.f32 %v618_v40, 0.0  ;;  %v493_v49 = vadd.f32 %v1285_v45, %v1511_v33  ;;  %v621_v50 = vadd.f32 %v1317_v46, %v1511_v33  ;;  %v484_v51 = vpop.f32.mrb[27].mxu0  ;;  %v612_v52 = vpop.f32.mrb[27].mxu1 }
 0x10d   :  { %v664_v53 = vmax.f32 %v482_v43, 0.0  ;;  %v696_v54 = vmax.f32 %v610_v44, 0.0  ;;  %v485_v55 = vadd.f32 %v1511_v33, %v484_v51  ;;  %v613_v56 = vadd.f32 %v1511_v33, %v612_v52 }
 0x10e   :  { %v1185_v57 = vpack.c.bf16 %v666_v47, %v666_v47  ;;  %v1217_v58 = vpack.c.bf16 %v698_v48, %v698_v48  ;;  %v667_v59 = vmax.f32 %v493_v49, 0.0  ;;  %v699_v60 = vmax.f32 %v621_v50, 0.0 }
 0x10f   :  { %v1183_v61 = vpack.c.bf16 %v664_v53, %v664_v53  ;;  %v1215_v62 = vpack.c.bf16 %v696_v54, %v696_v54  ;;  %v665_v63 = vmax.f32 %v485_v55, 0.0  ;;  %v697_v0 = vmax.f32 %v613_v56, 0.0 }
 0x110   :  { %987 = vst.msk [vmem:[%s1836_s3 + $0x68] sm:$0xf] %vm960_vm1, %v1185_v57  ;;  %1019 = vst.msk [vmem:[%s1836_s3 + $0xe8] sm:$0xf] %vm960_vm1, %v1217_v58  ;;  %v1186_v1 = vpack.c.bf16 %v667_v59, %v667_v59  ;;  %v1218_v2 = vpack.c.bf16 %v699_v60, %v699_v60 }
 0x111   :  { %985 = vst.msk [vmem:[%s1836_s3 + $0x60] sm:$0xf] %vm960_vm1, %v1183_v61  ;;  %1017 = vst.msk [vmem:[%s1836_s3 + $0xe0] sm:$0xf] %vm960_vm1, %v1215_v62  ;;  %v1184_v3 = vpack.c.bf16 %v665_v63, %v665_v63  ;;  %v1216_v4 = vpack.c.bf16 %v697_v0, %v697_v0  ;;  %v1288_v5 = vpop.f32.mrb[28].mxu0  ;;  %v1320_v6 = vpop.f32.mrb[28].mxu1 }
 0x112   :  { %988 = vst.msk [vmem:[%s1836_s3 + $0x6c] sm:$0xf] %vm960_vm1, %v1186_v1  ;;  %1020 = vst.msk [vmem:[%s1836_s3 + $0xec] sm:$0xf] %vm960_vm1, %v1218_v2  ;;  %v506_v7 = vadd.f32 %v1288_v5, %v1511_v33  ;;  %v634_v8 = vadd.f32 %v1320_v6, %v1511_v33  ;;  %v497_v9 = vpop.f32.mrb[29].mxu0  ;;  %v625_v10 = vpop.f32.mrb[29].mxu1 }
 0x113   :  { %986 = vst.msk [vmem:[%s1836_s3 + $0x64] sm:$0xf] %vm960_vm1, %v1184_v3  ;;  %1018 = vst.msk [vmem:[%s1836_s3 + $0xe4] sm:$0xf] %vm960_vm1, %v1216_v4  ;;  %v498_v11 = vadd.f32 %v1511_v33, %v497_v9  ;;  %v626_v12 = vadd.f32 %v1511_v33, %v625_v10  ;;  %v1289_v13 = vpop.f32.mrb[30].mxu0  ;;  %v1321_v14 = vpop.f32.mrb[30].mxu1 }
 0x114   :  { %v670_v15 = vmax.f32 %v506_v7, 0.0  ;;  %v702_v16 = vmax.f32 %v634_v8, 0.0  ;;  %v509_v17 = vadd.f32 %v1289_v13, %v1511_v33  ;;  %v637_v18 = vadd.f32 %v1321_v14, %v1511_v33  ;;  %v500_v19 = vpop.f32.mrb[31].mxu0  ;;  %v628_v20 = vpop.f32.mrb[31].mxu1 }
 0x115   :  { %v668_v21 = vmax.f32 %v498_v11, 0.0  ;;  %v700_v22 = vmax.f32 %v626_v12, 0.0  ;;  %v501_v23 = vadd.f32 %v1511_v33, %v500_v19  ;;  %v629_v24 = vadd.f32 %v1511_v33, %v628_v20 }
 0x116   :  { %v1189_v25 = vpack.c.bf16 %v670_v15, %v670_v15  ;;  %v1221_v26 = vpack.c.bf16 %v702_v16, %v702_v16  ;;  %v671_v27 = vmax.f32 %v509_v17, 0.0  ;;  %v703_v28 = vmax.f32 %v637_v18, 0.0 }
 0x117   :  { %v1187_v29 = vpack.c.bf16 %v668_v21, %v668_v21  ;;  %v1219_v30 = vpack.c.bf16 %v700_v22, %v700_v22  ;;  %v669_v31 = vmax.f32 %v501_v23, 0.0  ;;  %v701_v32 = vmax.f32 %v629_v24, 0.0 }
 0x118   :  { %991 = vst.msk [vmem:[%s1836_s3 + $0x78] sm:$0xf] %vm960_vm1, %v1189_v25  ;;  %1023 = vst.msk [vmem:[%s1836_s3 + $0xf8] sm:$0xf] %vm960_vm1, %v1221_v26  ;;  %v1190_v34 = vpack.c.bf16 %v671_v27, %v671_v27  ;;  %v1222_v33 = vpack.c.bf16 %v703_v28, %v703_v28 }
 0x119   :  { %989 = vst.msk [vmem:[%s1836_s3 + $0x70] sm:$0xf] %vm960_vm1, %v1187_v29  ;;  %1021 = vst.msk [vmem:[%s1836_s3 + $0xf0] sm:$0xf] %vm960_vm1, %v1219_v30  ;;  %v1188_v35 = vpack.c.bf16 %v669_v31, %v669_v31  ;;  %v1220_v36 = vpack.c.bf16 %v701_v32, %v701_v32 }
 0x11a   :  { %992 = vst.msk [vmem:[%s1836_s3 + $0x7c] sm:$0xf] %vm960_vm1, %v1190_v34  ;;  %1024 = vst.msk [vmem:[%s1836_s3 + $0xfc] sm:$0xf] %vm960_vm1, %v1222_v33 }
 0x11b   :  { %990 = vst.msk [vmem:[%s1836_s3 + $0x74] sm:$0xf] %vm960_vm1, %v1188_v35  ;;  %1022 = vst.msk [vmem:[%s1836_s3 + $0xf4] sm:$0xf] %vm960_vm1, %v1220_v36 }

// kernel: e_senet_forward.12
= control target key start
LH: loop header
LB: loop body
LE: loop exit
PB: predicated region body
PF: predicated region fallthrough
CT: control target
= control target key end

     0   :  { %vm262_vm0 = vcmask 261120   ;;  %vm968_vm1 = vcmask 125952   ;;  %s1851_s1 = inlined_call_operand.vmem [shape: bf16[32,16], index: 1, kind: input, shape index: {}]   ;;  %s1852_s0 = inlined_call_operand.vmem [shape: bf16[512,32], index: 0, kind: input, shape index: {}]   ;;  %s1853_s2 = inlined_call_operand.vmem [shape: f32[1,16], index: 2, kind: input, shape index: {}]   ;;  %s1854_s3 = inlined_call_operand.vmem [shape: bf16[512,16], index: 3, kind: output, shape index: {}]  }
   0x1   :  { %v1338_v0 = vld [vmem:[%s1851_s1] sm:$0xff]   ;;  %v1339_v1 = vld [vmem:[%s1851_s1 + $0x8] sm:$0xff]   ;;  %v1344_v6 = vld [vmem:[%s1852_s0 + $0x10] sm:$0xff]  }
   0x2   :  { %1266 = vmatprep.subr.bf16.mxu0 %v1338_v0  ;;  %1334 = vmatprep.subr.bf16.mxu1 %v1338_v0  ;;  %v1340_v2 = vld [vmem:[%s1852_s0] sm:$0xff]   ;;  %v1342_v4 = vld [vmem:[%s1852_s0 + $0x8] sm:$0xff]   ;;  %v1345_v7 = vld [vmem:[%s1852_s0 + $0x90] sm:$0xff]  }
   0x3   :  { %1267 = vmatpush3.bf16.msra.mxu0 %v1338_v0  ;;  %1336 = vmatpush3.bf16.msra.mxu1 %v1338_v0  ;;  %v1341_v3 = vld [vmem:[%s1852_s0 + $0x80] sm:$0xff]   ;;  %v1343_v5 = vld [vmem:[%s1852_s0 + $0x88] sm:$0xff]   ;;  %v1346_v8 = vld [vmem:[%s1852_s0 + $0x18] sm:$0xff]  }
   0x4   :  { %1268 = vmatprep.subr.bf16.mxu0 %v1339_v1  ;;  %1335 = vmatprep.subr.bf16.mxu1 %v1339_v1  ;;  %v1347_v9 = vld [vmem:[%s1852_s0 + $0x98] sm:$0xff]   ;;  %v1348_v10 = vld [vmem:[%s1852_s0 + $0x20] sm:$0xff]   ;;  %v1350_v12 = vld [vmem:[%s1852_s0 + $0x28] sm:$0xff]  }
   0x5   :  { %1270 = vmatprep.mubr.msk.bf16.mxu0 %vm262_vm0, %v1340_v2  ;;  %1302 = vmatprep.mubr.msk.bf16.mxu1 %vm262_vm0, %v1341_v3  ;;  %v1349_v11 = vld [vmem:[%s1852_s0 + $0xa0] sm:$0xff]   ;;  %v1351_v13 = vld [vmem:[%s1852_s0 + $0xa8] sm:$0xff]   ;;  %v1352_v14 = vld [vmem:[%s1852_s0 + $0x30] sm:$0xff]  }
   0x6   :  { %v1353_v15 = vld [vmem:[%s1852_s0 + $0xb0] sm:$0xff]   ;;  %v1354_v16 = vld [vmem:[%s1852_s0 + $0x38] sm:$0xff]   ;;  %v1356_v18 = vld [vmem:[%s1852_s0 + $0x40] sm:$0xff]  }
   0x7   :  { %1269 = vmatpush3.bf16.msra.mxu0 %v1339_v1  ;;  %1337 = vmatpush3.bf16.msra.mxu1 %v1339_v1  ;;  %v1355_v17 = vld [vmem:[%s1852_s0 + $0xb8] sm:$0xff]   ;;  %v1357_v19 = vld [vmem:[%s1852_s0 + $0xc0] sm:$0xff]   ;;  %v1358_v20 = vld [vmem:[%s1852_s0 + $0x48] sm:$0xff]  }
   0x8   :  { %v1359_v21 = vld [vmem:[%s1852_s0 + $0xc8] sm:$0xff]   ;;  %v1360_v22 = vld [vmem:[%s1852_s0 + $0x50] sm:$0xff]   ;;  %v1362_v24 = vld [vmem:[%s1852_s0 + $0x58] sm:$0xff]  }
   0x9   :  { %v1361_v23 = vld [vmem:[%s1852_s0 + $0xd0] sm:$0xff]   ;;  %v1363_v25 = vld [vmem:[%s1852_s0 + $0xd8] sm:$0xff]   ;;  %v1364_v26 = vld [vmem:[%s1852_s0 + $0x60] sm:$0xff]  }
   0xa   :  { %1271 = vmatmul.mubr.msk.bf16.vlgmr.msra.gmra.mrb[0].mxu0 %vm262_vm0, %v1342_v4  ;;  %1303 = vmatmul.mubr.msk.bf16.vlgmr.msra.gmra.mrb[0].mxu1 %vm262_vm0, %v1343_v5  ;;  %v1365_v27 = vld [vmem:[%s1852_s0 + $0xe0] sm:$0xff]   ;;  %v1366_v28 = vld [vmem:[%s1852_s0 + $0x68] sm:$0xff]   ;;  %v1368_v30 = vld [vmem:[%s1852_s0 + $0x70] sm:$0xff]  }
   0xb   :  { %1274 = vmatprep.mubr.msk.bf16.mxu0 %vm262_vm0, %v1344_v6  ;;  %1306 = vmatprep.mubr.msk.bf16.mxu1 %vm262_vm0, %v1345_v7  ;;  %v1367_v29 = vld [vmem:[%s1852_s0 + $0xe8] sm:$0xff]   ;;  %v1369_v31 = vld [vmem:[%s1852_s0 + $0xf0] sm:$0xff]   ;;  %v1370_v32 = vld [vmem:[%s1852_s0 + $0x78] sm:$0xff]  }
   0xc   :  { %v1371_v33 = vld [vmem:[%s1852_s0 + $0xf8] sm:$0xff]   ;;  %v1529_v34 = vld [vmem:[%s1853_s2] ss:$0 sm:$0xff] }
  0x12   :  { %1275 = vmatmul.mubr.msk.bf16.gmra.mrb[4].mxu0 %vm262_vm0, %v1346_v8  ;;  %1307 = vmatmul.mubr.msk.bf16.gmra.mrb[4].mxu1 %vm262_vm0, %v1347_v9 }
  0x13   :  { %1278 = vmatprep.mubr.msk.bf16.mxu0 %vm262_vm0, %v1348_v10  ;;  %1310 = vmatprep.mubr.msk.bf16.mxu1 %vm262_vm0, %v1349_v11 }
  0x1a   :  { %1279 = vmatmul.mubr.msk.bf16.gmra.mrb[8].mxu0 %vm262_vm0, %v1350_v12  ;;  %1311 = vmatmul.mubr.msk.bf16.gmra.mrb[8].mxu1 %vm262_vm0, %v1351_v13 }
  0x1b   :  { %1282 = vmatprep.mubr.msk.bf16.mxu0 %vm262_vm0, %v1352_v14  ;;  %1314 = vmatprep.mubr.msk.bf16.mxu1 %vm262_vm0, %v1353_v15 }
  0x22   :  { %1283 = vmatmul.mubr.msk.bf16.gmra.mrb[12].mxu0 %vm262_vm0, %v1354_v16  ;;  %1315 = vmatmul.mubr.msk.bf16.gmra.mrb[12].mxu1 %vm262_vm0, %v1355_v17 }
  0x23   :  { %1286 = vmatprep.mubr.msk.bf16.mxu0 %vm262_vm0, %v1356_v18  ;;  %1318 = vmatprep.mubr.msk.bf16.mxu1 %vm262_vm0, %v1357_v19 }
  0x2a   :  { %1287 = vmatmul.mubr.msk.bf16.gmra.mrb[16].mxu0 %vm262_vm0, %v1358_v20  ;;  %1319 = vmatmul.mubr.msk.bf16.gmra.mrb[16].mxu1 %vm262_vm0, %v1359_v21 }
  0x2b   :  { %1290 = vmatprep.mubr.msk.bf16.mxu0 %vm262_vm0, %v1360_v22  ;;  %1322 = vmatprep.mubr.msk.bf16.mxu1 %vm262_vm0, %v1361_v23 }
  0x32   :  { %1291 = vmatmul.mubr.msk.bf16.gmra.mrb[20].mxu0 %vm262_vm0, %v1362_v24  ;;  %1323 = vmatmul.mubr.msk.bf16.gmra.mrb[20].mxu1 %vm262_vm0, %v1363_v25 }
  0x33   :  { %1294 = vmatprep.mubr.msk.bf16.mxu0 %vm262_vm0, %v1364_v26  ;;  %1326 = vmatprep.mubr.msk.bf16.mxu1 %vm262_vm0, %v1365_v27 }
  0x3a   :  { %1295 = vmatmul.mubr.msk.bf16.gmra.mrb[24].mxu0 %vm262_vm0, %v1366_v28  ;;  %1327 = vmatmul.mubr.msk.bf16.gmra.mrb[24].mxu1 %vm262_vm0, %v1367_v29 }
  0x3b   :  { %1298 = vmatprep.mubr.msk.bf16.mxu0 %vm262_vm0, %v1368_v30  ;;  %1330 = vmatprep.mubr.msk.bf16.mxu1 %vm262_vm0, %v1369_v31 }
  0x42   :  { %1299 = vmatmul.mubr.msk.bf16.gmra.mrb[28].mxu0 %vm262_vm0, %v1370_v32  ;;  %1331 = vmatmul.mubr.msk.bf16.gmra.mrb[28].mxu1 %vm262_vm0, %v1371_v33 }
  0xdd   :  { %v1272_v35 = vpop.f32.mrb[0].mxu0  ;;  %v1304_v36 = vpop.f32.mrb[0].mxu1 }
  0xde   :  { %v402_v37 = vadd.f32 %v1272_v35, %v1529_v34  ;;  %v530_v38 = vadd.f32 %v1304_v36, %v1529_v34  ;;  %v393_v39 = vpop.f32.mrb[1].mxu0  ;;  %v521_v40 = vpop.f32.mrb[1].mxu1 }
  0xdf   :  { %v394_v41 = vadd.f32 %v1529_v34, %v393_v39  ;;  %v522_v42 = vadd.f32 %v1529_v34, %v521_v40  ;;  %v1273_v43 = vpop.f32.mrb[2].mxu0  ;;  %v1305_v44 = vpop.f32.mrb[2].mxu1 }
  0xe0   :  { %v650_v45 = vmax.f32 %v402_v37, 0.0  ;;  %v682_v46 = vmax.f32 %v530_v38, 0.0  ;;  %v405_v47 = vadd.f32 %v1273_v43, %v1529_v34  ;;  %v533_v48 = vadd.f32 %v1305_v44, %v1529_v34  ;;  %v396_v49 = vpop.f32.mrb[3].mxu0  ;;  %v524_v50 = vpop.f32.mrb[3].mxu1 }
  0xe1   :  { %v648_v51 = vmax.f32 %v394_v41, 0.0  ;;  %v680_v52 = vmax.f32 %v522_v42, 0.0  ;;  %v397_v53 = vadd.f32 %v1529_v34, %v396_v49  ;;  %v525_v54 = vadd.f32 %v1529_v34, %v524_v50 }
  0xe2   :  { %v1170_v55 = vpack.c.bf16 %v650_v45, %v650_v45  ;;  %v1202_v56 = vpack.c.bf16 %v682_v46, %v682_v46  ;;  %v651_v57 = vmax.f32 %v405_v47, 0.0  ;;  %v683_v58 = vmax.f32 %v533_v48, 0.0 }
  0xe3   :  { %v1168_v59 = vpack.c.bf16 %v648_v51, %v648_v51  ;;  %v1200_v60 = vpack.c.bf16 %v680_v52, %v680_v52  ;;  %v649_v61 = vmax.f32 %v397_v53, 0.0  ;;  %v681_v62 = vmax.f32 %v525_v54, 0.0 }
  0xe4   :  { %971 = vst.msk [vmem:[%s1854_s3 + $0x8] sm:$0xf] %vm968_vm1, %v1170_v55  ;;  %1003 = vst.msk [vmem:[%s1854_s3 + $0x88] sm:$0xf] %vm968_vm1, %v1202_v56  ;;  %v1171_v63 = vpack.c.bf16 %v651_v57, %v651_v57  ;;  %v1203_v0 = vpack.c.bf16 %v683_v58, %v683_v58 }
  0xe5   :  { %969 = vst.msk [vmem:[%s1854_s3] sm:$0xf] %vm968_vm1, %v1168_v59  ;;  %1001 = vst.msk [vmem:[%s1854_s3 + $0x80] sm:$0xf] %vm968_vm1, %v1200_v60  ;;  %v1169_v1 = vpack.c.bf16 %v649_v61, %v649_v61  ;;  %v1201_v2 = vpack.c.bf16 %v681_v62, %v681_v62  ;;  %v1276_v3 = vpop.f32.mrb[4].mxu0  ;;  %v1308_v4 = vpop.f32.mrb[4].mxu1 }
  0xe6   :  { %972 = vst.msk [vmem:[%s1854_s3 + $0xc] sm:$0xf] %vm968_vm1, %v1171_v63  ;;  %1004 = vst.msk [vmem:[%s1854_s3 + $0x8c] sm:$0xf] %vm968_vm1, %v1203_v0  ;;  %v418_v5 = vadd.f32 %v1276_v3, %v1529_v34  ;;  %v546_v6 = vadd.f32 %v1308_v4, %v1529_v34  ;;  %v409_v7 = vpop.f32.mrb[5].mxu0  ;;  %v537_v8 = vpop.f32.mrb[5].mxu1 }
  0xe7   :  { %970 = vst.msk [vmem:[%s1854_s3 + $0x4] sm:$0xf] %vm968_vm1, %v1169_v1  ;;  %1002 = vst.msk [vmem:[%s1854_s3 + $0x84] sm:$0xf] %vm968_vm1, %v1201_v2  ;;  %v410_v9 = vadd.f32 %v1529_v34, %v409_v7  ;;  %v538_v10 = vadd.f32 %v1529_v34, %v537_v8  ;;  %v1277_v11 = vpop.f32.mrb[6].mxu0  ;;  %v1309_v12 = vpop.f32.mrb[6].mxu1 }
  0xe8   :  { %v654_v13 = vmax.f32 %v418_v5, 0.0  ;;  %v686_v14 = vmax.f32 %v546_v6, 0.0  ;;  %v421_v15 = vadd.f32 %v1277_v11, %v1529_v34  ;;  %v549_v16 = vadd.f32 %v1309_v12, %v1529_v34  ;;  %v412_v17 = vpop.f32.mrb[7].mxu0  ;;  %v540_v18 = vpop.f32.mrb[7].mxu1 }
  0xe9   :  { %v652_v19 = vmax.f32 %v410_v9, 0.0  ;;  %v684_v20 = vmax.f32 %v538_v10, 0.0  ;;  %v413_v21 = vadd.f32 %v1529_v34, %v412_v17  ;;  %v541_v22 = vadd.f32 %v1529_v34, %v540_v18 }
  0xea   :  { %v1174_v23 = vpack.c.bf16 %v654_v13, %v654_v13  ;;  %v1206_v24 = vpack.c.bf16 %v686_v14, %v686_v14  ;;  %v655_v25 = vmax.f32 %v421_v15, 0.0  ;;  %v687_v26 = vmax.f32 %v549_v16, 0.0 }
  0xeb   :  { %v1172_v27 = vpack.c.bf16 %v652_v19, %v652_v19  ;;  %v1204_v28 = vpack.c.bf16 %v684_v20, %v684_v20  ;;  %v653_v29 = vmax.f32 %v413_v21, 0.0  ;;  %v685_v30 = vmax.f32 %v541_v22, 0.0 }
  0xec   :  { %975 = vst.msk [vmem:[%s1854_s3 + $0x18] sm:$0xf] %vm968_vm1, %v1174_v23  ;;  %1007 = vst.msk [vmem:[%s1854_s3 + $0x98] sm:$0xf] %vm968_vm1, %v1206_v24  ;;  %v1175_v31 = vpack.c.bf16 %v655_v25, %v655_v25  ;;  %v1207_v32 = vpack.c.bf16 %v687_v26, %v687_v26 }
  0xed   :  { %973 = vst.msk [vmem:[%s1854_s3 + $0x10] sm:$0xf] %vm968_vm1, %v1172_v27  ;;  %1005 = vst.msk [vmem:[%s1854_s3 + $0x90] sm:$0xf] %vm968_vm1, %v1204_v28  ;;  %v1173_v33 = vpack.c.bf16 %v653_v29, %v653_v29  ;;  %v1205_v35 = vpack.c.bf16 %v685_v30, %v685_v30  ;;  %v1280_v36 = vpop.f32.mrb[8].mxu0  ;;  %v1312_v37 = vpop.f32.mrb[8].mxu1 }
  0xee   :  { %976 = vst.msk [vmem:[%s1854_s3 + $0x1c] sm:$0xf] %vm968_vm1, %v1175_v31  ;;  %1008 = vst.msk [vmem:[%s1854_s3 + $0x9c] sm:$0xf] %vm968_vm1, %v1207_v32  ;;  %v434_v38 = vadd.f32 %v1280_v36, %v1529_v34  ;;  %v562_v39 = vadd.f32 %v1312_v37, %v1529_v34  ;;  %v425_v40 = vpop.f32.mrb[9].mxu0  ;;  %v553_v41 = vpop.f32.mrb[9].mxu1 }
  0xef   :  { %974 = vst.msk [vmem:[%s1854_s3 + $0x14] sm:$0xf] %vm968_vm1, %v1173_v33  ;;  %1006 = vst.msk [vmem:[%s1854_s3 + $0x94] sm:$0xf] %vm968_vm1, %v1205_v35  ;;  %v426_v42 = vadd.f32 %v1529_v34, %v425_v40  ;;  %v554_v43 = vadd.f32 %v1529_v34, %v553_v41  ;;  %v1281_v44 = vpop.f32.mrb[10].mxu0  ;;  %v1313_v45 = vpop.f32.mrb[10].mxu1 }
  0xf0   :  { %v658_v46 = vmax.f32 %v434_v38, 0.0  ;;  %v690_v47 = vmax.f32 %v562_v39, 0.0  ;;  %v437_v48 = vadd.f32 %v1281_v44, %v1529_v34  ;;  %v565_v49 = vadd.f32 %v1313_v45, %v1529_v34  ;;  %v428_v50 = vpop.f32.mrb[11].mxu0  ;;  %v556_v51 = vpop.f32.mrb[11].mxu1 }
  0xf1   :  { %v656_v52 = vmax.f32 %v426_v42, 0.0  ;;  %v688_v53 = vmax.f32 %v554_v43, 0.0  ;;  %v429_v54 = vadd.f32 %v1529_v34, %v428_v50  ;;  %v557_v55 = vadd.f32 %v1529_v34, %v556_v51 }
  0xf2   :  { %v1178_v56 = vpack.c.bf16 %v658_v46, %v658_v46  ;;  %v1210_v57 = vpack.c.bf16 %v690_v47, %v690_v47  ;;  %v659_v58 = vmax.f32 %v437_v48, 0.0  ;;  %v691_v59 = vmax.f32 %v565_v49, 0.0 }
  0xf3   :  { %v1176_v60 = vpack.c.bf16 %v656_v52, %v656_v52  ;;  %v1208_v61 = vpack.c.bf16 %v688_v53, %v688_v53  ;;  %v657_v62 = vmax.f32 %v429_v54, 0.0  ;;  %v689_v63 = vmax.f32 %v557_v55, 0.0 }
  0xf4   :  { %979 = vst.msk [vmem:[%s1854_s3 + $0x28] sm:$0xf] %vm968_vm1, %v1178_v56  ;;  %1011 = vst.msk [vmem:[%s1854_s3 + $0xa8] sm:$0xf] %vm968_vm1, %v1210_v57  ;;  %v1179_v0 = vpack.c.bf16 %v659_v58, %v659_v58  ;;  %v1211_v1 = vpack.c.bf16 %v691_v59, %v691_v59 }
  0xf5   :  { %977 = vst.msk [vmem:[%s1854_s3 + $0x20] sm:$0xf] %vm968_vm1, %v1176_v60  ;;  %1009 = vst.msk [vmem:[%s1854_s3 + $0xa0] sm:$0xf] %vm968_vm1, %v1208_v61  ;;  %v1177_v2 = vpack.c.bf16 %v657_v62, %v657_v62  ;;  %v1209_v3 = vpack.c.bf16 %v689_v63, %v689_v63  ;;  %v1284_v4 = vpop.f32.mrb[12].mxu0  ;;  %v1316_v5 = vpop.f32.mrb[12].mxu1 }
  0xf6   :  { %980 = vst.msk [vmem:[%s1854_s3 + $0x2c] sm:$0xf] %vm968_vm1, %v1179_v0  ;;  %1012 = vst.msk [vmem:[%s1854_s3 + $0xac] sm:$0xf] %vm968_vm1, %v1211_v1  ;;  %v450_v6 = vadd.f32 %v1284_v4, %v1529_v34  ;;  %v578_v7 = vadd.f32 %v1316_v5, %v1529_v34  ;;  %v441_v8 = vpop.f32.mrb[13].mxu0  ;;  %v569_v9 = vpop.f32.mrb[13].mxu1 }
  0xf7   :  { %978 = vst.msk [vmem:[%s1854_s3 + $0x24] sm:$0xf] %vm968_vm1, %v1177_v2  ;;  %1010 = vst.msk [vmem:[%s1854_s3 + $0xa4] sm:$0xf] %vm968_vm1, %v1209_v3  ;;  %v442_v10 = vadd.f32 %v1529_v34, %v441_v8  ;;  %v570_v11 = vadd.f32 %v1529_v34, %v569_v9  ;;  %v1285_v12 = vpop.f32.mrb[14].mxu0  ;;  %v1317_v13 = vpop.f32.mrb[14].mxu1 }
  0xf8   :  { %v662_v14 = vmax.f32 %v450_v6, 0.0  ;;  %v694_v15 = vmax.f32 %v578_v7, 0.0  ;;  %v453_v16 = vadd.f32 %v1285_v12, %v1529_v34  ;;  %v581_v17 = vadd.f32 %v1317_v13, %v1529_v34  ;;  %v444_v18 = vpop.f32.mrb[15].mxu0  ;;  %v572_v19 = vpop.f32.mrb[15].mxu1 }
  0xf9   :  { %v660_v20 = vmax.f32 %v442_v10, 0.0  ;;  %v692_v21 = vmax.f32 %v570_v11, 0.0  ;;  %v445_v22 = vadd.f32 %v1529_v34, %v444_v18  ;;  %v573_v23 = vadd.f32 %v1529_v34, %v572_v19 }
  0xfa   :  { %v1182_v24 = vpack.c.bf16 %v662_v14, %v662_v14  ;;  %v1214_v25 = vpack.c.bf16 %v694_v15, %v694_v15  ;;  %v663_v26 = vmax.f32 %v453_v16, 0.0  ;;  %v695_v27 = vmax.f32 %v581_v17, 0.0 }
  0xfb   :  { %v1180_v28 = vpack.c.bf16 %v660_v20, %v660_v20  ;;  %v1212_v29 = vpack.c.bf16 %v692_v21, %v692_v21  ;;  %v661_v30 = vmax.f32 %v445_v22, 0.0  ;;  %v693_v31 = vmax.f32 %v573_v23, 0.0 }
  0xfc   :  { %983 = vst.msk [vmem:[%s1854_s3 + $0x38] sm:$0xf] %vm968_vm1, %v1182_v24  ;;  %1015 = vst.msk [vmem:[%s1854_s3 + $0xb8] sm:$0xf] %vm968_vm1, %v1214_v25  ;;  %v1183_v32 = vpack.c.bf16 %v663_v26, %v663_v26  ;;  %v1215_v33 = vpack.c.bf16 %v695_v27, %v695_v27 }
  0xfd   :  { %981 = vst.msk [vmem:[%s1854_s3 + $0x30] sm:$0xf] %vm968_vm1, %v1180_v28  ;;  %1013 = vst.msk [vmem:[%s1854_s3 + $0xb0] sm:$0xf] %vm968_vm1, %v1212_v29  ;;  %v1181_v35 = vpack.c.bf16 %v661_v30, %v661_v30  ;;  %v1213_v36 = vpack.c.bf16 %v693_v31, %v693_v31  ;;  %v1288_v37 = vpop.f32.mrb[16].mxu0  ;;  %v1320_v38 = vpop.f32.mrb[16].mxu1 }
  0xfe   :  { %984 = vst.msk [vmem:[%s1854_s3 + $0x3c] sm:$0xf] %vm968_vm1, %v1183_v32  ;;  %1016 = vst.msk [vmem:[%s1854_s3 + $0xbc] sm:$0xf] %vm968_vm1, %v1215_v33  ;;  %v466_v39 = vadd.f32 %v1288_v37, %v1529_v34  ;;  %v594_v40 = vadd.f32 %v1320_v38, %v1529_v34  ;;  %v457_v41 = vpop.f32.mrb[17].mxu0  ;;  %v585_v42 = vpop.f32.mrb[17].mxu1 }
  0xff   :  { %982 = vst.msk [vmem:[%s1854_s3 + $0x34] sm:$0xf] %vm968_vm1, %v1181_v35  ;;  %1014 = vst.msk [vmem:[%s1854_s3 + $0xb4] sm:$0xf] %vm968_vm1, %v1213_v36  ;;  %v458_v43 = vadd.f32 %v1529_v34, %v457_v41  ;;  %v586_v44 = vadd.f32 %v1529_v34, %v585_v42  ;;  %v1289_v45 = vpop.f32.mrb[18].mxu0  ;;  %v1321_v46 = vpop.f32.mrb[18].mxu1 }
 0x100   :  { %v666_v47 = vmax.f32 %v466_v39, 0.0  ;;  %v698_v48 = vmax.f32 %v594_v40, 0.0  ;;  %v469_v49 = vadd.f32 %v1289_v45, %v1529_v34  ;;  %v597_v50 = vadd.f32 %v1321_v46, %v1529_v34  ;;  %v460_v51 = vpop.f32.mrb[19].mxu0  ;;  %v588_v52 = vpop.f32.mrb[19].mxu1 }
 0x101   :  { %v664_v53 = vmax.f32 %v458_v43, 0.0  ;;  %v696_v54 = vmax.f32 %v586_v44, 0.0  ;;  %v461_v55 = vadd.f32 %v1529_v34, %v460_v51  ;;  %v589_v56 = vadd.f32 %v1529_v34, %v588_v52 }
 0x102   :  { %v1186_v57 = vpack.c.bf16 %v666_v47, %v666_v47  ;;  %v1218_v58 = vpack.c.bf16 %v698_v48, %v698_v48  ;;  %v667_v59 = vmax.f32 %v469_v49, 0.0  ;;  %v699_v60 = vmax.f32 %v597_v50, 0.0 }
 0x103   :  { %v1184_v61 = vpack.c.bf16 %v664_v53, %v664_v53  ;;  %v1216_v62 = vpack.c.bf16 %v696_v54, %v696_v54  ;;  %v665_v63 = vmax.f32 %v461_v55, 0.0  ;;  %v697_v0 = vmax.f32 %v589_v56, 0.0 }
 0x104   :  { %987 = vst.msk [vmem:[%s1854_s3 + $0x48] sm:$0xf] %vm968_vm1, %v1186_v57  ;;  %1019 = vst.msk [vmem:[%s1854_s3 + $0xc8] sm:$0xf] %vm968_vm1, %v1218_v58  ;;  %v1187_v1 = vpack.c.bf16 %v667_v59, %v667_v59  ;;  %v1219_v2 = vpack.c.bf16 %v699_v60, %v699_v60 }
 0x105   :  { %985 = vst.msk [vmem:[%s1854_s3 + $0x40] sm:$0xf] %vm968_vm1, %v1184_v61  ;;  %1017 = vst.msk [vmem:[%s1854_s3 + $0xc0] sm:$0xf] %vm968_vm1, %v1216_v62  ;;  %v1185_v3 = vpack.c.bf16 %v665_v63, %v665_v63  ;;  %v1217_v4 = vpack.c.bf16 %v697_v0, %v697_v0  ;;  %v1292_v5 = vpop.f32.mrb[20].mxu0  ;;  %v1324_v6 = vpop.f32.mrb[20].mxu1 }
 0x106   :  { %988 = vst.msk [vmem:[%s1854_s3 + $0x4c] sm:$0xf] %vm968_vm1, %v1187_v1  ;;  %1020 = vst.msk [vmem:[%s1854_s3 + $0xcc] sm:$0xf] %vm968_vm1, %v1219_v2  ;;  %v482_v7 = vadd.f32 %v1292_v5, %v1529_v34  ;;  %v610_v8 = vadd.f32 %v1324_v6, %v1529_v34  ;;  %v473_v9 = vpop.f32.mrb[21].mxu0  ;;  %v601_v10 = vpop.f32.mrb[21].mxu1 }
 0x107   :  { %986 = vst.msk [vmem:[%s1854_s3 + $0x44] sm:$0xf] %vm968_vm1, %v1185_v3  ;;  %1018 = vst.msk [vmem:[%s1854_s3 + $0xc4] sm:$0xf] %vm968_vm1, %v1217_v4  ;;  %v474_v11 = vadd.f32 %v1529_v34, %v473_v9  ;;  %v602_v12 = vadd.f32 %v1529_v34, %v601_v10  ;;  %v1293_v13 = vpop.f32.mrb[22].mxu0  ;;  %v1325_v14 = vpop.f32.mrb[22].mxu1 }
 0x108   :  { %v670_v15 = vmax.f32 %v482_v7, 0.0  ;;  %v702_v16 = vmax.f32 %v610_v8, 0.0  ;;  %v485_v17 = vadd.f32 %v1293_v13, %v1529_v34  ;;  %v613_v18 = vadd.f32 %v1325_v14, %v1529_v34  ;;  %v476_v19 = vpop.f32.mrb[23].mxu0  ;;  %v604_v20 = vpop.f32.mrb[23].mxu1 }
 0x109   :  { %v668_v21 = vmax.f32 %v474_v11, 0.0  ;;  %v700_v22 = vmax.f32 %v602_v12, 0.0  ;;  %v477_v23 = vadd.f32 %v1529_v34, %v476_v19  ;;  %v605_v24 = vadd.f32 %v1529_v34, %v604_v20 }
 0x10a   :  { %v1190_v25 = vpack.c.bf16 %v670_v15, %v670_v15  ;;  %v1222_v26 = vpack.c.bf16 %v702_v16, %v702_v16  ;;  %v671_v27 = vmax.f32 %v485_v17, 0.0  ;;  %v703_v28 = vmax.f32 %v613_v18, 0.0 }
 0x10b   :  { %v1188_v29 = vpack.c.bf16 %v668_v21, %v668_v21  ;;  %v1220_v30 = vpack.c.bf16 %v700_v22, %v700_v22  ;;  %v669_v31 = vmax.f32 %v477_v23, 0.0  ;;  %v701_v32 = vmax.f32 %v605_v24, 0.0 }
 0x10c   :  { %991 = vst.msk [vmem:[%s1854_s3 + $0x58] sm:$0xf] %vm968_vm1, %v1190_v25  ;;  %1023 = vst.msk [vmem:[%s1854_s3 + $0xd8] sm:$0xf] %vm968_vm1, %v1222_v26  ;;  %v1191_v33 = vpack.c.bf16 %v671_v27, %v671_v27  ;;  %v1223_v35 = vpack.c.bf16 %v703_v28, %v703_v28 }
 0x10d   :  { %989 = vst.msk [vmem:[%s1854_s3 + $0x50] sm:$0xf] %vm968_vm1, %v1188_v29  ;;  %1021 = vst.msk [vmem:[%s1854_s3 + $0xd0] sm:$0xf] %vm968_vm1, %v1220_v30  ;;  %v1189_v36 = vpack.c.bf16 %v669_v31, %v669_v31  ;;  %v1221_v37 = vpack.c.bf16 %v701_v32, %v701_v32  ;;  %v1296_v38 = vpop.f32.mrb[24].mxu0  ;;  %v1328_v39 = vpop.f32.mrb[24].mxu1 }
 0x10e   :  { %992 = vst.msk [vmem:[%s1854_s3 + $0x5c] sm:$0xf] %vm968_vm1, %v1191_v33  ;;  %1024 = vst.msk [vmem:[%s1854_s3 + $0xdc] sm:$0xf] %vm968_vm1, %v1223_v35  ;;  %v498_v40 = vadd.f32 %v1296_v38, %v1529_v34  ;;  %v626_v41 = vadd.f32 %v1328_v39, %v1529_v34  ;;  %v489_v42 = vpop.f32.mrb[25].mxu0  ;;  %v617_v43 = vpop.f32.mrb[25].mxu1 }
 0x10f   :  { %990 = vst.msk [vmem:[%s1854_s3 + $0x54] sm:$0xf] %vm968_vm1, %v1189_v36  ;;  %1022 = vst.msk [vmem:[%s1854_s3 + $0xd4] sm:$0xf] %vm968_vm1, %v1221_v37  ;;  %v490_v44 = vadd.f32 %v1529_v34, %v489_v42  ;;  %v618_v45 = vadd.f32 %v1529_v34, %v617_v43  ;;  %v1297_v46 = vpop.f32.mrb[26].mxu0  ;;  %v1329_v47 = vpop.f32.mrb[26].mxu1 }
 0x110   :  { %v674_v48 = vmax.f32 %v498_v40, 0.0  ;;  %v706_v49 = vmax.f32 %v626_v41, 0.0  ;;  %v501_v50 = vadd.f32 %v1297_v46, %v1529_v34  ;;  %v629_v51 = vadd.f32 %v1329_v47, %v1529_v34  ;;  %v492_v52 = vpop.f32.mrb[27].mxu0  ;;  %v620_v53 = vpop.f32.mrb[27].mxu1 }
 0x111   :  { %v672_v54 = vmax.f32 %v490_v44, 0.0  ;;  %v704_v55 = vmax.f32 %v618_v45, 0.0  ;;  %v493_v56 = vadd.f32 %v1529_v34, %v492_v52  ;;  %v621_v57 = vadd.f32 %v1529_v34, %v620_v53 }
 0x112   :  { %v1194_v58 = vpack.c.bf16 %v674_v48, %v674_v48  ;;  %v1226_v59 = vpack.c.bf16 %v706_v49, %v706_v49  ;;  %v675_v60 = vmax.f32 %v501_v50, 0.0  ;;  %v707_v61 = vmax.f32 %v629_v51, 0.0 }
 0x113   :  { %v1192_v62 = vpack.c.bf16 %v672_v54, %v672_v54  ;;  %v1224_v63 = vpack.c.bf16 %v704_v55, %v704_v55  ;;  %v673_v0 = vmax.f32 %v493_v56, 0.0  ;;  %v705_v1 = vmax.f32 %v621_v57, 0.0 }
 0x114   :  { %995 = vst.msk [vmem:[%s1854_s3 + $0x68] sm:$0xf] %vm968_vm1, %v1194_v58  ;;  %1027 = vst.msk [vmem:[%s1854_s3 + $0xe8] sm:$0xf] %vm968_vm1, %v1226_v59  ;;  %v1195_v2 = vpack.c.bf16 %v675_v60, %v675_v60  ;;  %v1227_v3 = vpack.c.bf16 %v707_v61, %v707_v61 }
 0x115   :  { %993 = vst.msk [vmem:[%s1854_s3 + $0x60] sm:$0xf] %vm968_vm1, %v1192_v62  ;;  %1025 = vst.msk [vmem:[%s1854_s3 + $0xe0] sm:$0xf] %vm968_vm1, %v1224_v63  ;;  %v1193_v4 = vpack.c.bf16 %v673_v0, %v673_v0  ;;  %v1225_v5 = vpack.c.bf16 %v705_v1, %v705_v1  ;;  %v1300_v6 = vpop.f32.mrb[28].mxu0  ;;  %v1332_v7 = vpop.f32.mrb[28].mxu1 }
 0x116   :  { %996 = vst.msk [vmem:[%s1854_s3 + $0x6c] sm:$0xf] %vm968_vm1, %v1195_v2  ;;  %1028 = vst.msk [vmem:[%s1854_s3 + $0xec] sm:$0xf] %vm968_vm1, %v1227_v3  ;;  %v514_v8 = vadd.f32 %v1300_v6, %v1529_v34  ;;  %v642_v9 = vadd.f32 %v1332_v7, %v1529_v34  ;;  %v505_v10 = vpop.f32.mrb[29].mxu0  ;;  %v633_v11 = vpop.f32.mrb[29].mxu1 }
 0x117   :  { %994 = vst.msk [vmem:[%s1854_s3 + $0x64] sm:$0xf] %vm968_vm1, %v1193_v4  ;;  %1026 = vst.msk [vmem:[%s1854_s3 + $0xe4] sm:$0xf] %vm968_vm1, %v1225_v5  ;;  %v506_v12 = vadd.f32 %v1529_v34, %v505_v10  ;;  %v634_v13 = vadd.f32 %v1529_v34, %v633_v11  ;;  %v1301_v14 = vpop.f32.mrb[30].mxu0  ;;  %v1333_v15 = vpop.f32.mrb[30].mxu1 }
 0x118   :  { %v678_v16 = vmax.f32 %v514_v8, 0.0  ;;  %v710_v17 = vmax.f32 %v642_v9, 0.0  ;;  %v517_v18 = vadd.f32 %v1301_v14, %v1529_v34  ;;  %v645_v19 = vadd.f32 %v1333_v15, %v1529_v34  ;;  %v508_v20 = vpop.f32.mrb[31].mxu0  ;;  %v636_v21 = vpop.f32.mrb[31].mxu1 }
 0x119   :  { %v676_v22 = vmax.f32 %v506_v12, 0.0  ;;  %v708_v23 = vmax.f32 %v634_v13, 0.0  ;;  %v509_v24 = vadd.f32 %v1529_v34, %v508_v20  ;;  %v637_v25 = vadd.f32 %v1529_v34, %v636_v21 }
 0x11a   :  { %v1198_v26 = vpack.c.bf16 %v678_v16, %v678_v16  ;;  %v1230_v27 = vpack.c.bf16 %v710_v17, %v710_v17  ;;  %v679_v28 = vmax.f32 %v517_v18, 0.0  ;;  %v711_v29 = vmax.f32 %v645_v19, 0.0 }
 0x11b   :  { %v1196_v30 = vpack.c.bf16 %v676_v22, %v676_v22  ;;  %v1228_v31 = vpack.c.bf16 %v708_v23, %v708_v23  ;;  %v677_v32 = vmax.f32 %v509_v24, 0.0  ;;  %v709_v33 = vmax.f32 %v637_v25, 0.0 }
 0x11c   :  { %999 = vst.msk [vmem:[%s1854_s3 + $0x78] sm:$0xf] %vm968_vm1, %v1198_v26  ;;  %1031 = vst.msk [vmem:[%s1854_s3 + $0xf8] sm:$0xf] %vm968_vm1, %v1230_v27  ;;  %v1199_v35 = vpack.c.bf16 %v679_v28, %v679_v28  ;;  %v1231_v34 = vpack.c.bf16 %v711_v29, %v711_v29 }
 0x11d   :  { %997 = vst.msk [vmem:[%s1854_s3 + $0x70] sm:$0xf] %vm968_vm1, %v1196_v30  ;;  %1029 = vst.msk [vmem:[%s1854_s3 + $0xf0] sm:$0xf] %vm968_vm1, %v1228_v31  ;;  %v1197_v36 = vpack.c.bf16 %v677_v32, %v677_v32  ;;  %v1229_v37 = vpack.c.bf16 %v709_v33, %v709_v33 }
 0x11e   :  { %1000 = vst.msk [vmem:[%s1854_s3 + $0x7c] sm:$0xf] %vm968_vm1, %v1199_v35  ;;  %1032 = vst.msk [vmem:[%s1854_s3 + $0xfc] sm:$0xf] %vm968_vm1, %v1231_v34 }
 0x11f   :  { %998 = vst.msk [vmem:[%s1854_s3 + $0x74] sm:$0xf] %vm968_vm1, %v1197_v36  ;;  %1030 = vst.msk [vmem:[%s1854_s3 + $0xf4] sm:$0xf] %vm968_vm1, %v1229_v37 }

// kernel: e_senet_forward.11
= control target key start
LH: loop header
LB: loop body
LE: loop exit
PB: predicated region body
PF: predicated region fallthrough
CT: control target
= control target key end

     0   :  { %s2089_s27 = smov 0   ;;  %s2689_s0 = inlined_call_operand.vmem [shape: bf16[2,256,72], index: 0, kind: input, shape index: {}]   ;;  %s2690_s1 = inlined_call_operand.vmem [shape: bf16[2,256,16], index: 1, kind: input, shape index: {}]   ;;  %s2691_s2 = inlined_call_operand.vmem [shape: bf16[72,8], index: 2, kind: input, shape index: {}]   ;;  %s2692_s3 = inlined_call_operand.vmem [shape: bf16[8,32], index: 3, kind: input, shape index: {}]   ;;  %s2693_s4 = inlined_call_operand.vmem [shape: bf16[16,32], index: 4, kind: input, shape index: {}]   ;;  %s2694_s5 = inlined_call_operand.vmem [shape: bf16[32,8], index: 5, kind: input, shape index: {}]   ;;  %s2695_s6 = inlined_call_operand.vmem [shape: bf16[8,32], index: 6, kind: input, shape index: {}]   ;;  %s2696_s7 = inlined_call_operand.vmem [shape: f32[8,32], index: 7, kind: input, shape index: {}]   ;;  %s2697_s8 = inlined_call_operand.vmem [shape: f32[2,256,32], index: 8, kind: output, shape index: {}]  }
   0x1 LB: > { %s1685_s28 = sadd.s32 4294967295, %s2040_s27   ;;  %p1689_p0 = scmp.ge.s32.totalorder %s2040_s27, 1  ;;  %s2040_s27 = sphi %s2089_s27, %s18_s27  }
   0x2   : > { %p272_p1 = scmp.lt.s32.totalorder %s2040_s27, 3 }
   0x4   : > { %p273_p2 = pnand %p1689_p0, %p272_p1 }
   0x6   : > { %276 = sbr.rel (%p273_p2) target bundleno = 1043 (0x413), region = 52 }
   0xd   : > { %v1990_v0 = vld [vmem:[%s2691_s2] sm:$0xff]   ;;  %v1991_v1 = vld [vmem:[%s2691_s2 + $0x8] sm:$0xff]   ;;  %p311_p3 = scmp.lt.s32.totalorder %s1685_s28, 1  ;;  %v1992_v2 = vld [vmem:[%s2691_s2 + $0x10] sm:$0xff]   ;;  %vm529_vm0 = vcmask 1043456   ;;  %vm480_vm1 = vcmask 588800   ;;  %v369_v24 = vlaneseq }
   0xe   : > { %1851 = vmatprep.subr.bf16.mxu0 %v1990_v0  ;;  %v742_v3 = vld [vmem:[%s2692_s3] sm:$0xf]  ;;  %v1993_v6 = vld [vmem:[%s2691_s2 + $0x18] sm:$0xff]   ;;  %vm747_vm2 = vcmask 64512   ;;  %vm2043_vm3 = vmmov 0   ;;  %vm1084_vm4 = vcmask 130048  }
   0xf   : > { %1852 = vmatpush3.bf16.msra.mxu0 %v1990_v0  ;;  %s2747_s28 = smov (!%p311_p3, %s1685_s28), 1  ;;  %v797_v4 = vsel %vm529_vm0, %v742_v3, 0  ;;  %1979 = vmatprep.subr.msk.bf16.mxu1 %vm529_vm0, %v742_v3  ;;  %v1994_v7 = vld [vmem:[%s2691_s2 + $0x20] ss:$0 sps:$4 sm:$0xff]   ;;  %v2165_v25 = vshrl.u32 %v369_v24, 7  ;;  %vm1294_vm5 = vcmask 261120  }
  0x10   : > { %1853 = vmatprep.subr.bf16.mxu0 %v1991_v1  ;;  %s1788_s15 = sshll.u32 %s2747_s28, 7  ;;  %1976 = vmatpush3.bf16.msra.mxu1 %v797_v4  ;;  %v531_v8 = vsel %vm529_vm0, %v1994_v7, 0  ;;  %v2171_v27 = vld [vmem:[%s2696_s7] sm:$0xff]  ;;  %s1790_s16 = sshll.u32 %s2747_s28, 8 }
  0x11   : > { %s2117_s18 = scalar_lea.vmem %s2689_s0, %s1788_s15  ;;  %s2136_s25 = scalar_lea.vmem %s2690_s1, %s1788_s15  ;;  %v2698_v26 = vsub.s32 0, %v2165_v25 }
  0x12   : > { %v1995_v5 = vld [vmem:[%s2117_s18] sm:$0xff]   ;;  %v1996_v9 = vld [vmem:[%s2117_s18 + $0x8] sm:$0xff]   ;;  %v1997_v10 = vld [vmem:[%s2117_s18 + $0x10] sm:$0xff]   ;;  %s2574_s19 = scalar_lea.vmem %s2697_s8, %s1790_s16 }
  0x13   : > { %1854 = vmatpush3.bf16.msra.mxu0 %v1991_v1  ;;  %1861 = vmatprep.mubr.msk.bf16.mxu0 %vm480_vm1, %v1995_v5  ;;  %v1998_v11 = vld [vmem:[%s2117_s18 + $0x18] sm:$0xff]   ;;  %v1999_v12 = vld [vmem:[%s2117_s18 + $0x20] sm:$0xff]   ;;  %v2000_v13 = vld [vmem:[%s2117_s18 + $0x28] sm:$0xff]   ;;  %v2176_v28 = vrot.slane %v2171_v27, %v2698_v26 }
  0x14   : > { %1855 = vmatprep.subr.bf16.mxu0 %v1992_v2  ;;  %v2001_v14 = vld [vmem:[%s2117_s18 + $0x30] sm:$0xff]   ;;  %v2002_v15 = vld [vmem:[%s2117_s18 + $0x38] sm:$0xff]   ;;  %v2003_v16 = vld [vmem:[%s2117_s18 + $0x40] sm:$0xff]  }
  0x15   : > { %v2004_v17 = vld [vmem:[%s2117_s18 + $0x48] sm:$0xff]   ;;  %v2005_v18 = vld [vmem:[%s2117_s18 + $0x50] sm:$0xff]   ;;  %v2006_v19 = vld [vmem:[%s2117_s18 + $0x58] sm:$0xff]  }
  0x16   : > { %v2007_v20 = vld [vmem:[%s2117_s18 + $0x60] sm:$0xff]   ;;  %v2008_v21 = vld [vmem:[%s2117_s18 + $0x68] sm:$0xff]   ;;  %v2009_v22 = vld [vmem:[%s2117_s18 + $0x70] sm:$0xff]  }
  0x17   : > { %1856 = vmatpush3.bf16.msra.mxu0 %v1992_v2  ;;  %v2010_v23 = vld [vmem:[%s2117_s18 + $0x78] sm:$0xff]  }
  0x18   : > { %1857 = vmatprep.subr.bf16.mxu0 %v1993_v6 }
  0x1b   : > { %1858 = vmatpush3.bf16.msra.mxu0 %v1993_v6 }
  0x1c   : > { %1977 = vmatprep.subr.msk.bf16.mxu0 %vm529_vm0, %v1994_v7 }
  0x1f   : > { %1860 = vmatpush3.bf16.msra.mxu0 %v531_v8 }
  0x20   : > { %1978 = vmatprep.subr.msk.bf16.mxu0 %vm529_vm0, %v742_v3 }
  0x22   : > { %1862 = vmatmul.mubr.msk.bf16.vlgmr.msra.gmra.mrb[0].mxu0 %vm480_vm1, %v1996_v9 }
  0x23   : > { %1865 = vmatprep.mubr.msk.bf16.mxu0 %vm480_vm1, %v1997_v10  ;;  %1894 = vmatpush3.bf16.msra.mxu0 %v797_v4 }
  0x2a   : > { %1866 = vmatmul.mubr.msk.bf16.gmra.mrb[4].mxu0 %vm480_vm1, %v1998_v11 }
  0x2b   : > { %1869 = vmatprep.mubr.msk.bf16.mxu0 %vm480_vm1, %v1999_v12 }
  0x32   : > { %1870 = vmatmul.mubr.msk.bf16.gmra.mrb[8].mxu0 %vm480_vm1, %v2000_v13 }
  0x33   : > { %1873 = vmatprep.mubr.msk.bf16.mxu0 %vm480_vm1, %v2001_v14 }
  0x3a   : > { %1874 = vmatmul.mubr.msk.bf16.gmra.mrb[12].mxu0 %vm480_vm1, %v2002_v15 }
  0x3b   : > { %1877 = vmatprep.mubr.msk.bf16.mxu0 %vm480_vm1, %v2003_v16 }
  0x42   : > { %1878 = vmatmul.mubr.msk.bf16.gmra.mrb[16].mxu0 %vm480_vm1, %v2004_v17 }
  0x43   : > { %1881 = vmatprep.mubr.msk.bf16.mxu0 %vm480_vm1, %v2005_v18 }
  0x4a   : > { %1882 = vmatmul.mubr.msk.bf16.gmra.mrb[20].mxu0 %vm480_vm1, %v2006_v19 }
  0x4b   : > { %1885 = vmatprep.mubr.msk.bf16.mxu0 %vm480_vm1, %v2007_v20 }
  0x52   : > { %1886 = vmatmul.mubr.msk.bf16.gmra.mrb[24].mxu0 %vm480_vm1, %v2008_v21 }
  0x53   : > { %1889 = vmatprep.mubr.msk.bf16.mxu0 %vm480_vm1, %v2009_v22 }
  0x5a   : > { %1890 = vmatmul.mubr.msk.bf16.gmra.mrb[28].mxu0 %vm480_vm1, %v2010_v23 }
  0xf5   : > { %v1863_v29 = vpop.f32.mrb[0].mxu0 }
  0xf6   : > { %v576_v30 = vadd.f32 %v1863_v29, %v2176_v28  ;;  %v567_v31 = vpop.f32.mrb[1].mxu0 }
  0xf7   : > { %v568_v32 = vadd.f32 %v567_v31, %v2176_v28  ;;  %v1864_v33 = vpop.f32.mrb[2].mxu0 }
  0xf8   : > { %v579_v34 = vadd.f32 %v1864_v33, %v2176_v28  ;;  %v570_v35 = vpop.f32.mrb[3].mxu0  ;;  %v696_v37 = vmax.f32 %v576_v30, 0.0 }
  0xf9   : > { %v571_v36 = vadd.f32 %v570_v35, %v2176_v28  ;;  %v694_v39 = vmax.f32 %v568_v32, 0.0 }
  0xfa   : > { %v697_v38 = vmax.f32 %v579_v34, 0.0 }
  0xfb   : > { %v695_v40 = vmax.f32 %v571_v36, 0.0 }
  0xfc   : > { %v727_v41 = vpack.c.bf16 %v697_v38, %v696_v37 }
  0xfd   : > { %v726_v42 = vpack.c.bf16 %v695_v40, %v694_v39  ;;  %v1867_v43 = vpop.f32.mrb[4].mxu0 }
  0xfe   : > { %v592_v44 = vadd.f32 %v1867_v43, %v2176_v28  ;;  %v583_v45 = vpop.f32.mrb[5].mxu0 }
  0xff   : > { %v584_v46 = vadd.f32 %v583_v45, %v2176_v28  ;;  %v1868_v47 = vpop.f32.mrb[6].mxu0  ;;  %1895 = vmatprep.mubr.msk.bf16.mxu0 %vm747_vm2, %v726_v42 }
 0x100   : > { %v595_v48 = vadd.f32 %v1868_v47, %v2176_v28  ;;  %v586_v49 = vpop.f32.mrb[7].mxu0  ;;  %1896 = vmatmul.mubr.msk.bf16.vlgmr.msra.gmra.mrb[32].mxu0 %vm747_vm2, %v727_v41  ;;  %v700_v51 = vmax.f32 %v592_v44, 0.0 }
 0x101   : > { %v587_v50 = vadd.f32 %v586_v49, %v2176_v28  ;;  %v698_v53 = vmax.f32 %v584_v46, 0.0 }
 0x102   : > { %v701_v52 = vmax.f32 %v595_v48, 0.0 }
 0x103   : > { %v699_v54 = vmax.f32 %v587_v50, 0.0 }
 0x104   : > { %v729_v55 = vpack.c.bf16 %v701_v52, %v700_v51 }
 0x105   : > { %v728_v56 = vpack.c.bf16 %v699_v54, %v698_v53  ;;  %v1871_v57 = vpop.f32.mrb[8].mxu0 }
 0x106   : > { %v608_v58 = vadd.f32 %v1871_v57, %v2176_v28  ;;  %v599_v59 = vpop.f32.mrb[9].mxu0 }
 0x107   : > { %v600_v60 = vadd.f32 %v599_v59, %v2176_v28  ;;  %v1872_v61 = vpop.f32.mrb[10].mxu0  ;;  %1899 = vmatprep.mubr.msk.bf16.mxu0 %vm747_vm2, %v728_v56 }
 0x108   : > { %v611_v62 = vadd.f32 %v1872_v61, %v2176_v28  ;;  %v602_v63 = vpop.f32.mrb[11].mxu0  ;;  %1900 = vmatmul.mubr.msk.bf16.gmra.mrb[36].mxu0 %vm747_vm2, %v729_v55  ;;  %v704_v1 = vmax.f32 %v608_v58, 0.0 }
 0x109   : > { %v603_v0 = vadd.f32 %v602_v63, %v2176_v28  ;;  %v702_v3 = vmax.f32 %v600_v60, 0.0 }
 0x10a   : > { %v705_v2 = vmax.f32 %v611_v62, 0.0 }
 0x10b   : > { %v703_v4 = vmax.f32 %v603_v0, 0.0 }
 0x10c   : > { %v731_v5 = vpack.c.bf16 %v705_v2, %v704_v1 }
 0x10d   : > { %v1875_v6 = vpop.f32.mrb[12].mxu0  ;;  %v730_v7 = vpack.c.bf16 %v703_v4, %v702_v3 }
 0x10e   : > { %v624_v8 = vadd.f32 %v1875_v6, %v2176_v28  ;;  %v615_v9 = vpop.f32.mrb[13].mxu0 }
 0x10f   : > { %v616_v10 = vadd.f32 %v615_v9, %v2176_v28  ;;  %v1876_v11 = vpop.f32.mrb[14].mxu0  ;;  %1903 = vmatprep.mubr.msk.bf16.mxu1 %vm747_vm2, %v730_v7 }
 0x110   : > { %v627_v12 = vadd.f32 %v1876_v11, %v2176_v28  ;;  %v618_v13 = vpop.f32.mrb[15].mxu0  ;;  %1904 = vmatmul.mubr.msk.bf16.vlgmr.msra.gmra.mrb[0].mxu1 %vm747_vm2, %v731_v5  ;;  %v708_v15 = vmax.f32 %v624_v8, 0.0 }
 0x111   : > { %v619_v14 = vadd.f32 %v618_v13, %v2176_v28  ;;  %v706_v17 = vmax.f32 %v616_v10, 0.0 }
 0x112   : > { %v709_v16 = vmax.f32 %v627_v12, 0.0 }
 0x113   : > { %v707_v18 = vmax.f32 %v619_v14, 0.0 }
 0x114   : > { %v733_v19 = vpack.c.bf16 %v709_v16, %v708_v15 }
 0x115   : > { %v732_v20 = vpack.c.bf16 %v707_v18, %v706_v17  ;;  %v1879_v21 = vpop.f32.mrb[16].mxu0  ;;  %v2011_v17 = vld [vmem:[%s2694_s5] sm:$0xff]   ;;  %v2042_v18 = vmov 0.0  }
 0x116   : > { %v640_v22 = vadd.f32 %v1879_v21, %v2176_v28  ;;  %v631_v23 = vpop.f32.mrb[17].mxu0  ;;  %1961 = vmatprep.subr.bf16.mxu0 %v2042_v18  ;;  %1965 = vmatprep.mubr.msk.bf16.mxu0 %vm2043_vm3, %v2042_v18  ;;  %v2015_v21 = vld [vmem:[%s2136_s25 + $0x8] sm:$0xff]  }
 0x117   : > { %v632_v24 = vadd.f32 %v631_v23, %v2176_v28  ;;  %v1880_v29 = vpop.f32.mrb[18].mxu0  ;;  %1907 = vmatprep.mubr.msk.bf16.mxu1 %vm747_vm2, %v732_v20  ;;  %1962 = vmatpush3.bf16.msra.mxu0 %v2011_v17  ;;  %v2014_v20 = vld [vmem:[%s2136_s25] sm:$0xff]   ;;  %v2017_v23 = vld [vmem:[%s2136_s25 + $0x18] sm:$0xff]  }
 0x118   : > { %v643_v30 = vadd.f32 %v1880_v29, %v2176_v28  ;;  %v634_v31 = vpop.f32.mrb[19].mxu0  ;;  %1908 = vmatmul.mubr.msk.bf16.gmra.mrb[4].mxu1 %vm747_vm2, %v733_v19  ;;  %v712_v33 = vmax.f32 %v640_v22, 0.0  ;;  %1963 = vmatprep.subr.bf16.mxu0 %v2042_v18  ;;  %v2013_v19 = vld [vmem:[%s2693_s4] sm:$0xff]   ;;  %v2016_v22 = vld [vmem:[%s2136_s25 + $0x10] sm:$0xff]   ;;  %v2019_v29 = vld [vmem:[%s2136_s25 + $0x28] sm:$0xff]  }
 0x119   : > { %v635_v32 = vadd.f32 %v634_v31, %v2176_v28  ;;  %v710_v35 = vmax.f32 %v632_v24, 0.0  ;;  %1927 = vmatprep.subr.bf16.mxu1 %v2013_v19  ;;  %v2018_v24 = vld [vmem:[%s2136_s25 + $0x20] sm:$0xff]   ;;  %v745_v31 = vsub.s32 1, %v2165_v25 }
 0x11a   : > { %v713_v34 = vmax.f32 %v643_v30, 0.0  ;;  %1928 = vmatpush3.bf16.msra.mxu1 %v2013_v19  ;;  %v2020_v30 = vld [vmem:[%s2136_s25 + $0x30] sm:$0xff]  }
 0x11b   : > { %v711_v36 = vmax.f32 %v635_v32, 0.0  ;;  %v2256_v32 = vrot.slane %v2171_v27, %v745_v31 }
 0x11c   : > { %v735_v37 = vpack.c.bf16 %v713_v34, %v712_v33 }
 0x11d   : > { %v734_v38 = vpack.c.bf16 %v711_v36, %v710_v35  ;;  %v1883_v39 = vpop.f32.mrb[20].mxu0 }
 0x11e   : > { %v656_v40 = vadd.f32 %v1883_v39, %v2176_v28  ;;  %v647_v41 = vpop.f32.mrb[21].mxu0 }
 0x11f   : > { %v648_v42 = vadd.f32 %v647_v41, %v2176_v28  ;;  %v1884_v43 = vpop.f32.mrb[22].mxu0  ;;  %1911 = vmatprep.mubr.msk.bf16.mxu1 %vm747_vm2, %v734_v38 }
 0x120   : > { %v659_v44 = vadd.f32 %v1884_v43, %v2176_v28  ;;  %v650_v45 = vpop.f32.mrb[23].mxu0  ;;  %1912 = vmatmul.mubr.msk.bf16.gmra.mrb[8].mxu1 %vm747_vm2, %v735_v37  ;;  %v716_v47 = vmax.f32 %v656_v40, 0.0 }
 0x121   : > { %v651_v46 = vadd.f32 %v650_v45, %v2176_v28  ;;  %v714_v49 = vmax.f32 %v648_v42, 0.0 }
 0x122   : > { %v717_v48 = vmax.f32 %v659_v44, 0.0 }
 0x123   : > { %v715_v50 = vmax.f32 %v651_v46, 0.0 }
 0x124   : > { %v737_v51 = vpack.c.bf16 %v717_v48, %v716_v47 }
 0x125   : > { %v736_v52 = vpack.c.bf16 %v715_v50, %v714_v49  ;;  %v1887_v53 = vpop.f32.mrb[24].mxu0 }
 0x126   : > { %v672_v54 = vadd.f32 %v1887_v53, %v2176_v28  ;;  %v663_v55 = vpop.f32.mrb[25].mxu0 }
 0x127   : > { %v664_v56 = vadd.f32 %v663_v55, %v2176_v28  ;;  %v1888_v57 = vpop.f32.mrb[26].mxu0  ;;  %1915 = vmatprep.mubr.msk.bf16.mxu1 %vm747_vm2, %v736_v52 }
 0x128   : > { %v675_v58 = vadd.f32 %v1888_v57, %v2176_v28  ;;  %v666_v59 = vpop.f32.mrb[27].mxu0  ;;  %1916 = vmatmul.mubr.msk.bf16.gmra.mrb[12].mxu1 %vm747_vm2, %v737_v51  ;;  %v720_v61 = vmax.f32 %v672_v54, 0.0 }
 0x129   : > { %v667_v60 = vadd.f32 %v666_v59, %v2176_v28  ;;  %v718_v63 = vmax.f32 %v664_v56, 0.0 }
 0x12a   : > { %v721_v62 = vmax.f32 %v675_v58, 0.0 }
 0x12b   : > { %v719_v0 = vmax.f32 %v667_v60, 0.0 }
 0x12c   : > { %v739_v1 = vpack.c.bf16 %v721_v62, %v720_v61 }
 0x12d   : > { %v738_v2 = vpack.c.bf16 %v719_v0, %v718_v63  ;;  %v1891_v3 = vpop.f32.mrb[28].mxu0 }
 0x12e   : > { %v688_v4 = vadd.f32 %v1891_v3, %v2176_v28  ;;  %v679_v5 = vpop.f32.mrb[29].mxu0 }
 0x12f   : > { %v680_v6 = vadd.f32 %v679_v5, %v2176_v28  ;;  %v1892_v7 = vpop.f32.mrb[30].mxu0  ;;  %1919 = vmatprep.mubr.msk.bf16.mxu1 %vm747_vm2, %v738_v2 }
 0x130   : > { %v691_v8 = vadd.f32 %v1892_v7, %v2176_v28  ;;  %v682_v9 = vpop.f32.mrb[31].mxu0  ;;  %1920 = vmatmul.mubr.msk.bf16.gmra.mrb[16].mxu1 %vm747_vm2, %v739_v1  ;;  %v724_v11 = vmax.f32 %v688_v4, 0.0 }
 0x131   : > { %v683_v10 = vadd.f32 %v682_v9, %v2176_v28  ;;  %v722_v13 = vmax.f32 %v680_v6, 0.0  ;;  %v2012_v28 = vld [vmem:[%s2694_s5 + $0x8] sm:$0xff]  }
 0x132   : > { %v725_v12 = vmax.f32 %v691_v8, 0.0  ;;  %1964 = vmatpush3.bf16.msra.mxu0 %v2012_v28 }
 0x133   : > { %v723_v14 = vmax.f32 %v683_v10, 0.0  ;;  %1969 = vmatprep.subr.bf16.mxu0 %v2042_v18 }
 0x134   : > { %v741_v15 = vpack.c.bf16 %v725_v12, %v724_v11 }
 0x135   : > { %v740_v16 = vpack.c.bf16 %v723_v14, %v722_v13 }
 0x137   : > { %1923 = vmatprep.mubr.msk.bf16.mxu1 %vm747_vm2, %v740_v16 }
 0x138   : > { %1924 = vmatmul.mubr.msk.bf16.gmra.mrb[20].mxu1 %vm747_vm2, %v741_v15 }
 0x139   : > { %1929 = vmatprep.mubr.msk.bf16.mxu1 %vm1084_vm4, %v2014_v20 }
 0x140   : > { %1930 = vmatmul.mubr.msk.bf16.vlgmr.msra.gmra.mrb[24].mxu1 %vm1084_vm4, %v2015_v21 }
 0x141   : > { %1933 = vmatprep.mubr.msk.bf16.mxu1 %vm1084_vm4, %v2016_v22 }
 0x148   : > { %1934 = vmatmul.mubr.msk.bf16.gmra.mrb[28].mxu1 %vm1084_vm4, %v2017_v23 }
 0x149   : > { %1937 = vmatprep.mubr.msk.bf16.mxu1 %vm1084_vm4, %v2018_v24 }
 0x150   : > { %1938 = vmatmul.mubr.msk.bf16.gmra.mrb[32].mxu1 %vm1084_vm4, %v2019_v29 }
 0x151   : > { %1941 = vmatprep.mubr.msk.bf16.mxu1 %vm1084_vm4, %v2020_v30 }
 0x1d3   : > { %v1897_v33 = vpop.f32.mrb[32].mxu0 }
 0x1d4   : > { %v833_v34 = vpop.f32.mrb[33].mxu0  ;;  %v2262_v38 = vadd.f32 %v1897_v33, %v2256_v32 }
 0x1d5   : > { %v2259_v35 = vadd.f32 %v833_v34, %v2256_v32  ;;  %v1898_v36 = vpop.f32.mrb[34].mxu0 }
 0x1d6   : > { %v836_v37 = vpop.f32.mrb[35].mxu0  ;;  %v2270_v41 = vadd.f32 %v1898_v36, %v2256_v32  ;;  %v1298_v44 = vsel %vm1294_vm5, %v2262_v38, 0.0 }
 0x1d7   : > { %v2265_v39 = vadd.f32 %v836_v37, %v2256_v32  ;;  %v1295_v40 = vsel %vm1294_vm5, %v2259_v35, 0.0 }
 0x1d8   : > { %v1300_v48 = vsel %vm1294_vm5, %v2270_v41, 0.0 }
 0x1d9   : > { %v1296_v42 = vsel %vm1294_vm5, %v2265_v39, 0.0 }
 0x1da   : > { %v1297_v43 = vadd.f32 %v1296_v42, %v1295_v40 }
 0x1db   : > { %v1901_v45 = vpop.f32.mrb[36].mxu0 }
 0x1dc   : > { %v1299_v46 = vadd.f32 %v1298_v44, %v1297_v43  ;;  %v849_v47 = vpop.f32.mrb[37].mxu0  ;;  %v2282_v53 = vadd.f32 %v1901_v45, %v2256_v32 }
 0x1dd   : > { %v2279_v49 = vadd.f32 %v849_v47, %v2256_v32  ;;  %v1902_v50 = vpop.f32.mrb[38].mxu0 }
 0x1de   : > { %v1301_v51 = vadd.f32 %v1300_v48, %v1299_v46  ;;  %v852_v52 = vpop.f32.mrb[39].mxu0  ;;  %v2290_v57 = vadd.f32 %v1902_v50, %v2256_v32  ;;  %v1306_v60 = vsel %vm1294_vm5, %v2282_v53, 0.0 }
 0x1df   : > { %v1302_v54 = vsel %vm1294_vm5, %v2279_v49, 0.0  ;;  %v2287_v55 = vadd.f32 %v852_v52, %v2256_v32 }
 0x1e0   : > { %v1303_v56 = vadd.f32 %v1302_v54, %v1301_v51  ;;  %v1308_v0 = vsel %vm1294_vm5, %v2290_v57, 0.0 }
 0x1e1   : > { %v1304_v58 = vsel %vm1294_vm5, %v2287_v55, 0.0 }
 0x1e2   : > { %v1305_v59 = vadd.f32 %v1304_v58, %v1303_v56 }
 0x1e3   : > { %v1905_v61 = vpop.f32.mrb[0].mxu1 }
 0x1e4   : > { %v1307_v62 = vadd.f32 %v1306_v60, %v1305_v59  ;;  %v865_v63 = vpop.f32.mrb[1].mxu1  ;;  %v2302_v5 = vadd.f32 %v1905_v61, %v2256_v32 }
 0x1e5   : > { %v2299_v1 = vadd.f32 %v865_v63, %v2256_v32  ;;  %v1906_v2 = vpop.f32.mrb[2].mxu1 }
 0x1e6   : > { %v1309_v3 = vadd.f32 %v1308_v0, %v1307_v62  ;;  %v868_v4 = vpop.f32.mrb[3].mxu1  ;;  %v2310_v9 = vadd.f32 %v1906_v2, %v2256_v32  ;;  %v1314_v12 = vsel %vm1294_vm5, %v2302_v5, 0.0 }
 0x1e7   : > { %v1310_v6 = vsel %vm1294_vm5, %v2299_v1, 0.0  ;;  %v2307_v7 = vadd.f32 %v868_v4, %v2256_v32 }
 0x1e8   : > { %v1311_v8 = vadd.f32 %v1310_v6, %v1309_v3  ;;  %v1316_v16 = vsel %vm1294_vm5, %v2310_v9, 0.0 }
 0x1e9   : > { %v1312_v10 = vsel %vm1294_vm5, %v2307_v7, 0.0 }
 0x1ea   : > { %v1313_v11 = vadd.f32 %v1312_v10, %v1311_v8 }
 0x1eb   : > { %v1909_v13 = vpop.f32.mrb[4].mxu1 }
 0x1ec   : > { %v1315_v14 = vadd.f32 %v1314_v12, %v1313_v11  ;;  %v881_v15 = vpop.f32.mrb[5].mxu1  ;;  %v2322_v21 = vadd.f32 %v1909_v13, %v2256_v32 }
 0x1ed   : > { %v2319_v17 = vadd.f32 %v881_v15, %v2256_v32  ;;  %v1910_v28 = vpop.f32.mrb[6].mxu1 }
 0x1ee   : > { %v1317_v19 = vadd.f32 %v1316_v16, %v1315_v14  ;;  %v884_v20 = vpop.f32.mrb[7].mxu1  ;;  %v2330_v29 = vadd.f32 %v1910_v28, %v2256_v32  ;;  %v1322_v33 = vsel %vm1294_vm5, %v2322_v21, 0.0 }
 0x1ef   : > { %v1318_v22 = vsel %vm1294_vm5, %v2319_v17, 0.0  ;;  %v2327_v23 = vadd.f32 %v884_v20, %v2256_v32 }
 0x1f0   : > { %v1319_v24 = vadd.f32 %v1318_v22, %v1317_v19  ;;  %v1324_v40 = vsel %vm1294_vm5, %v2330_v29, 0.0 }
 0x1f1   : > { %v1320_v30 = vsel %vm1294_vm5, %v2327_v23, 0.0 }
 0x1f2   : > { %v1321_v31 = vadd.f32 %v1320_v30, %v1319_v24 }
 0x1f3   : > { %v1913_v34 = vpop.f32.mrb[8].mxu1 }
 0x1f4   : > { %v1323_v36 = vadd.f32 %v1322_v33, %v1321_v31  ;;  %v897_v37 = vpop.f32.mrb[9].mxu1  ;;  %v2342_v46 = vadd.f32 %v1913_v34, %v2256_v32 }
 0x1f5   : > { %v2339_v42 = vadd.f32 %v897_v37, %v2256_v32  ;;  %v1914_v43 = vpop.f32.mrb[10].mxu1 }
 0x1f6   : > { %v1325_v44 = vadd.f32 %v1324_v40, %v1323_v36  ;;  %v900_v45 = vpop.f32.mrb[11].mxu1  ;;  %v2350_v51 = vadd.f32 %v1914_v43, %v2256_v32  ;;  %v1330_v56 = vsel %vm1294_vm5, %v2342_v46, 0.0 }
 0x1f7   : > { %v1326_v47 = vsel %vm1294_vm5, %v2339_v42, 0.0  ;;  %v2347_v48 = vadd.f32 %v900_v45, %v2256_v32 }
 0x1f8   : > { %v1327_v50 = vadd.f32 %v1326_v47, %v1325_v44  ;;  %2714 = vst [vmem:[#allocation3_spill] sm:$0xff] %v2350_v51  ;;  %v1332_v61 = vsel %vm1294_vm5, %v2350_v51, 0.0 }
 0x1f9   : > { %2713 = vst [vmem:[#allocation2_spill] sm:$0xff] %v2347_v48  ;;  %v1328_v52 = vsel %vm1294_vm5, %v2347_v48, 0.0 }
 0x1fa   : > { %v1329_v54 = vadd.f32 %v1328_v52, %v1327_v50 }
 0x1fb   : > { %v1917_v58 = vpop.f32.mrb[12].mxu1 }
 0x1fc   : > { %v1331_v59 = vadd.f32 %v1330_v56, %v1329_v54  ;;  %v913_v60 = vpop.f32.mrb[13].mxu1  ;;  %v2362_v3 = vadd.f32 %v1917_v58, %v2256_v32 }
 0x1fd   : > { %v2359_v62 = vadd.f32 %v913_v60, %v2256_v32  ;;  %v1918_v63 = vpop.f32.mrb[14].mxu1 }
 0x1fe   : > { %v1333_v0 = vadd.f32 %v1332_v61, %v1331_v59  ;;  %v916_v2 = vpop.f32.mrb[15].mxu1  ;;  %2716 = vst [vmem:[#allocation5_spill] sm:$0xff] %v2362_v3  ;;  %v2370_v10 = vadd.f32 %v1918_v63, %v2256_v32  ;;  %v1338_v13 = vsel %vm1294_vm5, %v2362_v3, 0.0  ;;  %v996_v3 = vsub.s32 2, %v2165_v25 }
 0x1ff   : > { %2715 = vst [vmem:[#allocation4_spill] sm:$0xff] %v2359_v62  ;;  %v1334_v4 = vsel %vm1294_vm5, %v2359_v62, 0.0  ;;  %v2367_v6 = vadd.f32 %v916_v2, %v2256_v32 }
 0x200   : > { %v1335_v8 = vadd.f32 %v1334_v4, %v1333_v0  ;;  %2718 = vst [vmem:[#allocation7_spill] sm:$0xff] %v2370_v10  ;;  %v1340_v28 = vsel %vm1294_vm5, %v2370_v10, 0.0  ;;  %v2464_v51 = vrot.slane %v2171_v27, %v996_v3 }
 0x201   : > { %2717 = vst [vmem:[#allocation6_spill] sm:$0xff] %v2367_v6  ;;  %v1336_v11 = vsel %vm1294_vm5, %v2367_v6, 0.0 }
 0x202   : > { %v1337_v12 = vadd.f32 %v1336_v11, %v1335_v8 }
 0x203   : > { %v1921_v14 = vpop.f32.mrb[16].mxu1 }
 0x204   : > { %v1339_v15 = vadd.f32 %v1338_v13, %v1337_v12  ;;  %v929_v16 = vpop.f32.mrb[17].mxu1  ;;  %v2382_v30 = vadd.f32 %v1921_v14, %v2256_v32 }
 0x205   : > { %v2379_v19 = vadd.f32 %v929_v16, %v2256_v32  ;;  %v1922_v20 = vpop.f32.mrb[18].mxu1 }
 0x206   : > { %v1341_v22 = vadd.f32 %v1340_v28, %v1339_v15  ;;  %v932_v24 = vpop.f32.mrb[19].mxu1  ;;  %2720 = vst [vmem:[#allocation9_spill] sm:$0xff] %v2382_v30  ;;  %v2390_v36 = vadd.f32 %v1922_v20, %v2256_v32  ;;  %v1346_v43 = vsel %vm1294_vm5, %v2382_v30, 0.0 }
 0x207   : > { %2719 = vst [vmem:[#allocation8_spill] sm:$0xff] %v2379_v19  ;;  %v1342_v31 = vsel %vm1294_vm5, %v2379_v19, 0.0  ;;  %v2387_v33 = vadd.f32 %v932_v24, %v2256_v32 }
 0x208   : > { %v1343_v34 = vadd.f32 %v1342_v31, %v1341_v22  ;;  %2722 = vst [vmem:[#allocation11_spill] sm:$0xff] %v2390_v36  ;;  %v1348_v50 = vsel %vm1294_vm5, %v2390_v36, 0.0  ;;  %v1431_v22 = vld [vmem:[%s2695_s6] sm:$0xf] }
 0x209   : > { %2721 = vst [vmem:[#allocation10_spill] sm:$0xff] %v2387_v33  ;;  %v1344_v37 = vsel %vm1294_vm5, %v2387_v33, 0.0 }
 0x20a   : > { %v1345_v40 = vadd.f32 %v1344_v37, %v1343_v34  ;;  %v1438_v34 = vsel %vm529_vm0, %v1431_v22, 0  ;;  %v2021_v37 = vld [vmem:[%s2136_s25 + $0x38] sm:$0xff]  }
 0x20b   : > { %v1925_v44 = vpop.f32.mrb[20].mxu1  ;;  %1942 = vmatmul.mubr.msk.bf16.gmra.mrb[36].mxu1 %vm1084_vm4, %v2021_v37 }
 0x20c   : > { %v1347_v45 = vadd.f32 %v1346_v43, %v1345_v40  ;;  %v945_v47 = vpop.f32.mrb[21].mxu1  ;;  %v2402_v59 = vadd.f32 %v1925_v44, %v2256_v32  ;;  %v2022_v40 = vld [vmem:[%s2136_s25 + $0x40] sm:$0xff]   ;;  %v2023_v43 = vld [vmem:[%s2136_s25 + $0x48] sm:$0xff]   ;;  %v2024_v44 = vld [vmem:[%s2136_s25 + $0x50] sm:$0xff]  }
 0x20d   : > { %v2399_v52 = vadd.f32 %v945_v47, %v2256_v32  ;;  %v1926_v54 = vpop.f32.mrb[22].mxu1  ;;  %1945 = vmatprep.mubr.msk.bf16.mxu1 %vm1084_vm4, %v2022_v40 }
 0x20e   : > { %v1349_v56 = vadd.f32 %v1348_v50, %v1347_v45  ;;  %v948_v58 = vpop.f32.mrb[23].mxu1  ;;  %2724 = vst [vmem:[#allocation13_spill] sm:$0xff] %v2402_v59  ;;  %v2410_v0 = vadd.f32 %v1926_v54, %v2256_v32  ;;  %v1354_v8 = vsel %vm1294_vm5, %v2402_v59, 0.0  ;;  %v2025_v54 = vld [vmem:[%s2136_s25 + $0x58] sm:$0xff]  }
 0x20f   : > { %2723 = vst [vmem:[#allocation12_spill] sm:$0xff] %v2399_v52  ;;  %v1350_v60 = vsel %vm1294_vm5, %v2399_v52, 0.0  ;;  %v2407_v61 = vadd.f32 %v948_v58, %v2256_v32  ;;  %v1432_v52 = vrot.slane %v2171_v27, 4 }
 0x210   : > { %v1351_v63 = vadd.f32 %v1350_v60, %v1349_v56  ;;  %2726 = vst [vmem:[#allocation15_spill] sm:$0xff] %v2410_v0  ;;  %v1356_v12 = vsel %vm1294_vm5, %v2410_v0, 0.0  ;;  %v2026_v56 = vld [vmem:[%s2136_s25 + $0x60] sm:$0xff]  }
 0x211   : > { %2725 = vst [vmem:[#allocation14_spill] sm:$0xff] %v2407_v61  ;;  %v1352_v2 = vsel %vm1294_vm5, %v2407_v61, 0.0 }
 0x212   : > { %v1353_v4 = vadd.f32 %v1352_v2, %v1351_v63 }
 0x213   : > { %v2430_v45 = vpop.f32.mrb[24].mxu1  ;;  %1946 = vmatmul.mubr.msk.bf16.gmra.mrb[40].mxu1 %vm1084_vm4, %v2023_v43 }
 0x214   : > { %v1355_v11 = vadd.f32 %v1354_v8, %v1353_v4  ;;  %v2433_v47 = vpop.f32.mrb[25].mxu1  ;;  %1949 = vmatprep.mubr.msk.bf16.mxu1 %vm1084_vm4, %v2024_v44  ;;  %v2027_v4 = vld [vmem:[%s2136_s25 + $0x68] sm:$0xff]   ;;  %v2028_v8 = vld [vmem:[%s2136_s25 + $0x70] sm:$0xff]  }
 0x215   : > { %v2436_v50 = vpop.f32.mrb[26].mxu1 }
 0x216   : > { %v1357_v13 = vadd.f32 %v1356_v12, %v1355_v11 }
 0x218   : > { %v1358_v14 = vrot.slane %v1357_v13, 4 }
 0x21a   : > { %v1359_v15 = vadd.f32 %v1358_v14, %v1357_v13 }
 0x21b   : > { %1950 = vmatmul.mubr.msk.bf16.gmra.mrb[44].mxu1 %vm1084_vm4, %v2025_v54 }
 0x21c   : > { %v1360_v32 = vrot.slane %v1359_v15, 2  ;;  %1953 = vmatprep.mubr.msk.bf16.mxu1 %vm1084_vm4, %v2026_v56 }
 0x21e   : > { %v1361_v16 = vadd.f32 %v1360_v32, %v1359_v15  ;;  %v2029_v15 = vld [vmem:[%s2136_s25 + $0x78] sm:$0xff]   ;;  %v1384_v32 = vrot.slane %v2171_v27, 3 }
 0x220   : > { %v1362_v28 = vrot.slane %v1361_v16, 1 }
 0x222   : > { %v1363_v20 = vadd.f32 %v1362_v28, %v1361_v16 }
 0x223   : > { %1954 = vmatmul.mubr.msk.bf16.gmra.mrb[48].mxu1 %vm1084_vm4, %v2027_v4 }
 0x224   : > { %v1365_v24 = vmul.f32 0.00390625, %v1363_v20  ;;  %1957 = vmatprep.mubr.msk.bf16.mxu1 %vm1084_vm4, %v2028_v8 }
 0x226   : > { %v1366_v31 = vpack.c.bf16 %v1365_v24, %v1365_v24 }
 0x228   : > { %1966 = vmatmul.mubr.msk.bf16.vlgmr.msra.gmra.mrb[40].mxu0 %vm1294_vm5, %v1366_v31 }
 0x229   : > { %1970 = vmatpush3.bf16.msra.mxu0 %v1438_v34  ;;  %1971 = vmatprep.mubr.msk.bf16.mxu0 %vm2043_vm3, %v2042_v18  ;;  %v2439_v18 = vpop.f32.mrb[27].mxu1 }
 0x22a   : > { %v2443_v58 = vpop.f32.mrb[28].mxu1 }
 0x22b   : > { %v2445_v60 = vpop.f32.mrb[29].mxu1  ;;  %1958 = vmatmul.mubr.msk.bf16.gmra.mrb[52].mxu1 %vm1084_vm4, %v2029_v15 }
 0x22c   : > { %v2447_v63 = vpop.f32.mrb[30].mxu1 }
 0x22d   : > { %v1186_v2 = vpop.f32.mrb[31].mxu1  ;;  %v1195_v27 = vadd.f32 %v2447_v63, %v2464_v51 }
 0x22e   : > { %v1939_v11 = vpop.f32.mrb[32].mxu1 }
 0x22f   : > { %v1199_v12 = vpop.f32.mrb[33].mxu1  ;;  %v1208_v3 = vadd.f32 %v1939_v11, %v2464_v51 }
 0x230   : > { %v1940_v13 = vpop.f32.mrb[34].mxu1 }
 0x231   : > { %v1202_v14 = vpop.f32.mrb[35].mxu1 }
 0x2de   : > { %v1943_v37 = vpop.f32.mrb[36].mxu1 }
 0x2df   : > { %v1215_v40 = vpop.f32.mrb[37].mxu1 }
 0x2e0   : > { %v1944_v43 = vpop.f32.mrb[38].mxu1 }
 0x2e1   : > { %v1218_v44 = vpop.f32.mrb[39].mxu1 }
 0x2e6   : > { %v1947_v54 = vpop.f32.mrb[40].mxu1 }
 0x2e7   : > { %v1231_v56 = vpop.f32.mrb[41].mxu1 }
 0x2e8   : > { %v1948_v4 = vpop.f32.mrb[42].mxu1 }
 0x2e9   : > { %v1234_v8 = vpop.f32.mrb[43].mxu1 }
 0x2ea   : > { %v2497_v63 = vadd.f32 %v1234_v8, %v2464_v51 }
 0x2ee   : > { %v1951_v15 = vpop.f32.mrb[44].mxu1 }
 0x2ef   : > { %v1247_v26 = vpop.f32.mrb[45].mxu1  ;;  %v2500_v11 = vadd.f32 %v1951_v15, %v2464_v51 }
 0x2f0   : > { %v1952_v61 = vpop.f32.mrb[46].mxu1 }
 0x2f1   : > { %v1250_v0 = vpop.f32.mrb[47].mxu1 }
 0x2fb   : > { %v1423_v16 = vpop.f32.mrb[40].mxu0 }
 0x2fc   : > { %v1424_v28 = vadd.f32 %v1423_v16, %v1384_v32  ;;  %v1967_v20 = vpop.f32.mrb[41].mxu0  ;;  %v1955_v32 = vpop.f32.mrb[48].mxu1 }
 0x2fd   : > { %v1426_v22 = vpop.f32.mrb[42].mxu0  ;;  %v1263_v16 = vpop.f32.mrb[49].mxu1 }
 0x2fe   : > { %v1429_v24 = vmax.f32 %v1424_v28, 0.0  ;;  %v1968_v31 = vpop.f32.mrb[43].mxu0  ;;  %v1956_v20 = vpop.f32.mrb[50].mxu1 }
 0x2ff   : > { %v1266_v28 = vpop.f32.mrb[51].mxu1 }
 0x300   : > { %v1430_v34 = vpack.c.bf16 %v1429_v24, %v1429_v24  ;;  %v1959_v22 = vpop.f32.mrb[52].mxu1 }
 0x301   : > { %v1279_v24 = vpop.f32.mrb[53].mxu1 }
 0x302   : > { %1972 = vmatmul.mubr.msk.bf16.vlgmr.msra.gmra.mrb[44].mxu0 %vm747_vm2, %v1430_v34  ;;  %v1960_v31 = vpop.f32.mrb[54].mxu1 }
 0x303   : > { %v2459_v34 = vpop.f32.mrb[55].mxu1 }
 0x304   : > { %2727 = vst [vmem:[#allocation16_spill] sm:$0xff] %v2459_v34  ;;  %v1176_v34 = vadd.f32 %v2430_v45, %v2464_v51  ;;  %v1216_v45 = vadd.f32 %v1215_v40, %v2464_v51 }
 0x3d5   : > { %v1474_v59 = vpop.f32.mrb[44].mxu0 }
 0x3d6   : > { %v1475_v33 = vadd.f32 %v1474_v59, %v1432_v52  ;;  %v1973_v36 = vpop.f32.mrb[45].mxu0  ;;  %v1168_v52 = vadd.f32 %v2433_v47, %v2464_v51  ;;  %v1224_v59 = vadd.f32 %v1943_v37, %v2464_v51  ;;  %v1227_v47 = vadd.f32 %v1944_v43, %v2464_v51 }
 0x3d7   : > { %v1477_v19 = vpop.f32.mrb[46].mxu0  ;;  %v1203_v36 = vadd.f32 %v1202_v14, %v2464_v51  ;;  %v2509_v14 = vadd.f32 %v1250_v0, %v2464_v51  ;;  %v2728_v37 = vsub.s32 0, %v2165_v25  ;;  %v2516_v43 = vadd.f32 %v1955_v32, %v2464_v51 }
 0x3d8   : > { %v1480_v30 = vsub.f32 0.0, %v1475_v33  ;;  %v1974_v6 = vpop.f32.mrb[47].mxu0  ;;  %v1179_v19 = vadd.f32 %v2436_v50, %v2464_v51  ;;  %v1211_v33 = vadd.f32 %v1940_v13, %v2464_v51  ;;  %v1219_v50 = vadd.f32 %v1218_v44, %v2464_v51 }
 0x3d9   : > { %v1171_v6 = vadd.f32 %v2439_v18, %v2464_v51  ;;  %v1240_v18 = vadd.f32 %v1947_v54, %v2464_v51  ;;  %v2506_v13 = vadd.f32 %v1952_v61, %v2464_v51  ;;  %v2519_v44 = vadd.f32 %v1263_v16, %v2464_v51 }
 0x3da   : > { %v1481_v10 = vmul.f32 1.442695, %v1480_v30  ;;  %v1200_v30 = vadd.f32 %v1199_v12, %v2464_v51  ;;  %v2503_v12 = vadd.f32 %v1247_v26, %v2464_v51  ;;  %v2522_v54 = vadd.f32 %v1956_v20, %v2464_v51 }
 0x3db   : > { %v2525_v26 = vadd.f32 %v1266_v28, %v2464_v51  ;;  %v2528_v61 = vadd.f32 %v1959_v22, %v2464_v51  ;;  %v2531_v0 = vadd.f32 %v1279_v24, %v2464_v51  ;;  %v2534_v25 = vadd.f32 %v1960_v31, %v2464_v51 }
 0x3dc   : > { %2030 = vpow2.f32 %v1481_v10  ;;  %v1192_v10 = vadd.f32 %v2443_v58, %v2464_v51  ;;  %v2491_v58 = vadd.f32 %v1231_v56, %v2464_v51 }
 0x3dd   : > { %2729 = vst [vmem:[#allocation17_spill] sm:$0xff] %v2534_v25 }
 0x3e6   : > { %v2031_v62 = vpop.eup %2030 }
 0x3e7   : > { %v1483_v48 = vadd.f32 1.0, %v2031_v62  ;;  %v1187_v62 = vadd.f32 %v1186_v2, %v2464_v51 }
 0x3e9   : > { %2032 = vrcp.f32 %v1483_v48  ;;  %v1184_v48 = vadd.f32 %v2445_v60, %v2464_v51  ;;  %v2494_v60 = vadd.f32 %v1948_v4, %v2464_v51 }
 0x3f3   : > { %v2033_v2 = vpop.eup %2032 }
 0x3f4   : > { %v2513_v40 = vrot.slane %v2033_v2, %v2728_v37 }
 0x3f6   : > { %v1490_v56 = vmul.f32 %v2513_v40, %v2259_v35  ;;  %v1491_v4 = vmul.f32 %v2513_v40, %v2265_v39  ;;  %v1492_v8 = vmul.f32 %v2513_v40, %v2262_v38  ;;  %v1493_v15 = vmul.f32 %v2513_v40, %v2270_v41 }
 0x3f7   : > { %v1494_v32 = vmul.f32 %v2513_v40, %v2279_v49  ;;  %v1495_v16 = vmul.f32 %v2513_v40, %v2287_v55  ;;  %v1496_v20 = vmul.f32 %v2513_v40, %v2282_v53  ;;  %v1497_v35 = vmul.f32 %v2513_v40, %v2290_v57 }
 0x3f8   : > { %v1498_v39 = vmul.f32 %v2513_v40, %v2299_v1  ;;  %v1499_v38 = vmul.f32 %v2513_v40, %v2307_v7  ;;  %v1500_v41 = vmul.f32 %v2513_v40, %v2302_v5  ;;  %v1501_v49 = vmul.f32 %v2513_v40, %v2310_v9 }
 0x3f9   : > { %v1502_v55 = vmul.f32 %v2513_v40, %v2319_v17  ;;  %v1503_v53 = vmul.f32 %v2513_v40, %v2327_v23  ;;  %v1504_v57 = vmul.f32 %v2513_v40, %v2322_v21  ;;  %v1505_v1 = vmul.f32 %v2513_v40, %v2330_v29 }
 0x3fa   : > { %v1508_v7 = vmul.f32 %v2513_v40, %v2342_v46  ;;  %v1522_v5 = vadd.f32 %v1490_v56, %v1168_v52  ;;  %v1523_v28 = vadd.f32 %v1491_v4, %v1171_v6  ;;  %v1524_v22 = vadd.f32 %v1492_v8, %v1176_v34 }
 0x3fb   : > { %v1525_v9 = vadd.f32 %v1493_v15, %v1179_v19  ;;  %v1526_v24 = vadd.f32 %v1494_v32, %v1184_v48  ;;  %v1527_v31 = vadd.f32 %v1495_v16, %v1187_v62  ;;  %v1528_v17 = vadd.f32 %v1496_v20, %v1192_v10  ;;  %v2730_v15 = vld [vmem:[#allocation3_spill] sm:$0xff]  ;;  %v2731_v16 = vld [vmem:[#allocation2_spill] sm:$0xff] }
 0x3fc   : > { %v1529_v2 = vadd.f32 %v1497_v35, %v1195_v27  ;;  %v1530_v37 = vadd.f32 %v1498_v39, %v1200_v30  ;;  %v1531_v23 = vadd.f32 %v1499_v38, %v1203_v36  ;;  %v1532_v25 = vadd.f32 %v1500_v41, %v1208_v3  ;;  %v2732_v35 = vld [vmem:[#allocation5_spill] sm:$0xff]  ;;  %v2733_v38 = vld [vmem:[#allocation4_spill] sm:$0xff] }
 0x3fd   : > { %v1533_v21 = vadd.f32 %v1501_v49, %v1211_v33  ;;  %v1534_v29 = vadd.f32 %v1502_v55, %v1216_v45  ;;  %v1535_v46 = vadd.f32 %v1503_v53, %v1219_v50  ;;  %v1536_v52 = vadd.f32 %v1504_v57, %v1224_v59  ;;  %v2734_v49 = vld [vmem:[#allocation7_spill] sm:$0xff]  ;;  %v2735_v53 = vld [vmem:[#allocation6_spill] sm:$0xff] }
 0x3fe   : > { %v1537_v34 = vadd.f32 %v1505_v1, %v1227_v47  ;;  %v1540_v19 = vadd.f32 %v1508_v7, %v1240_v18  ;;  %v1554_v6 = vmax.f32 %v1522_v5, 0.0  ;;  %v1555_v10 = vmax.f32 %v1523_v28, 0.0  ;;  %v2736_v1 = vld [vmem:[#allocation9_spill] sm:$0xff] }
 0x3ff   : > { %v1556_v48 = vmax.f32 %v1524_v22, 0.0  ;;  %v1557_v27 = vmax.f32 %v1525_v9, 0.0  ;;  %v1558_v62 = vmax.f32 %v1526_v24, 0.0  ;;  %v1559_v3 = vmax.f32 %v1527_v31, 0.0 }
 0x400   : > { %v1560_v30 = vmax.f32 %v1528_v17, 0.0  ;;  %v1561_v36 = vmax.f32 %v1529_v2, 0.0  ;;  %v1562_v33 = vmax.f32 %v1530_v37, 0.0  ;;  %v1563_v45 = vmax.f32 %v1531_v23, 0.0  ;;  %1586 = vst.msk [vmem:[%s2574_s19] sm:$0xff] %vm1294_vm5, %v1554_v6  ;;  %1587 = vst.msk [vmem:[%s2574_s19 + $0x8] sm:$0xff] %vm1294_vm5, %v1555_v10 }
 0x401   : > { %v1564_v59 = vmax.f32 %v1532_v25, 0.0  ;;  %v1565_v47 = vmax.f32 %v1533_v21, 0.0  ;;  %v1566_v50 = vmax.f32 %v1534_v29, 0.0  ;;  %v1567_v18 = vmax.f32 %v1535_v46, 0.0  ;;  %1588 = vst.msk [vmem:[%s2574_s19 + $0x10] sm:$0xff] %vm1294_vm5, %v1556_v48  ;;  %1589 = vst.msk [vmem:[%s2574_s19 + $0x18] sm:$0xff] %vm1294_vm5, %v1557_v27 }
 0x402   : > { %1590 = vst.msk [vmem:[%s2574_s19 + $0x20] sm:$0xff] %vm1294_vm5, %v1558_v62  ;;  %1591 = vst.msk [vmem:[%s2574_s19 + $0x28] sm:$0xff] %vm1294_vm5, %v1559_v3  ;;  %v1568_v56 = vmax.f32 %v1536_v52, 0.0  ;;  %v1569_v4 = vmax.f32 %v1537_v34, 0.0  ;;  %v1572_v25 = vmax.f32 %v1540_v19, 0.0  ;;  %v1506_v8 = vmul.f32 %v2513_v40, %v2339_v42  ;;  %v2737_v21 = vld [vmem:[#allocation8_spill] sm:$0xff] }
 0x403   : > { %1592 = vst.msk [vmem:[%s2574_s19 + $0x30] sm:$0xff] %vm1294_vm5, %v1560_v30  ;;  %1593 = vst.msk [vmem:[%s2574_s19 + $0x38] sm:$0xff] %vm1294_vm5, %v1561_v36  ;;  %v1509_v32 = vmul.f32 %v2513_v40, %v2730_v15  ;;  %v1507_v20 = vmul.f32 %v2513_v40, %v2731_v16  ;;  %v1512_v39 = vmul.f32 %v2513_v40, %v2732_v35  ;;  %v2740_v52 = vld [vmem:[#allocation13_spill] sm:$0xff]  ;;  %v2741_v19 = vld [vmem:[#allocation12_spill] sm:$0xff] }
 0x404   : > { %1594 = vst.msk [vmem:[%s2574_s19 + $0x40] sm:$0xff] %vm1294_vm5, %v1562_v33  ;;  %1595 = vst.msk [vmem:[%s2574_s19 + $0x48] sm:$0xff] %vm1294_vm5, %v1563_v45  ;;  %v1510_v42 = vmul.f32 %v2513_v40, %v2733_v38  ;;  %v1538_v41 = vadd.f32 %v1506_v8, %v2491_v58  ;;  %v1513_v55 = vmul.f32 %v2513_v40, %v2734_v49  ;;  %v2742_v48 = vld [vmem:[#allocation15_spill] sm:$0xff]  ;;  %v2743_v62 = vld [vmem:[#allocation16_spill] sm:$0xff] }
 0x405   : > { %1596 = vst.msk [vmem:[%s2574_s19 + $0x50] sm:$0xff] %vm1294_vm5, %v1564_v59  ;;  %1597 = vst.msk [vmem:[%s2574_s19 + $0x58] sm:$0xff] %vm1294_vm5, %v1565_v47  ;;  %v1511_v57 = vmul.f32 %v2513_v40, %v2735_v53  ;;  %v1516_v7 = vmul.f32 %v2513_v40, %v2736_v1  ;;  %v1541_v5 = vadd.f32 %v1509_v32, %v2494_v60  ;;  %v2744_v30 = vld [vmem:[#allocation14_spill] sm:$0xff] }
 0x406   : > { %1598 = vst.msk [vmem:[%s2574_s19 + $0x60] sm:$0xff] %vm1294_vm5, %v1566_v50  ;;  %1599 = vst.msk [vmem:[%s2574_s19 + $0x68] sm:$0xff] %vm1294_vm5, %v1567_v18  ;;  %v1539_v28 = vadd.f32 %v1507_v20, %v2497_v63  ;;  %v1544_v22 = vadd.f32 %v1512_v39, %v2500_v11  ;;  %v1542_v58 = vadd.f32 %v1510_v42, %v2503_v12  ;;  %v1570_v9 = vmax.f32 %v1538_v41, 0.0  ;;  %v2745_v50 = vld [vmem:[#allocation17_spill] sm:$0xff] }
 0x407   : > { %1600 = vst.msk [vmem:[%s2574_s19 + $0x70] sm:$0xff] %vm1294_vm5, %v1568_v56  ;;  %1601 = vst.msk [vmem:[%s2574_s19 + $0x78] sm:$0xff] %vm1294_vm5, %v1569_v4  ;;  %v1545_v24 = vadd.f32 %v1513_v55, %v2506_v13  ;;  %v1543_v31 = vadd.f32 %v1511_v57, %v2509_v14  ;;  %v1548_v17 = vadd.f32 %v1516_v7, %v2516_v43  ;;  %v1573_v2 = vmax.f32 %v1541_v5, 0.0  ;;  %v2738_v13 = vld [vmem:[#allocation11_spill] sm:$0xff]  ;;  %v2739_v43 = vld [vmem:[#allocation10_spill] sm:$0xff] }
 0x408   : > { %1604 = vst.msk [vmem:[%s2574_s19 + $0x90] sm:$0xff] %vm1294_vm5, %v1572_v25  ;;  %v1571_v37 = vmax.f32 %v1539_v28, 0.0  ;;  %v1576_v60 = vmax.f32 %v1544_v22, 0.0  ;;  %v1574_v63 = vmax.f32 %v1542_v58, 0.0  ;;  %1602 = vst.msk [vmem:[%s2574_s19 + $0x80] sm:$0xff] %vm1294_vm5, %v1570_v9  ;;  %v1514_v29 = vmul.f32 %v2513_v40, %v2737_v21 }
 0x409   : > { %v1577_v11 = vmax.f32 %v1545_v24, 0.0  ;;  %v1575_v12 = vmax.f32 %v1543_v31, 0.0  ;;  %v1580_v23 = vmax.f32 %v1548_v17, 0.0  ;;  %1605 = vst.msk [vmem:[%s2574_s19 + $0x98] sm:$0xff] %vm1294_vm5, %v1573_v2  ;;  %v1517_v14 = vmul.f32 %v2513_v40, %v2738_v13 }
 0x40a   : > { %1603 = vst.msk [vmem:[%s2574_s19 + $0x88] sm:$0xff] %vm1294_vm5, %v1571_v37  ;;  %1608 = vst.msk [vmem:[%s2574_s19 + $0xb0] sm:$0xff] %vm1294_vm5, %v1576_v60  ;;  %v1515_v46 = vmul.f32 %v2513_v40, %v2739_v43  ;;  %v1520_v34 = vmul.f32 %v2513_v40, %v2740_v52  ;;  %v1518_v6 = vmul.f32 %v2513_v40, %v2741_v19 }
 0x40b   : > { %1606 = vst.msk [vmem:[%s2574_s19 + $0xa0] sm:$0xff] %vm1294_vm5, %v1574_v63  ;;  %1609 = vst.msk [vmem:[%s2574_s19 + $0xb8] sm:$0xff] %vm1294_vm5, %v1577_v11  ;;  %v1546_v10 = vadd.f32 %v1514_v29, %v2519_v44  ;;  %v1521_v27 = vmul.f32 %v2513_v40, %v2742_v48  ;;  %v1283_v3 = vadd.f32 %v2743_v62, %v2464_v51 }
 0x40c   : > { %1607 = vst.msk [vmem:[%s2574_s19 + $0xa8] sm:$0xff] %vm1294_vm5, %v1575_v12  ;;  %1612 = vst.msk [vmem:[%s2574_s19 + $0xd0] sm:$0xff] %vm1294_vm5, %v1580_v23  ;;  %v1519_v36 = vmul.f32 %v2513_v40, %v2744_v30  ;;  %v1549_v33 = vadd.f32 %v1517_v14, %v2522_v54  ;;  %v1547_v45 = vadd.f32 %v1515_v46, %v2525_v26 }
 0x40d   : > { %v1552_v59 = vadd.f32 %v1520_v34, %v2528_v61  ;;  %v1550_v44 = vadd.f32 %v1518_v6, %v2531_v0  ;;  %v1578_v47 = vmax.f32 %v1546_v10, 0.0  ;;  %v1553_v51 = vadd.f32 %v1521_v27, %v2745_v50 }
 0x40e   : > { %v1551_v18 = vadd.f32 %v1519_v36, %v1283_v3  ;;  %v1581_v56 = vmax.f32 %v1549_v33, 0.0  ;;  %v1579_v4 = vmax.f32 %v1547_v45, 0.0 }
 0x40f   : > { %v1584_v40 = vmax.f32 %v1552_v59, 0.0  ;;  %v1582_v25 = vmax.f32 %v1550_v44, 0.0  ;;  %1610 = vst.msk [vmem:[%s2574_s19 + $0xc0] sm:$0xff] %vm1294_vm5, %v1578_v47  ;;  %v1585_v54 = vmax.f32 %v1553_v51, 0.0 }
 0x410   : > { %v1583_v8 = vmax.f32 %v1551_v18, 0.0  ;;  %1613 = vst.msk [vmem:[%s2574_s19 + $0xd8] sm:$0xff] %vm1294_vm5, %v1581_v56  ;;  %1611 = vst.msk [vmem:[%s2574_s19 + $0xc8] sm:$0xff] %vm1294_vm5, %v1579_v4 }
 0x411   : > { %1616 = vst.msk [vmem:[%s2574_s19 + $0xf0] sm:$0xff] %vm1294_vm5, %v1584_v40  ;;  %1614 = vst.msk [vmem:[%s2574_s19 + $0xe0] sm:$0xff] %vm1294_vm5, %v1582_v25 }
 0x412   : > { %1617 = vst.msk [vmem:[%s2574_s19 + $0xf8] sm:$0xff] %vm1294_vm5, %v1585_v54  ;;  %1615 = vst.msk [vmem:[%s2574_s19 + $0xe8] sm:$0xff] %vm1294_vm5, %v1583_v8 }
 0x413 PF: > { %s18_s27 = sadd.s32 1, %s2040_s27  }
 0x414   : > { %p15_p4 = scmp.ge.s32.totalorder %s18_s27, 4  }
 0x416   :  { %17 = sbr.rel (!%p15_p4) target bundleno = 1 (0x1), region = 85 }

// kernel: e_senet_forward.13
= control target key start
LH: loop header
LB: loop body
LE: loop exit
PB: predicated region body
PF: predicated region fallthrough
CT: control target
= control target key end

     0   :  { %s1241_s27 = smov 0   ;;  %s1422_s0 = inlined_call_operand.vmem [shape: bf16[2,64,144], index: 0, kind: input, shape index: {}]   ;;  %s1423_s1 = inlined_call_operand.vmem [shape: bf16[2,64,32], index: 1, kind: input, shape index: {}]   ;;  %s1424_s2 = inlined_call_operand.vmem [shape: bf16[144,16], index: 2, kind: input, shape index: {}]   ;;  %s1425_s3 = inlined_call_operand.vmem [shape: bf16[16,64], index: 3, kind: input, shape index: {}]   ;;  %s1426_s4 = inlined_call_operand.vmem [shape: bf16[32,64], index: 4, kind: input, shape index: {}]   ;;  %s1427_s5 = inlined_call_operand.vmem [shape: bf16[64,16], index: 5, kind: input, shape index: {}]   ;;  %s1428_s6 = inlined_call_operand.vmem [shape: bf16[16,64], index: 6, kind: input, shape index: {}]   ;;  %s1429_s7 = inlined_call_operand.vmem [shape: f32[8,64], index: 7, kind: input, shape index: {}]   ;;  %s1430_s8 = inlined_call_operand.vmem [shape: f32[2,64,64], index: 8, kind: output, shape index: {}]  }
   0x1 LB: > { %s1020_s28 = sadd.s32 4294967295, %s1191_s27   ;;  %p1024_p0 = scmp.ge.s32.totalorder %s1191_s27, 1  ;;  %s1191_s27 = sphi %s1241_s27, %s18_s27  }
   0x2   : > { %p272_p1 = scmp.lt.s32.totalorder %s1191_s27, 3 }
   0x4   : > { %p273_p2 = pnand %p1024_p0, %p272_p1 }
   0x5   : > { %v1148_v0 = vld [vmem:[%s1424_s2] sm:$0xff] (!%p273_p2)   ;;  %v1193_v1 = vmov (!%p273_p2), 0   ;;  %p311_p3 = scmp.lt.s32.totalorder (!%p273_p2), %s1020_s28, 1  ;;  %v1149_v2 = vld [vmem:[%s1424_s2 + $0x8] sm:$0xff] (!%p273_p2)   ;;  %v1150_v3 = vld [vmem:[%s1424_s2 + $0x10] sm:$0xff] (!%p273_p2)   ;;  %vm448_vm0 = vcmask (!%p273_p2), 130048   ;;  %v354_v19 = vlaneseq (!%p273_p2) }
   0x6   : > { %276 = sbr.rel (%p273_p2) target bundleno = 998 (0x3e6), region = 52  ;;  %461 = vmatprep.subr.bf16.mxu0 (!%p273_p2), %v1193_v1  ;;  %v1151_v4 = vld [vmem:[%s1424_s2 + $0x18] sm:$0xff] (!%p273_p2)   ;;  %v1152_v6 = vld [vmem:[%s1424_s2 + $0x20] sm:$0xff] (!%p273_p2)   ;;  %v1153_v7 = vld [vmem:[%s1424_s2 + $0x28] sm:$0xff] (!%p273_p2)   ;;  %vm675_vm1 = vcmask (!%p273_p2), 261120   ;;  %vm1195_vm2 = vmmov (!%p273_p2), 0  }
   0x7   : > { %462 = vmatpush1.bf16.msra.mxu0 (!%p273_p2), %v1148_v0  ;;  %v1154_v8 = vld [vmem:[%s1424_s2 + $0x30] sm:$0xff] (!%p273_p2)   ;;  %v1155_v9 = vld [vmem:[%s1424_s2 + $0x38] sm:$0xff] (!%p273_p2)   ;;  %v1156_v10 = vld [vmem:[%s1424_s2 + $0x40] sm:$0xff] (!%p273_p2)   ;;  %v1307_v20 = vshrl.u32 (!%p273_p2), %v354_v19, 7  ;;  %vm753_vm3 = vcmask (!%p273_p2), 523264  }
   0x8   : > { %463 = vmatprep.subr.bf16.mxu0 (!%p273_p2), %v1193_v1  ;;  %v1169_v18 = vld [vmem:[%s1425_s3] sm:$0xff] (!%p273_p2)   ;;  %v1171_v61 = vld [vmem:[%s1426_s4 + $0x8] sm:$0xff] (!%p273_p2)  }
   0x9   : > { %1097 = vmatprep.subr.bf16.mxu1 (!%p273_p2), %v1169_v18  ;;  %v356_v21 = vsub.s32 (!%p273_p2), 0, %v1307_v20  ;;  %v1313_v22 = vld [vmem:[%s1429_s7] sm:$0xff] (!%p273_p2) }
   0xa   : > { %1098 = vmatpush3.bf16.msra.mxu1 (!%p273_p2), %v1169_v18  ;;  %v1170_v60 = vld [vmem:[%s1426_s4] sm:$0xff] (!%p273_p2)  }
   0xb   : > { %464 = vmatpush1.bf16.msra.mxu0 (!%p273_p2), %v1149_v2  ;;  %v357_v23 = vrot.slane (!%p273_p2), %v1313_v22, %v356_v21  ;;  %1107 = vmatprep.subr.bf16.mxu1 (!%p273_p2), %v1170_v60  ;;  %v1174_v0 = vld [vmem:[%s1427_s5] sm:$0xff] (!%p273_p2)  }
   0xc   : > { %465 = vmatprep.subr.bf16.mxu0 (!%p273_p2), %v1193_v1 }
   0xd   : > { %s1432_s28 = smov (!%p311_p3, %s1020_s28), 1 }
   0xe   : > { %s1076_s11 = sshll.u32 %s1432_s28, 6  ;;  %s1077_s19 = sshll.u32 %s1432_s28, 5 }
   0xf   : > { %s1266_s16 = scalar_lea.vmem %s1422_s0, %s1076_s11  ;;  %466 = vmatpush1.bf16.msra.mxu0 %v1150_v3  ;;  %s1280_s24 = scalar_lea.vmem %s1423_s1, %s1077_s19  ;;  %v1176_v3 = vld [vmem:[%s1427_s5 + $0x8] sm:$0xff]  }
  0x10   : > { %v1159_v5 = vld [vmem:[%s1266_s16 + $0x4] ss:$8 sps:$4 sm:$0xff]   ;;  %467 = vmatprep.subr.bf16.mxu0 %v1193_v1  ;;  %v1157_v11 = vld [vmem:[%s1266_s16] ss:$8 sps:$4 sm:$0xff]   ;;  %v1160_v12 = vld [vmem:[%s1266_s16 + $0x14] ss:$8 sps:$4 sm:$0xff]   ;;  %s325_s15 = scalar_lea.vmem %s1430_s8, %s1076_s11 }
  0x11   : > { %1048 = vmatprep.mubr.msk.bf16.mxu0 %vm448_vm0, %v1159_v5  ;;  %v1162_v13 = vld [vmem:[%s1266_s16 + $0x10] ss:$8 sps:$4 sm:$0xff]   ;;  %v1163_v14 = vld [vmem:[%s1266_s16 + $0x24] ss:$8 sps:$4 sm:$0xff]   ;;  %v1165_v15 = vld [vmem:[%s1266_s16 + $0x20] ss:$8 sps:$4 sm:$0xff]  }
  0x12   : > { %v1166_v16 = vld [vmem:[%s1266_s16 + $0x34] ss:$8 sps:$4 sm:$0xff]   ;;  %v1168_v17 = vld [vmem:[%s1266_s16 + $0x30] ss:$8 sps:$4 sm:$0xff]   ;;  %v1172_v62 = vld [vmem:[%s1280_s24] sm:$0xff]  }
  0x13   : > { %468 = vmatpush1.bf16.msra.mxu0 %v1151_v4  ;;  %v1173_v63 = vld [vmem:[%s1280_s24 + $0x8] sm:$0xff]   ;;  %v1175_v2 = vld [vmem:[%s1280_s24 + $0x10] sm:$0xff]   ;;  %v1177_v4 = vld [vmem:[%s1280_s24 + $0x18] sm:$0xff]  }
  0x14   : > { %469 = vmatprep.subr.bf16.mxu0 %v1193_v1  ;;  %v1178_v5 = vld [vmem:[%s1427_s5 + $0x10] sm:$0xff]  }
  0x17   : > { %470 = vmatpush1.bf16.msra.mxu0 %v1152_v6  ;;  %v1179_v6 = vld [vmem:[%s1427_s5 + $0x18] sm:$0xff]  }
  0x18   : > { %471 = vmatprep.subr.bf16.mxu0 %v1193_v1 }
  0x1b   : > { %472 = vmatpush1.bf16.msra.mxu0 %v1153_v7  ;;  %v542_v7 = vsub.s32 1, %v1307_v20 }
  0x1c   : > { %473 = vmatprep.subr.bf16.mxu0 %v1193_v1 }
  0x1f   : > { %474 = vmatpush1.bf16.msra.mxu0 %v1154_v8 }
  0x20   : > { %475 = vmatprep.subr.bf16.mxu0 %v1193_v1 }
  0x23   : > { %476 = vmatpush1.bf16.msra.mxu0 %v1155_v9 }
  0x24   : > { %477 = vmatprep.subr.bf16.mxu0 %v1193_v1  ;;  %v1194_v1 = vmov 0.0  }
  0x27   : > { %478 = vmatpush1.bf16.msra.mxu0 %v1156_v10  ;;  %v543_v10 = vrot.slane %v1313_v22, %v542_v7 }
  0x2a   : > { %494 = vmatmul.mubr.bf16.vlgmr.msra.gmra.mrb[0].mxu0 %v1157_v11 }
  0x2b   : > { %1049 = vmatprep.mubr.msk.bf16.mxu0 %vm448_vm0, %v1160_v12 }
  0x32   : > { %502 = vmatmul.mubr.bf16.gmra.mrb[4].mxu0 %v1162_v13 }
  0x33   : > { %1050 = vmatprep.mubr.msk.bf16.mxu0 %vm448_vm0, %v1163_v14 }
  0x3a   : > { %510 = vmatmul.mubr.bf16.gmra.mrb[8].mxu0 %v1165_v15 }
  0x3b   : > { %1051 = vmatprep.mubr.msk.bf16.mxu0 %vm448_vm0, %v1166_v16 }
  0x42   : > { %518 = vmatmul.mubr.bf16.gmra.mrb[12].mxu0 %v1168_v17 }
  0xfd   : > { %v495_v24 = vpop.f32.mrb[0].mxu0 }
  0xfe   : > { %v496_v25 = vadd.f32 %v495_v24, %v357_v23  ;;  %v497_v26 = vpop.f32.mrb[1].mxu0 }
  0xff   : > { %v498_v27 = vpop.f32.mrb[2].mxu0 }
 0x100   : > { %v499_v28 = vadd.f32 %v498_v27, %v357_v23  ;;  %v500_v29 = vpop.f32.mrb[3].mxu0  ;;  %v526_v30 = vmax.f32 %v496_v25, 0.0 }
 0x102   : > { %v527_v31 = vmax.f32 %v499_v28, 0.0 }
 0x104   : > { %v534_v32 = vpack.c.bf16 %v527_v31, %v526_v30 }
 0x105   : > { %v503_v33 = vpop.f32.mrb[4].mxu0 }
 0x106   : > { %v504_v34 = vadd.f32 %v503_v33, %v357_v23  ;;  %v505_v35 = vpop.f32.mrb[5].mxu0  ;;  %1099 = vmatprep.mubr.msk.bf16.mxu1 %vm448_vm0, %v534_v32 }
 0x107   : > { %v506_v36 = vpop.f32.mrb[6].mxu0 }
 0x108   : > { %v507_v37 = vadd.f32 %v506_v36, %v357_v23  ;;  %v508_v38 = vpop.f32.mrb[7].mxu0  ;;  %v528_v39 = vmax.f32 %v504_v34, 0.0 }
 0x10a   : > { %v529_v40 = vmax.f32 %v507_v37, 0.0 }
 0x10c   : > { %v535_v41 = vpack.c.bf16 %v529_v40, %v528_v39 }
 0x10d   : > { %v511_v42 = vpop.f32.mrb[8].mxu0 }
 0x10e   : > { %v512_v43 = vadd.f32 %v511_v42, %v357_v23  ;;  %v513_v44 = vpop.f32.mrb[9].mxu0  ;;  %1100 = vmatmul.mubr.msk.bf16.vlgmr.msra.gmra.mrb[0].mxu1 %vm448_vm0, %v535_v41 }
 0x10f   : > { %v514_v45 = vpop.f32.mrb[10].mxu0  ;;  %1108 = vmatpush3.bf16.msra.mxu1 %v1170_v60  ;;  %v811_v60 = vrot.slane %v1313_v22, 3 }
 0x110   : > { %v515_v46 = vadd.f32 %v514_v45, %v357_v23  ;;  %v516_v47 = vpop.f32.mrb[11].mxu0  ;;  %v530_v48 = vmax.f32 %v512_v43, 0.0  ;;  %1109 = vmatprep.subr.bf16.mxu1 %v1171_v61 }
 0x112   : > { %v531_v49 = vmax.f32 %v515_v46, 0.0 }
 0x113   : > { %1110 = vmatpush3.bf16.msra.mxu1 %v1171_v61 }
 0x114   : > { %v536_v50 = vpack.c.bf16 %v531_v49, %v530_v48  ;;  %1119 = vmatprep.subr.bf16.mxu1 %v1194_v1 }
 0x115   : > { %v519_v51 = vpop.f32.mrb[12].mxu0 }
 0x116   : > { %v520_v52 = vadd.f32 %v519_v51, %v357_v23  ;;  %v521_v53 = vpop.f32.mrb[13].mxu0  ;;  %1103 = vmatprep.mubr.msk.bf16.mxu1 %vm448_vm0, %v536_v50  ;;  %v1180_v50 = vld [vmem:[%s1428_s6] sm:$0xff]  }
 0x117   : > { %v522_v54 = vpop.f32.mrb[14].mxu0 }
 0x118   : > { %v523_v55 = vadd.f32 %v522_v54, %v357_v23  ;;  %v524_v56 = vpop.f32.mrb[15].mxu0  ;;  %v532_v57 = vmax.f32 %v520_v52, 0.0 }
 0x11a   : > { %v533_v58 = vmax.f32 %v523_v55, 0.0 }
 0x11c   : > { %v537_v59 = vpack.c.bf16 %v533_v58, %v532_v57 }
 0x11e   : > { %1104 = vmatmul.mubr.msk.bf16.gmra.mrb[4].mxu1 %vm448_vm0, %v537_v59 }
 0x11f   : > { %1111 = vmatprep.mubr.msk.bf16.mxu1 %vm675_vm1, %v1172_v62 }
 0x126   : > { %1112 = vmatmul.mubr.msk.bf16.vlgmr.msra.gmra.mrb[8].mxu1 %vm675_vm1, %v1173_v63 }
 0x127   : > { %1120 = vmatpush3.bf16.msra.mxu1 %v1174_v0  ;;  %1115 = vmatprep.mubr.msk.bf16.mxu1 %vm675_vm1, %v1175_v2 }
 0x128   : > { %1121 = vmatprep.subr.bf16.mxu1 %v1194_v1 }
 0x12b   : > { %1122 = vmatpush3.bf16.msra.mxu1 %v1176_v3 }
 0x12c   : > { %1123 = vmatprep.subr.bf16.mxu1 %v1194_v1 }
 0x12e   : > { %1116 = vmatmul.mubr.msk.bf16.gmra.mrb[12].mxu1 %vm675_vm1, %v1177_v4 }
 0x12f   : > { %1124 = vmatpush3.bf16.msra.mxu1 %v1178_v5  ;;  %1127 = vmatprep.mubr.msk.bf16.mxu1 %vm1195_vm2, %v1194_v1 }
 0x130   : > { %1125 = vmatprep.subr.bf16.mxu1 %v1194_v1 }
 0x133   : > { %1126 = vmatpush3.bf16.msra.mxu1 %v1179_v6 }
 0x134   : > { %1131 = vmatprep.subr.bf16.mxu1 %v1194_v1 }
 0x1e1   : > { %v1101_v8 = vpop.f32.mrb[0].mxu1 }
 0x1e2   : > { %v596_v9 = vpop.f32.mrb[1].mxu1  ;;  %v1359_v16 = vadd.f32 %v1101_v8, %v543_v10 }
 0x1e3   : > { %v1102_v11 = vpop.f32.mrb[2].mxu1  ;;  %v1355_v14 = vadd.f32 %v596_v9, %v543_v10 }
 0x1e4   : > { %v599_v12 = vpop.f32.mrb[3].mxu1  ;;  %v757_v19 = vsel %vm753_vm3, %v1359_v16, 0.0  ;;  %v1365_v23 = vadd.f32 %v1102_v11, %v543_v10 }
 0x1e5   : > { %v1353_v13 = vadd.f32 %v599_v12, %v543_v10  ;;  %v754_v17 = vsel %vm753_vm3, %v1355_v14, 0.0 }
 0x1e6   : > { %v759_v27 = vsel %vm753_vm3, %v1365_v23, 0.0 }
 0x1e7   : > { %v755_v15 = vsel %vm753_vm3, %v1353_v13, 0.0 }
 0x1e8   : > { %v756_v18 = vadd.f32 %v755_v15, %v754_v17  ;;  %v641_v17 = vsub.s32 2, %v1307_v20 }
 0x1ea   : > { %v758_v24 = vadd.f32 %v757_v19, %v756_v18  ;;  %v642_v18 = vrot.slane %v1313_v22, %v641_v17 }
 0x1ec   : > { %v760_v30 = vadd.f32 %v759_v27, %v758_v24 }
 0x1f1   : > { %v1105_v25 = vpop.f32.mrb[4].mxu1 }
 0x1f2   : > { %v612_v26 = vpop.f32.mrb[5].mxu1  ;;  %v1371_v32 = vadd.f32 %v1105_v25, %v543_v10 }
 0x1f3   : > { %v1369_v28 = vadd.f32 %v612_v26, %v543_v10  ;;  %v1106_v29 = vpop.f32.mrb[6].mxu1 }
 0x1f4   : > { %v615_v31 = vpop.f32.mrb[7].mxu1  ;;  %v1377_v36 = vadd.f32 %v1106_v29, %v543_v10  ;;  %v765_v39 = vsel %vm753_vm3, %v1371_v32, 0.0 }
 0x1f5   : > { %v761_v33 = vsel %vm753_vm3, %v1369_v28, 0.0  ;;  %v1375_v34 = vadd.f32 %v615_v31, %v543_v10 }
 0x1f6   : > { %v762_v35 = vadd.f32 %v761_v33, %v760_v30  ;;  %v767_v41 = vsel %vm753_vm3, %v1377_v36, 0.0 }
 0x1f7   : > { %v763_v37 = vsel %vm753_vm3, %v1375_v34, 0.0 }
 0x1f8   : > { %v764_v38 = vadd.f32 %v763_v37, %v762_v35 }
 0x1f9   : > { %v1113_v52 = vpop.f32.mrb[8].mxu1 }
 0x1fa   : > { %v766_v40 = vadd.f32 %v765_v39, %v764_v38  ;;  %v722_v53 = vpop.f32.mrb[9].mxu1  ;;  %v731_v24 = vadd.f32 %v1113_v52, %v642_v18 }
 0x1fb   : > { %v1114_v54 = vpop.f32.mrb[10].mxu1  ;;  %v723_v25 = vadd.f32 %v722_v53, %v642_v18 }
 0x1fc   : > { %v768_v42 = vadd.f32 %v767_v41, %v766_v40  ;;  %v725_v55 = vpop.f32.mrb[11].mxu1  ;;  %v734_v26 = vadd.f32 %v1114_v54, %v642_v18 }
 0x1fd   : > { %v726_v27 = vadd.f32 %v725_v55, %v642_v18 }
 0x1fe   : > { %v769_v43 = vrot.slane %v768_v42, 4 }
 0x200   : > { %v770_v44 = vadd.f32 %v769_v43, %v768_v42 }
 0x201   : > { %v1117_v56 = vpop.f32.mrb[12].mxu1 }
 0x202   : > { %v771_v45 = vrot.slane %v770_v44, 2  ;;  %v738_v57 = vpop.f32.mrb[13].mxu1  ;;  %v747_v30 = vadd.f32 %v1117_v56, %v642_v18 }
 0x203   : > { %v1118_v58 = vpop.f32.mrb[14].mxu1  ;;  %v739_v31 = vadd.f32 %v738_v57, %v642_v18 }
 0x204   : > { %v772_v46 = vadd.f32 %v771_v45, %v770_v44  ;;  %v741_v59 = vpop.f32.mrb[15].mxu1  ;;  %v750_v33 = vadd.f32 %v1118_v58, %v642_v18 }
 0x205   : > { %v742_v35 = vadd.f32 %v741_v59, %v642_v18 }
 0x206   : > { %v773_v47 = vrot.slane %v772_v46, 1 }
 0x208   : > { %v774_v48 = vadd.f32 %v773_v47, %v772_v46 }
 0x20a   : > { %v776_v49 = vmul.f32 0.015625, %v774_v48 }
 0x20c   : > { %v777_v51 = vpack.c.bf16 %v776_v49, %v776_v49 }
 0x20e   : > { %1128 = vmatmul.mubr.msk.bf16.vlgmr.msra.gmra.mrb[16].mxu1 %vm753_vm3, %v777_v51 }
 0x20f   : > { %1132 = vmatpush3.bf16.msra.mxu1 %v1180_v50  ;;  %1133 = vmatprep.mubr.msk.bf16.mxu1 %vm1195_vm2, %v1194_v1  ;;  %v866_v1 = vrot.slane %v1313_v22, 4 }
 0x2e1   : > { %v850_v61 = vpop.f32.mrb[16].mxu1 }
 0x2e2   : > { %v851_v62 = vadd.f32 %v850_v61, %v811_v60  ;;  %v1129_v63 = vpop.f32.mrb[17].mxu1 }
 0x2e3   : > { %v853_v0 = vpop.f32.mrb[18].mxu1 }
 0x2e4   : > { %v856_v2 = vmax.f32 %v851_v62, 0.0  ;;  %v1130_v3 = vpop.f32.mrb[19].mxu1 }
 0x2e6   : > { %v857_v4 = vpack.c.bf16 %v856_v2, %v856_v2 }
 0x2e8   : > { %1134 = vmatmul.mubr.msk.bf16.vlgmr.msra.gmra.mrb[20].mxu1 %vm448_vm0, %v857_v4 }
 0x3bb   : > { %v905_v5 = vpop.f32.mrb[20].mxu1 }
 0x3bc   : > { %v906_v6 = vadd.f32 %v905_v5, %v866_v1  ;;  %v1135_v7 = vpop.f32.mrb[21].mxu1 }
 0x3bd   : > { %v908_v8 = vpop.f32.mrb[22].mxu1 }
 0x3be   : > { %v911_v9 = vsub.f32 0.0, %v906_v6  ;;  %v1136_v10 = vpop.f32.mrb[23].mxu1 }
 0x3c0   : > { %v912_v11 = vmul.f32 1.442695, %v911_v9 }
 0x3c2   : > { %1181 = vpow2.f32 %v912_v11 }
 0x3cc   : > { %v1182_v12 = vpop.eup %1181 }
 0x3cd   : > { %v914_v15 = vadd.f32 1.0, %v1182_v12 }
 0x3cf   : > { %1183 = vrcp.f32 %v914_v15 }
 0x3d9   : > { %v1184_v19 = vpop.eup %1183 }
 0x3da   : > { %v920_v29 = vrot.slane %v1184_v19, %v356_v21 }
 0x3dc   : > { %v921_v37 = vmul.f32 %v920_v29, %v1355_v14  ;;  %v922_v38 = vmul.f32 %v920_v29, %v1353_v13  ;;  %v923_v39 = vmul.f32 %v920_v29, %v1359_v16  ;;  %v924_v22 = vmul.f32 %v920_v29, %v1365_v23 }
 0x3dd   : > { %v925_v40 = vmul.f32 %v920_v29, %v1369_v28  ;;  %v926_v41 = vmul.f32 %v920_v29, %v1375_v34  ;;  %v927_v20 = vmul.f32 %v920_v29, %v1371_v32  ;;  %v928_v21 = vmul.f32 %v920_v29, %v1377_v36 }
 0x3de   : > { %v929_v42 = vadd.f32 %v921_v37, %v723_v25  ;;  %v930_v43 = vadd.f32 %v922_v38, %v726_v27  ;;  %v931_v44 = vadd.f32 %v923_v39, %v731_v24  ;;  %v932_v45 = vadd.f32 %v924_v22, %v734_v26 }
 0x3df   : > { %v933_v13 = vadd.f32 %v925_v40, %v739_v31  ;;  %v934_v14 = vadd.f32 %v926_v41, %v742_v35  ;;  %v935_v16 = vadd.f32 %v927_v20, %v747_v30  ;;  %v936_v23 = vadd.f32 %v928_v21, %v750_v33 }
 0x3e0   : > { %v937_v28 = vmax.f32 %v929_v42, 0.0  ;;  %v938_v46 = vmax.f32 %v930_v43, 0.0  ;;  %v939_v34 = vmax.f32 %v931_v44, 0.0  ;;  %v940_v47 = vmax.f32 %v932_v45, 0.0 }
 0x3e1   : > { %v941_v32 = vmax.f32 %v933_v13, 0.0  ;;  %v942_v48 = vmax.f32 %v934_v14, 0.0  ;;  %v943_v36 = vmax.f32 %v935_v16, 0.0  ;;  %v944_v49 = vmax.f32 %v936_v23, 0.0 }
 0x3e2   : > { %945 = vst.msk [vmem:[%s325_s15] sm:$0xff] %vm753_vm3, %v937_v28  ;;  %946 = vst.msk [vmem:[%s325_s15 + $0x8] sm:$0xff] %vm753_vm3, %v938_v46 }
 0x3e3   : > { %947 = vst.msk [vmem:[%s325_s15 + $0x10] sm:$0xff] %vm753_vm3, %v939_v34  ;;  %948 = vst.msk [vmem:[%s325_s15 + $0x18] sm:$0xff] %vm753_vm3, %v940_v47 }
 0x3e4   : > { %949 = vst.msk [vmem:[%s325_s15 + $0x20] sm:$0xff] %vm753_vm3, %v941_v32  ;;  %950 = vst.msk [vmem:[%s325_s15 + $0x28] sm:$0xff] %vm753_vm3, %v942_v48 }
 0x3e5   : > { %951 = vst.msk [vmem:[%s325_s15 + $0x30] sm:$0xff] %vm753_vm3, %v943_v36  ;;  %952 = vst.msk [vmem:[%s325_s15 + $0x38] sm:$0xff] %vm753_vm3, %v944_v49 }
 0x3e6 PF: > { %s18_s27 = sadd.s32 1, %s1191_s27  }
 0x3e7   : > { %p15_p4 = scmp.ge.s32.totalorder %s18_s27, 4  }
 0x3e9   :  { %17 = sbr.rel (!%p15_p4) target bundleno = 1 (0x1), region = 85 }

// kernel: e_senet_forward.14
= control target key start
LH: loop header
LB: loop body
LE: loop exit
PB: predicated region body
PF: predicated region fallthrough
CT: control target
= control target key end

     0   :  { %vm110_vm0 = vcmask 523264   ;;  %vm312_vm1 = vcmask 257024   ;;  %s573_s1 = inlined_call_operand.vmem [shape: bf16[64,32], index: 1, kind: input, shape index: {}]   ;;  %s574_s0 = inlined_call_operand.vmem [shape: bf16[128,64], index: 0, kind: input, shape index: {}]   ;;  %s575_s2 = inlined_call_operand.vmem [shape: f32[1,32], index: 2, kind: input, shape index: {}]   ;;  %s576_s3 = inlined_call_operand.vmem [shape: bf16[128,32], index: 3, kind: output, shape index: {}]  }
   0x1   :  { %v430_v0 = vld [vmem:[%s573_s1] sm:$0xff]   ;;  %v431_v1 = vld [vmem:[%s573_s1 + $0x8] sm:$0xff]   ;;  %v432_v2 = vld [vmem:[%s573_s1 + $0x10] sm:$0xff]  }
   0x2   :  { %398 = vmatprep.subr.bf16.mxu0 %v430_v0  ;;  %422 = vmatprep.subr.bf16.mxu1 %v430_v0  ;;  %v434_v3 = vld [vmem:[%s574_s0] sm:$0xff]   ;;  %v433_v5 = vld [vmem:[%s573_s1 + $0x18] sm:$0xff]   ;;  %v436_v6 = vld [vmem:[%s574_s0 + $0x8] sm:$0xff]  }
   0x3   :  { %399 = vmatpush3.bf16.msra.mxu0 %v430_v0  ;;  %426 = vmatpush3.bf16.msra.mxu1 %v430_v0  ;;  %v435_v4 = vld [vmem:[%s574_s0 + $0x20] sm:$0xff]   ;;  %v437_v7 = vld [vmem:[%s574_s0 + $0x28] sm:$0xff]   ;;  %v438_v8 = vld [vmem:[%s574_s0 + $0x10] sm:$0xff]  }
   0x4   :  { %400 = vmatprep.subr.bf16.mxu0 %v431_v1  ;;  %423 = vmatprep.subr.bf16.mxu1 %v431_v1  ;;  %v439_v9 = vld [vmem:[%s574_s0 + $0x30] sm:$0xff]   ;;  %v440_v10 = vld [vmem:[%s574_s0 + $0x18] sm:$0xff]   ;;  %v333_v12 = vld [vmem:[%s575_s2] ss:$0 sm:$0xff] }
   0x5   :  { %406 = vmatprep.mubr.msk.bf16.mxu0 %vm110_vm0, %v434_v3  ;;  %414 = vmatprep.mubr.msk.bf16.mxu1 %vm110_vm0, %v435_v4  ;;  %v441_v11 = vld [vmem:[%s574_s0 + $0x38] sm:$0xff]  }
   0x7   :  { %401 = vmatpush3.bf16.msra.mxu0 %v431_v1  ;;  %427 = vmatpush3.bf16.msra.mxu1 %v431_v1 }
   0x8   :  { %402 = vmatprep.subr.bf16.mxu0 %v432_v2  ;;  %424 = vmatprep.subr.bf16.mxu1 %v432_v2 }
   0xb   :  { %403 = vmatpush3.bf16.msra.mxu0 %v432_v2  ;;  %428 = vmatpush3.bf16.msra.mxu1 %v432_v2 }
   0xc   :  { %404 = vmatprep.subr.bf16.mxu0 %v433_v5  ;;  %425 = vmatprep.subr.bf16.mxu1 %v433_v5 }
   0xf   :  { %405 = vmatpush3.bf16.msra.mxu0 %v433_v5  ;;  %429 = vmatpush3.bf16.msra.mxu1 %v433_v5 }
  0x12   :  { %407 = vmatmul.mubr.msk.bf16.vlgmr.msra.gmra.mrb[0].mxu0 %vm110_vm0, %v436_v6  ;;  %415 = vmatmul.mubr.msk.bf16.vlgmr.msra.gmra.mrb[0].mxu1 %vm110_vm0, %v437_v7 }
  0x13   :  { %410 = vmatprep.mubr.msk.bf16.mxu0 %vm110_vm0, %v438_v8  ;;  %418 = vmatprep.mubr.msk.bf16.mxu1 %vm110_vm0, %v439_v9 }
  0x1a   :  { %411 = vmatmul.mubr.msk.bf16.gmra.mrb[4].mxu0 %vm110_vm0, %v440_v10  ;;  %419 = vmatmul.mubr.msk.bf16.gmra.mrb[4].mxu1 %vm110_vm0, %v441_v11 }
  0xe5   :  { %v408_v13 = vpop.f32.mrb[0].mxu0  ;;  %v416_v14 = vpop.f32.mrb[0].mxu1 }
  0xe6   :  { %v178_v15 = vadd.f32 %v408_v13, %v333_v12  ;;  %v210_v16 = vadd.f32 %v416_v14, %v333_v12  ;;  %v169_v17 = vpop.f32.mrb[1].mxu0  ;;  %v201_v18 = vpop.f32.mrb[1].mxu1 }
  0xe7   :  { %v170_v19 = vadd.f32 %v333_v12, %v169_v17  ;;  %v202_v20 = vadd.f32 %v333_v12, %v201_v18  ;;  %v409_v21 = vpop.f32.mrb[2].mxu0  ;;  %v417_v22 = vpop.f32.mrb[2].mxu1 }
  0xe8   :  { %v234_v23 = vmax.f32 %v178_v15, 0.0  ;;  %v242_v24 = vmax.f32 %v210_v16, 0.0  ;;  %v181_v25 = vadd.f32 %v409_v21, %v333_v12  ;;  %v213_v26 = vadd.f32 %v417_v22, %v333_v12  ;;  %v172_v27 = vpop.f32.mrb[3].mxu0  ;;  %v204_v28 = vpop.f32.mrb[3].mxu1 }
  0xe9   :  { %v232_v29 = vmax.f32 %v170_v19, 0.0  ;;  %v240_v30 = vmax.f32 %v202_v20, 0.0  ;;  %v173_v31 = vadd.f32 %v333_v12, %v172_v27  ;;  %v205_v32 = vadd.f32 %v333_v12, %v204_v28 }
  0xea   :  { %v372_v33 = vpack.c.bf16 %v234_v23, %v234_v23  ;;  %v380_v34 = vpack.c.bf16 %v242_v24, %v242_v24  ;;  %v235_v35 = vmax.f32 %v181_v25, 0.0  ;;  %v243_v36 = vmax.f32 %v213_v26, 0.0 }
  0xeb   :  { %v370_v37 = vpack.c.bf16 %v232_v29, %v232_v29  ;;  %v378_v38 = vpack.c.bf16 %v240_v30, %v240_v30  ;;  %v233_v39 = vmax.f32 %v173_v31, 0.0  ;;  %v241_v40 = vmax.f32 %v205_v32, 0.0 }
  0xec   :  { %315 = vst.msk [vmem:[%s576_s3 + $0x8] sm:$0xf] %vm312_vm1, %v372_v33  ;;  %323 = vst.msk [vmem:[%s576_s3 + $0x28] sm:$0xf] %vm312_vm1, %v380_v34  ;;  %v373_v41 = vpack.c.bf16 %v235_v35, %v235_v35  ;;  %v381_v42 = vpack.c.bf16 %v243_v36, %v243_v36 }
  0xed   :  { %313 = vst.msk [vmem:[%s576_s3] sm:$0xf] %vm312_vm1, %v370_v37  ;;  %321 = vst.msk [vmem:[%s576_s3 + $0x20] sm:$0xf] %vm312_vm1, %v378_v38  ;;  %v371_v43 = vpack.c.bf16 %v233_v39, %v233_v39  ;;  %v379_v44 = vpack.c.bf16 %v241_v40, %v241_v40  ;;  %v412_v45 = vpop.f32.mrb[4].mxu0  ;;  %v420_v46 = vpop.f32.mrb[4].mxu1 }
  0xee   :  { %316 = vst.msk [vmem:[%s576_s3 + $0xc] sm:$0xf] %vm312_vm1, %v373_v41  ;;  %324 = vst.msk [vmem:[%s576_s3 + $0x2c] sm:$0xf] %vm312_vm1, %v381_v42  ;;  %v194_v47 = vadd.f32 %v412_v45, %v333_v12  ;;  %v226_v48 = vadd.f32 %v420_v46, %v333_v12  ;;  %v185_v49 = vpop.f32.mrb[5].mxu0  ;;  %v217_v50 = vpop.f32.mrb[5].mxu1 }
  0xef   :  { %314 = vst.msk [vmem:[%s576_s3 + $0x4] sm:$0xf] %vm312_vm1, %v371_v43  ;;  %322 = vst.msk [vmem:[%s576_s3 + $0x24] sm:$0xf] %vm312_vm1, %v379_v44  ;;  %v186_v51 = vadd.f32 %v333_v12, %v185_v49  ;;  %v218_v52 = vadd.f32 %v333_v12, %v217_v50  ;;  %v413_v53 = vpop.f32.mrb[6].mxu0  ;;  %v421_v54 = vpop.f32.mrb[6].mxu1 }
  0xf0   :  { %v238_v55 = vmax.f32 %v194_v47, 0.0  ;;  %v246_v56 = vmax.f32 %v226_v48, 0.0  ;;  %v197_v57 = vadd.f32 %v413_v53, %v333_v12  ;;  %v229_v58 = vadd.f32 %v421_v54, %v333_v12  ;;  %v188_v59 = vpop.f32.mrb[7].mxu0  ;;  %v220_v60 = vpop.f32.mrb[7].mxu1 }
  0xf1   :  { %v236_v61 = vmax.f32 %v186_v51, 0.0  ;;  %v244_v62 = vmax.f32 %v218_v52, 0.0  ;;  %v189_v63 = vadd.f32 %v333_v12, %v188_v59  ;;  %v221_v0 = vadd.f32 %v333_v12, %v220_v60 }
  0xf2   :  { %v376_v1 = vpack.c.bf16 %v238_v55, %v238_v55  ;;  %v384_v2 = vpack.c.bf16 %v246_v56, %v246_v56  ;;  %v239_v3 = vmax.f32 %v197_v57, 0.0  ;;  %v247_v4 = vmax.f32 %v229_v58, 0.0 }
  0xf3   :  { %v374_v5 = vpack.c.bf16 %v236_v61, %v236_v61  ;;  %v382_v6 = vpack.c.bf16 %v244_v62, %v244_v62  ;;  %v237_v7 = vmax.f32 %v189_v63, 0.0  ;;  %v245_v8 = vmax.f32 %v221_v0, 0.0 }
  0xf4   :  { %319 = vst.msk [vmem:[%s576_s3 + $0x18] sm:$0xf] %vm312_vm1, %v376_v1  ;;  %327 = vst.msk [vmem:[%s576_s3 + $0x38] sm:$0xf] %vm312_vm1, %v384_v2  ;;  %v377_v9 = vpack.c.bf16 %v239_v3, %v239_v3  ;;  %v385_v10 = vpack.c.bf16 %v247_v4, %v247_v4 }
  0xf5   :  { %317 = vst.msk [vmem:[%s576_s3 + $0x10] sm:$0xf] %vm312_vm1, %v374_v5  ;;  %325 = vst.msk [vmem:[%s576_s3 + $0x30] sm:$0xf] %vm312_vm1, %v382_v6  ;;  %v375_v11 = vpack.c.bf16 %v237_v7, %v237_v7  ;;  %v383_v12 = vpack.c.bf16 %v245_v8, %v245_v8 }
  0xf6   :  { %320 = vst.msk [vmem:[%s576_s3 + $0x1c] sm:$0xf] %vm312_vm1, %v377_v9  ;;  %328 = vst.msk [vmem:[%s576_s3 + $0x3c] sm:$0xf] %vm312_vm1, %v385_v10 }
  0xf7   :  { %318 = vst.msk [vmem:[%s576_s3 + $0x14] sm:$0xf] %vm312_vm1, %v375_v11  ;;  %326 = vst.msk [vmem:[%s576_s3 + $0x34] sm:$0xf] %vm312_vm1, %v383_v12 }

// kernel: e_senet_forward.16
= control target key start
LH: loop header
LB: loop body
LE: loop exit
PB: predicated region body
PF: predicated region fallthrough
CT: control target
= control target key end

     0   :  { %vm171_vm0 = vcmask 519168   ;;  %s304_s1 = inlined_call_operand.vmem [shape: bf16[128,64], index: 1, kind: input, shape index: {}]   ;;  %s305_s0 = inlined_call_operand.vmem [shape: bf16[32,128], index: 0, kind: input, shape index: {}]   ;;  %s306_s2 = inlined_call_operand.vmem [shape: f32[1,64], index: 2, kind: input, shape index: {}]   ;;  %s307_s3 = inlined_call_operand.vmem [shape: bf16[32,64], index: 3, kind: output, shape index: {}]  }
   0x1   :  { %v229_v0 = vld [vmem:[%s304_s1] sm:$0xff]   ;;  %v230_v1 = vld [vmem:[%s304_s1 + $0x8] sm:$0xff]   ;;  %v231_v2 = vld [vmem:[%s304_s1 + $0x10] sm:$0xff]  }
   0x2   :  { %209 = vmatprep.subr.bf16.mxu0 %v229_v0  ;;  %v232_v3 = vld [vmem:[%s304_s1 + $0x18] sm:$0xff]   ;;  %v237_v4 = vld [vmem:[%s305_s0] sm:$0xff]   ;;  %v234_v6 = vld [vmem:[%s304_s1 + $0x28] sm:$0xff]  }
   0x3   :  { %210 = vmatpush3.bf16.msra.mxu0 %v229_v0  ;;  %225 = vmatprep.mubr.bf16.mxu0 %v237_v4  ;;  %v233_v5 = vld [vmem:[%s304_s1 + $0x20] sm:$0xff]   ;;  %v235_v7 = vld [vmem:[%s304_s1 + $0x30] sm:$0xff]   ;;  %v236_v8 = vld [vmem:[%s304_s1 + $0x38] sm:$0xff]  }
   0x4   :  { %211 = vmatprep.subr.bf16.mxu0 %v230_v1  ;;  %v238_v9 = vld [vmem:[%s305_s0 + $0x8] sm:$0xff]   ;;  %v180_v10 = vld [vmem:[%s306_s2] ss:$0 sm:$0xff] }
   0x7   :  { %212 = vmatpush3.bf16.msra.mxu0 %v230_v1 }
   0x8   :  { %213 = vmatprep.subr.bf16.mxu0 %v231_v2 }
   0xb   :  { %214 = vmatpush3.bf16.msra.mxu0 %v231_v2 }
   0xc   :  { %215 = vmatprep.subr.bf16.mxu0 %v232_v3 }
   0xf   :  { %216 = vmatpush3.bf16.msra.mxu0 %v232_v3 }
  0x10   :  { %217 = vmatprep.subr.bf16.mxu0 %v233_v5 }
  0x13   :  { %218 = vmatpush3.bf16.msra.mxu0 %v233_v5 }
  0x14   :  { %219 = vmatprep.subr.bf16.mxu0 %v234_v6 }
  0x17   :  { %220 = vmatpush3.bf16.msra.mxu0 %v234_v6 }
  0x18   :  { %221 = vmatprep.subr.bf16.mxu0 %v235_v7 }
  0x1b   :  { %222 = vmatpush3.bf16.msra.mxu0 %v235_v7 }
  0x1c   :  { %223 = vmatprep.subr.bf16.mxu0 %v236_v8 }
  0x1f   :  { %224 = vmatpush3.bf16.msra.mxu0 %v236_v8 }
  0x22   :  { %226 = vmatmul.mubr.bf16.vlgmr.msra.gmra.mrb[0].mxu0 %v238_v9 }
  0xf5   :  { %v227_v11 = vpop.f32.mrb[0].mxu0 }
  0xf6   :  { %v145_v12 = vadd.f32 %v227_v11, %v180_v10  ;;  %v136_v13 = vpop.f32.mrb[1].mxu0 }
  0xf7   :  { %v137_v14 = vadd.f32 %v180_v10, %v136_v13  ;;  %v228_v15 = vpop.f32.mrb[2].mxu0 }
  0xf8   :  { %v153_v16 = vmax.f32 %v145_v12, 0.0  ;;  %v148_v17 = vadd.f32 %v228_v15, %v180_v10  ;;  %v139_v18 = vpop.f32.mrb[3].mxu0 }
  0xf9   :  { %v151_v19 = vmax.f32 %v137_v14, 0.0  ;;  %v140_v20 = vadd.f32 %v180_v10, %v139_v18 }
  0xfa   :  { %v197_v21 = vpack.c.bf16 %v153_v16, %v153_v16  ;;  %v154_v22 = vmax.f32 %v148_v17, 0.0 }
  0xfb   :  { %v195_v23 = vpack.c.bf16 %v151_v19, %v151_v19  ;;  %v152_v24 = vmax.f32 %v140_v20, 0.0 }
  0xfc   :  { %174 = vst.msk [vmem:[%s307_s3 + $0x8] sm:$0xf] %vm171_vm0, %v197_v21  ;;  %v198_v25 = vpack.c.bf16 %v154_v22, %v154_v22 }
  0xfd   :  { %172 = vst.msk [vmem:[%s307_s3] sm:$0xf] %vm171_vm0, %v195_v23  ;;  %v196_v26 = vpack.c.bf16 %v152_v24, %v152_v24 }
  0xfe   :  { %175 = vst.msk [vmem:[%s307_s3 + $0xc] sm:$0xf] %vm171_vm0, %v198_v25 }
  0xff   :  { %173 = vst.msk [vmem:[%s307_s3 + $0x4] sm:$0xf] %vm171_vm0, %v196_v26 }

// kernel: e_senet_forward.15
= control target key start
LH: loop header
LB: loop body
LE: loop exit
PB: predicated region body
PF: predicated region fallthrough
CT: control target
= control target key end

     0   :  { %s1267_s27 = smov 0   ;;  %s1444_s0 = inlined_call_operand.vmem [shape: bf16[2,16,288], index: 0, kind: input, shape index: {}]   ;;  %s1445_s1 = inlined_call_operand.vmem [shape: bf16[2,16,64], index: 1, kind: input, shape index: {}]   ;;  %s1446_s2 = inlined_call_operand.vmem [shape: bf16[288,32], index: 2, kind: input, shape index: {}]   ;;  %s1447_s3 = inlined_call_operand.vmem [shape: bf16[32,128], index: 3, kind: input, shape index: {}]   ;;  %s1448_s4 = inlined_call_operand.vmem [shape: bf16[64,128], index: 4, kind: input, shape index: {}]   ;;  %s1449_s5 = inlined_call_operand.vmem [shape: bf16[128,32], index: 5, kind: input, shape index: {}]   ;;  %s1450_s6 = inlined_call_operand.vmem [shape: bf16[32,128], index: 6, kind: input, shape index: {}]   ;;  %s1451_s7 = inlined_call_operand.vmem [shape: f32[8,128], index: 7, kind: input, shape index: {}]   ;;  %s1452_s8 = inlined_call_operand.vmem [shape: f32[2,16,128], index: 8, kind: output, shape index: {}]  }
   0x1 LB: > { %s1001_s28 = sadd.s32 4294967295, %s1218_s27   ;;  %p1005_p0 = scmp.ge.s32.totalorder %s1218_s27, 1  ;;  %s1218_s27 = sphi %s1267_s27, %s18_s27  }
   0x2   : > { %p272_p1 = scmp.lt.s32.totalorder %s1218_s27, 3 }
   0x4   : > { %p273_p2 = pnand %p1005_p0, %p272_p1 }
   0x5   : > { %v1169_v0 = vld [vmem:[%s1446_s2 + $0x40] sm:$0xff] (!%p273_p2)   ;;  %v1220_v2 = vmov (!%p273_p2), 0.0   ;;  %v1171_v3 = vld [vmem:[%s1446_s2 + $0x48] sm:$0xff] (!%p273_p2)   ;;  %p311_p3 = scmp.lt.s32.totalorder (!%p273_p2), %s1001_s28, 1  ;;  %vm1221_vm0 = vmmov (!%p273_p2), 0   ;;  %v1173_v5 = vld [vmem:[%s1446_s2 + $0x50] sm:$0xff] (!%p273_p2)   ;;  %v368_v26 = vlaneseq (!%p273_p2) }
   0x6   : > { %276 = sbr.rel (%p273_p2) target bundleno = 966 (0x3c6), region = 52  ;;  %v1170_v1 = vld [vmem:[%s1446_s2] sm:$0xff] (!%p273_p2)   ;;  %1102 = vmatprep.subr.bf16.mxu1 (!%p273_p2), %v1220_v2  ;;  %1057 = vmatprep.subr.bf16.mxu0 (!%p273_p2), %v1169_v0  ;;  %v1172_v4 = vld [vmem:[%s1446_s2 + $0x8] sm:$0xff] (!%p273_p2)   ;;  %v1174_v6 = vld [vmem:[%s1446_s2 + $0x10] sm:$0xff] (!%p273_p2)   ;;  %vm495_vm1 = vcmask (!%p273_p2), 261120   ;;  %vm691_vm2 = vcmask (!%p273_p2), 523264  }
   0x7   : > { %1058 = vmatpush3.bf16.msra.mxu0 (!%p273_p2), %v1170_v1  ;;  %1106 = vmatprep.mubr.msk.bf16.mxu1 (!%p273_p2), %vm1221_vm0, %v1220_v2  ;;  %v1175_v7 = vld [vmem:[%s1446_s2 + $0x58] sm:$0xff] (!%p273_p2)   ;;  %v1177_v9 = vld [vmem:[%s1446_s2 + $0x60] sm:$0xff] (!%p273_p2)   ;;  %v1179_v12 = vld [vmem:[%s1446_s2 + $0x68] sm:$0xff] (!%p273_p2)   ;;  %v1362_v29 = vshrl.u32 (!%p273_p2), %v368_v26, 7 }
   0x8   : > { %1059 = vmatprep.subr.bf16.mxu0 (!%p273_p2), %v1171_v3  ;;  %v1176_v8 = vld [vmem:[%s1446_s2 + $0x18] sm:$0xff] (!%p273_p2)   ;;  %v1183_v10 = vld [vmem:[%s1446_s2 + $0x80] sm:$0xff] (!%p273_p2)   ;;  %v1180_v13 = vld [vmem:[%s1446_s2 + $0x28] sm:$0xff] (!%p273_p2)  }
   0x9   : > { %v1178_v11 = vld [vmem:[%s1446_s2 + $0x20] sm:$0xff] (!%p273_p2)   ;;  %1103 = vmatpush3.bf16.msra.mxu1 (!%p273_p2), %v1183_v10  ;;  %v1181_v14 = vld [vmem:[%s1446_s2 + $0x70] sm:$0xff] (!%p273_p2)   ;;  %v1189_v16 = vld [vmem:[%s1446_s2 + $0x88] sm:$0xff] (!%p273_p2)   ;;  %v370_v32 = vsub.s32 (!%p273_p2), 0, %v1362_v29  ;;  %v590_v60 = vsub.s32 (!%p273_p2), 1, %v1362_v29 }
   0xa   : > { %1104 = vmatprep.subr.bf16.mxu1 (!%p273_p2), %v1220_v2  ;;  %v1182_v18 = vld [vmem:[%s1446_s2 + $0x30] sm:$0xff] (!%p273_p2)   ;;  %v1184_v19 = vld [vmem:[%s1446_s2 + $0x78] sm:$0xff] (!%p273_p2)   ;;  %v1191_v22 = vld [vmem:[%s1447_s3] sm:$0xff] (!%p273_p2)  }
   0xb   : > { %1060 = vmatpush3.bf16.msra.mxu0 (!%p273_p2), %v1172_v4  ;;  %v1185_v20 = vld [vmem:[%s1446_s2 + $0x38] sm:$0xff] (!%p273_p2)   ;;  %v1192_v23 = vld [vmem:[%s1447_s3 + $0x8] sm:$0xff] (!%p273_p2)   ;;  %v1193_v24 = vld [vmem:[%s1449_s5] sm:$0xff] (!%p273_p2)  }
   0xc   : > { %1061 = vmatprep.subr.bf16.mxu0 (!%p273_p2), %v1173_v5  ;;  %v1194_v25 = vld [vmem:[%s1449_s5 + $0x8] sm:$0xff] (!%p273_p2)   ;;  %v1368_v33 = vld [vmem:[%s1451_s7] sm:$0xff] (!%p273_p2)  ;;  %v1195_v48 = vld [vmem:[%s1449_s5 + $0x10] sm:$0xff] (!%p273_p2)  }
   0xd   : > { %s1454_s28 = smov (!%p311_p3, %s1001_s28), 1  ;;  %1105 = vmatpush3.bf16.msra.mxu1 %v1189_v16  ;;  %v371_v35 = vrot.slane %v1368_v33, %v370_v32  ;;  %v1196_v49 = vld [vmem:[%s1449_s5 + $0x18] sm:$0xff]   ;;  %v1197_v50 = vld [vmem:[%s1449_s5 + $0x20] sm:$0xff]   ;;  %v1198_v51 = vld [vmem:[%s1449_s5 + $0x28] sm:$0xff]   ;;  %v591_v61 = vrot.slane %v1368_v33, %v590_v60  ;;  %v871_v26 = vrot.slane %v1368_v33, 4 }
   0xe   : > { %s1158_s23 = smul.u32 24, %s1454_s28  ;;  %1110 = vmatprep.subr.bf16.mxu1 %v1220_v2  ;;  %v1199_v52 = vld [vmem:[%s1449_s5 + $0x30] sm:$0xff]   ;;  %v1200_v53 = vld [vmem:[%s1449_s5 + $0x38] sm:$0xff]   ;;  %v1201_v54 = vld [vmem:[%s1448_s4] sm:$0xff]   ;;  %s1055_s11 = sshll.u32 %s1454_s28, 3 }
   0xf   : > { %1062 = vmatpush3.bf16.msra.mxu0 %v1174_v6  ;;  %s320_s14 = scalar_lea.vmem %s1445_s1, %s1055_s11  ;;  %v1202_v55 = vld [vmem:[%s1448_s4 + $0x8] sm:$0xff]   ;;  %v1203_v56 = vld [vmem:[%s1448_s4 + $0x10] sm:$0xff]   ;;  %v1204_v57 = vld [vmem:[%s1448_s4 + $0x18] sm:$0xff]   ;;  %s1056_s25 = sshll.u32 %s1454_s28, 4 }
  0x10   : > { %1063 = vmatprep.subr.bf16.mxu0 %v1175_v7  ;;  %s315_s12 = scalar_lea.vmem %s1444_s0, %s1158_s23  ;;  %v1205_v58 = vld [vmem:[%s320_s14] sm:$0xff]   ;;  %s325_s30 = scalar_lea.vmem %s1452_s8, %s1056_s25 }
  0x11   : > { %v1188_v15 = vld [vmem:[%s315_s12 + $0x4] ss:$12 sps:$4 sm:$0xff]   ;;  %v1190_v17 = vld [vmem:[%s315_s12 + $0x8] ss:$12 sps:$4 sm:$0xff]   ;;  %v1186_v21 = vld [vmem:[%s315_s12] ss:$12 sps:$4 sm:$0xff]  }
  0x12   : > { %531 = vmatprep.mubr.bf16.mxu0 %v1188_v15  ;;  %1107 = vmatmul.mubr.msk.bf16.vlgmr.msra.gmra.mrb[0].mxu1 %vm495_vm1, %v1190_v17  ;;  %v1206_v59 = vld [vmem:[%s1450_s6] sm:$0xff]  }
  0x13   : > { %1064 = vmatpush3.bf16.msra.mxu0 %v1176_v8  ;;  %1114 = vmatprep.mubr.msk.bf16.mxu1 %vm1221_vm0, %v1220_v2 }
  0x14   : > { %1065 = vmatprep.subr.bf16.mxu0 %v1177_v9  ;;  %1111 = vmatpush3.bf16.msra.mxu1 %v1191_v22 }
  0x15   : > { %1112 = vmatprep.subr.bf16.mxu1 %v1220_v2 }
  0x17   : > { %1066 = vmatpush3.bf16.msra.mxu0 %v1178_v11 }
  0x18   : > { %1067 = vmatprep.subr.bf16.mxu0 %v1179_v12  ;;  %1113 = vmatpush3.bf16.msra.mxu1 %v1192_v23 }
  0x19   : > { %1118 = vmatprep.subr.bf16.mxu1 %v1220_v2 }
  0x1b   : > { %1068 = vmatpush3.bf16.msra.mxu0 %v1180_v13 }
  0x1c   : > { %1069 = vmatprep.subr.bf16.mxu0 %v1181_v14 }
  0x1f   : > { %1070 = vmatpush3.bf16.msra.mxu0 %v1182_v18  ;;  %v811_v18 = vrot.slane %v1368_v33, 3 }
  0x20   : > { %1071 = vmatprep.subr.bf16.mxu0 %v1184_v19 }
  0x23   : > { %1072 = vmatpush3.bf16.msra.mxu0 %v1185_v20 }
  0x24   : > { %1130 = vmatprep.subr.bf16.mxu0 %v1220_v2 }
  0x26   : > { %532 = vmatmul.mubr.bf16.vlgmr.msra.gmra.mrb[0].mxu0 %v1186_v21 }
  0x27   : > { %1146 = vmatprep.mubr.msk.bf16.mxu0 %vm1221_vm0, %v1220_v2  ;;  %1131 = vmatpush3.bf16.msra.mxu0 %v1193_v24 }
  0x28   : > { %1132 = vmatprep.subr.bf16.mxu0 %v1220_v2 }
  0x2b   : > { %1133 = vmatpush3.bf16.msra.mxu0 %v1194_v25 }
  0x2c   : > { %1134 = vmatprep.subr.bf16.mxu0 %v1220_v2 }
  0x2f   : > { %1135 = vmatpush3.bf16.msra.mxu0 %v1195_v48 }
  0x30   : > { %1136 = vmatprep.subr.bf16.mxu0 %v1220_v2 }
  0x33   : > { %1137 = vmatpush3.bf16.msra.mxu0 %v1196_v49 }
  0x34   : > { %1138 = vmatprep.subr.bf16.mxu0 %v1220_v2 }
  0x37   : > { %1139 = vmatpush3.bf16.msra.mxu0 %v1197_v50 }
  0x38   : > { %1140 = vmatprep.subr.bf16.mxu0 %v1220_v2 }
  0x3b   : > { %1141 = vmatpush3.bf16.msra.mxu0 %v1198_v51 }
  0x3c   : > { %1142 = vmatprep.subr.bf16.mxu0 %v1220_v2 }
  0x3f   : > { %1143 = vmatpush3.bf16.msra.mxu0 %v1199_v52 }
  0x40   : > { %1144 = vmatprep.subr.bf16.mxu0 %v1220_v2 }
  0x43   : > { %1145 = vmatpush3.bf16.msra.mxu0 %v1200_v53 }
  0xe5   : > { %v574_v27 = vpop.f32.mrb[0].mxu1 }
  0xe6   : > { %v1108_v28 = vpop.f32.mrb[1].mxu1 }
  0xe7   : > { %v577_v30 = vpop.f32.mrb[2].mxu1 }
  0xe8   : > { %v1109_v31 = vpop.f32.mrb[3].mxu1 }
  0xf9   : > { %v1073_v34 = vpop.f32.mrb[0].mxu0 }
  0xfa   : > { %v1074_v36 = vpop.f32.mrb[1].mxu0 }
  0xfb   : > { %v1075_v37 = vadd.f32 %v1074_v36, %v1073_v34  ;;  %v1076_v38 = vpop.f32.mrb[2].mxu0 }
  0xfc   : > { %v1077_v39 = vpop.f32.mrb[3].mxu0 }
  0xfd   : > { %v534_v40 = vadd.f32 %v1075_v37, %v371_v35  ;;  %v1078_v41 = vadd.f32 %v1077_v39, %v1076_v38  ;;  %v660_v39 = vsub.s32 2, %v1362_v29 }
  0xff   : > { %v575_v42 = vadd.f32 %v574_v27, %v534_v40  ;;  %v537_v43 = vadd.f32 %v1078_v41, %v371_v35  ;;  %v661_v40 = vrot.slane %v1368_v33, %v660_v39 }
 0x101   : > { %v578_v44 = vadd.f32 %v577_v30, %v537_v43  ;;  %v581_v45 = vmax.f32 %v575_v42, 0.0 }
 0x103   : > { %v582_v46 = vmax.f32 %v578_v44, 0.0 }
 0x105   : > { %v583_v47 = vpack.c.bf16 %v582_v46, %v581_v45 }
 0x107   : > { %1115 = vmatmul.mubr.msk.bf16.vlgmr.msra.gmra.mrb[4].mxu1 %vm495_vm1, %v583_v47 }
 0x108   : > { %1126 = vmatprep.mubr.msk.bf16.mxu1 %vm1221_vm0, %v1220_v2  ;;  %1119 = vmatpush3.bf16.msra.mxu1 %v1201_v54 }
 0x109   : > { %1120 = vmatprep.subr.bf16.mxu1 %v1220_v2 }
 0x10c   : > { %1121 = vmatpush3.bf16.msra.mxu1 %v1202_v55 }
 0x10d   : > { %1122 = vmatprep.subr.bf16.mxu1 %v1220_v2 }
 0x110   : > { %1123 = vmatpush3.bf16.msra.mxu1 %v1203_v56 }
 0x111   : > { %1124 = vmatprep.subr.bf16.mxu1 %v1220_v2 }
 0x114   : > { %1125 = vmatpush3.bf16.msra.mxu1 %v1204_v57 }
 0x115   : > { %1150 = vmatprep.subr.bf16.mxu1 %v1220_v2 }
 0x117   : > { %1127 = vmatmul.mubr.msk.bf16.vlgmr.msra.gmra.mrb[8].mxu1 %vm691_vm2, %v1205_v58 }
 0x118   : > { %1151 = vmatpush3.bf16.msra.mxu1 %v1206_v59  ;;  %1154 = vmatprep.mubr.msk.bf16.mxu1 %vm1221_vm0, %v1220_v2 }
 0x119   : > { %1152 = vmatprep.subr.bf16.mxu1 %v1220_v2  ;;  %v1207_v2 = vld [vmem:[%s1450_s6 + $0x8] sm:$0xff]  }
 0x11c   : > { %1153 = vmatpush3.bf16.msra.mxu1 %v1207_v2 }
 0x1da   : > { %v641_v62 = vpop.f32.mrb[4].mxu1 }
 0x1db   : > { %v1116_v63 = vpop.f32.mrb[5].mxu1  ;;  %v642_v1 = vadd.f32 %v641_v62, %v591_v61 }
 0x1dc   : > { %v644_v0 = vpop.f32.mrb[6].mxu1 }
 0x1dd   : > { %v645_v3 = vadd.f32 %v644_v0, %v591_v61  ;;  %v1117_v4 = vpop.f32.mrb[7].mxu1 }
 0x1df   : > { %v736_v5 = vadd.f32 %v645_v3, %v642_v1 }
 0x1e1   : > { %v737_v6 = vrot.slane %v736_v5, 4 }
 0x1e3   : > { %v738_v7 = vadd.f32 %v737_v6, %v736_v5 }
 0x1e5   : > { %v739_v8 = vrot.slane %v738_v7, 2 }
 0x1e7   : > { %v740_v9 = vadd.f32 %v739_v8, %v738_v7 }
 0x1e9   : > { %v741_v10 = vrot.slane %v740_v9, 1 }
 0x1ea   : > { %v729_v14 = vpop.f32.mrb[8].mxu1 }
 0x1eb   : > { %v742_v11 = vadd.f32 %v741_v10, %v740_v9  ;;  %v1128_v15 = vpop.f32.mrb[9].mxu1  ;;  %v730_v43 = vadd.f32 %v729_v14, %v661_v40 }
 0x1ec   : > { %v732_v16 = vpop.f32.mrb[10].mxu1 }
 0x1ed   : > { %v744_v12 = vmul.f32 0.0625, %v742_v11  ;;  %v1129_v17 = vpop.f32.mrb[11].mxu1  ;;  %v733_v44 = vadd.f32 %v732_v16, %v661_v40 }
 0x1ef   : > { %v745_v13 = vpack.c.bf16 %v744_v12, %v744_v12 }
 0x1f1   : > { %1147 = vmatmul.mubr.bf16.vlgmr.msra.gmra.mrb[4].mxu0 %v745_v13 }
 0x2c4   : > { %v847_v19 = vpop.f32.mrb[4].mxu0 }
 0x2c5   : > { %v848_v20 = vadd.f32 %v847_v19, %v811_v18  ;;  %v1148_v21 = vpop.f32.mrb[5].mxu0 }
 0x2c6   : > { %v850_v22 = vpop.f32.mrb[6].mxu0 }
 0x2c7   : > { %v853_v23 = vmax.f32 %v848_v20, 0.0  ;;  %v1149_v24 = vpop.f32.mrb[7].mxu0 }
 0x2c9   : > { %v854_v25 = vpack.c.bf16 %v853_v23, %v853_v23 }
 0x2cb   : > { %1155 = vmatmul.mubr.msk.bf16.vlgmr.msra.gmra.mrb[12].mxu1 %vm495_vm1, %v854_v25 }
 0x39e   : > { %v910_v27 = vpop.f32.mrb[12].mxu1 }
 0x39f   : > { %v911_v28 = vadd.f32 %v910_v27, %v871_v26  ;;  %v1156_v30 = vpop.f32.mrb[13].mxu1 }
 0x3a0   : > { %v913_v31 = vpop.f32.mrb[14].mxu1 }
 0x3a1   : > { %v916_v34 = vsub.f32 0.0, %v911_v28  ;;  %v1157_v35 = vpop.f32.mrb[15].mxu1 }
 0x3a3   : > { %v917_v36 = vmul.f32 1.442695, %v916_v34 }
 0x3a5   : > { %1208 = vpow2.f32 %v917_v36 }
 0x3af   : > { %v1209_v37 = vpop.eup %1208 }
 0x3b0   : > { %v919_v38 = vadd.f32 1.0, %v1209_v37 }
 0x3b2   : > { %1210 = vrcp.f32 %v919_v38 }
 0x3bc   : > { %v1211_v41 = vpop.eup %1210 }
 0x3bd   : > { %v925_v42 = vrot.slane %v1211_v41, %v370_v32 }
 0x3bf   : > { %v926_v45 = vmul.f32 %v925_v42, %v642_v1  ;;  %v927_v46 = vmul.f32 %v925_v42, %v645_v3 }
 0x3c1   : > { %v928_v47 = vadd.f32 %v926_v45, %v730_v43  ;;  %v929_v48 = vadd.f32 %v927_v46, %v733_v44 }
 0x3c3   : > { %v930_v49 = vmax.f32 %v928_v47, 0.0  ;;  %v931_v50 = vmax.f32 %v929_v48, 0.0 }
 0x3c5   : > { %932 = vst [vmem:[%s325_s30] sm:$0xff] %v930_v49  ;;  %933 = vst [vmem:[%s325_s30 + $0x8] sm:$0xff] %v931_v50 }
 0x3c6 PF: > { %s18_s27 = sadd.s32 1, %s1218_s27  }
 0x3c7   : > { %p15_p4 = scmp.ge.s32.totalorder %s18_s27, 4  }
 0x3c9   :  { %17 = sbr.rel (!%p15_p4) target bundleno = 1 (0x1), region = 85 }

// kernel: e_senet_forward.17
= control target key start
LH: loop header
LB: loop body
LE: loop exit
PB: predicated region body
PF: predicated region fallthrough
CT: control target
= control target key end

     0   :  { %s1772_s27 = smov 0   ;;  %s2100_s0 = inlined_call_operand.vmem [shape: bf16[2,4,576], index: 0, kind: input, shape index: {}]   ;;  %s2101_s1 = inlined_call_operand.vmem [shape: bf16[2,4,128], index: 1, kind: input, shape index: {}]   ;;  %s2102_s2 = inlined_call_operand.vmem [shape: bf16[576,64], index: 2, kind: input, shape index: {}]   ;;  %s2103_s3 = inlined_call_operand.vmem [shape: bf16[64,256], index: 3, kind: input, shape index: {}]   ;;  %s2104_s4 = inlined_call_operand.vmem [shape: bf16[128,256], index: 4, kind: input, shape index: {}]   ;;  %s2105_s5 = inlined_call_operand.vmem [shape: bf16[256,64], index: 5, kind: input, shape index: {}]   ;;  %s2106_s6 = inlined_call_operand.vmem [shape: bf16[64,256], index: 6, kind: input, shape index: {}]   ;;  %s2107_s7 = inlined_call_operand.vmem [shape: f32[8,256], index: 7, kind: input, shape index: {}]   ;;  %s2108_s8 = inlined_call_operand.vmem [shape: f32[2,4,256], index: 8, kind: output, shape index: {}]  }
   0x1 LB: > { %s1410_s28 = sadd.s32 4294967295, %s1721_s27   ;;  %p1414_p0 = scmp.ge.s32.totalorder %s1721_s27, 1  ;;  %s1721_s27 = sphi %s1772_s27, %s18_s27  }
   0x2   : > { %p271_p1 = scmp.lt.s32.totalorder %s1721_s27, 3 }
   0x4   : > { %p272_p2 = pnand %p1414_p0, %p271_p1 }
   0x5   : > { %v1606_v0 = vld [vmem:[%s2102_s2 + $0x40] sm:$0xff] (!%p272_p2)   ;;  %v1610_v4 = vld [vmem:[%s2102_s2 + $0x48] sm:$0xff] (!%p272_p2)   ;;  %v1614_v8 = vld [vmem:[%s2102_s2 + $0x50] sm:$0xff] (!%p272_p2)   ;;  %p309_p3 = scmp.lt.s32.totalorder (!%p272_p2), %s1410_s28, 1  ;;  %v400_v30 = vlaneseq (!%p272_p2)  ;;  %v1723_v34 = vmov (!%p272_p2), 0.0   ;;  %vm1725_vm0 = vmmov (!%p272_p2), 0  }
   0x6   : > { %275 = sbr.rel (%p272_p2) target bundleno = 980 (0x3d4), region = 52  ;;  %v1607_v1 = vld [vmem:[%s2102_s2] sm:$0xff] (!%p272_p2)   ;;  %1510 = vmatprep.subr.bf16.mxu0 (!%p272_p2), %v1606_v0  ;;  %v1611_v5 = vld [vmem:[%s2102_s2 + $0x8] sm:$0xff] (!%p272_p2)   ;;  %v1615_v9 = vld [vmem:[%s2102_s2 + $0x10] sm:$0xff] (!%p272_p2)   ;;  %v1724_v36 = vmov (!%p272_p2), 1983009808  }
   0x7   : > { %v1608_v2 = vld [vmem:[%s2102_s2 + $0xc0] sm:$0xff] (!%p272_p2)   ;;  %1511 = vmatpush3.bf16.msra.mxu0 (!%p272_p2), %v1607_v1  ;;  %v1612_v6 = vld [vmem:[%s2102_s2 + $0xc8] sm:$0xff] (!%p272_p2)   ;;  %v1616_v10 = vld [vmem:[%s2102_s2 + $0xd0] sm:$0xff] (!%p272_p2)   ;;  %v1889_v35 = vshrl.u32 (!%p272_p2), %v400_v30, 7  ;;  %v408_v37 = vunpack.c.l.s4 (!%p272_p2), %v1724_v36  ;;  %vm650_vm1 = vcmask (!%p272_p2), 523264   ;;  %v1726_v58 = vmov (!%p272_p2), 0  }
   0x8   : > { %v1609_v3 = vld [vmem:[%s2102_s2 + $0x80] sm:$0xff] (!%p272_p2)   ;;  %1532 = vmatprep.subr.bf16.mxu1 (!%p272_p2), %v1608_v2  ;;  %1512 = vmatprep.subr.bf16.mxu0 (!%p272_p2), %v1610_v4  ;;  %v1613_v7 = vld [vmem:[%s2102_s2 + $0x88] sm:$0xff] (!%p272_p2)   ;;  %v1617_v11 = vld [vmem:[%s2102_s2 + $0x90] sm:$0xff] (!%p272_p2)   ;;  %vm1022_vm2 = vcmask (!%p272_p2), 1043456  }
   0x9   : > { %1533 = vmatpush3.bf16.msra.mxu1 (!%p272_p2), %v1609_v3  ;;  %v1618_v12 = vld [vmem:[%s2102_s2 + $0x58] sm:$0xff] (!%p272_p2)   ;;  %v1622_v16 = vld [vmem:[%s2102_s2 + $0x60] sm:$0xff] (!%p272_p2)   ;;  %v1626_v20 = vld [vmem:[%s2102_s2 + $0x68] sm:$0xff] (!%p272_p2)   ;;  %v409_v38 = vunpack.c.0.s8 (!%p272_p2), %v408_v37  ;;  %v1936_v60 = vsub.s32 (!%p272_p2), 0, %v1889_v35 }
   0xa   : > { %1534 = vmatprep.subr.bf16.mxu1 (!%p272_p2), %v1612_v6  ;;  %v1619_v13 = vld [vmem:[%s2102_s2 + $0x18] sm:$0xff] (!%p272_p2)   ;;  %v1623_v17 = vld [vmem:[%s2102_s2 + $0x20] sm:$0xff] (!%p272_p2)   ;;  %v1627_v21 = vld [vmem:[%s2102_s2 + $0x28] sm:$0xff] (!%p272_p2)  }
   0xb   : > { %1513 = vmatpush3.bf16.msra.mxu0 (!%p272_p2), %v1611_v5  ;;  %v1620_v14 = vld [vmem:[%s2102_s2 + $0xd8] sm:$0xff] (!%p272_p2)   ;;  %v1624_v18 = vld [vmem:[%s2102_s2 + $0xe0] sm:$0xff] (!%p272_p2)   ;;  %v1628_v22 = vld [vmem:[%s2102_s2 + $0xe8] sm:$0xff] (!%p272_p2)   ;;  %v412_v40 = vsub.s32 (!%p272_p2), %v409_v38, %v1889_v35 }
   0xc   : > { %1514 = vmatprep.subr.bf16.mxu0 (!%p272_p2), %v1614_v8  ;;  %v1621_v15 = vld [vmem:[%s2102_s2 + $0x98] sm:$0xff] (!%p272_p2)   ;;  %v1625_v19 = vld [vmem:[%s2102_s2 + $0xa0] sm:$0xff] (!%p272_p2)   ;;  %v1629_v23 = vld [vmem:[%s2102_s2 + $0xa8] sm:$0xff] (!%p272_p2)  }
   0xd   : > { %1535 = vmatpush3.bf16.msra.mxu1 %v1613_v7  ;;  %s2110_s28 = smov (!%p309_p3, %s1410_s28), 1  ;;  %v1630_v24 = vld [vmem:[%s2102_s2 + $0x70] sm:$0xff]   ;;  %v1634_v28 = vld [vmem:[%s2102_s2 + $0x78] sm:$0xff]   ;;  %v1639_v43 = vld [vmem:[%s2102_s2 + $0x100] sm:$0xff]  }
   0xe   : > { %1536 = vmatprep.subr.bf16.mxu1 %v1616_v10  ;;  %s1593_s17 = smul.u32 10, %s2110_s28  ;;  %v1631_v25 = vld [vmem:[%s2102_s2 + $0x30] sm:$0xff]   ;;  %v1635_v29 = vld [vmem:[%s2102_s2 + $0x38] sm:$0xff]   ;;  %v1640_v46 = vld [vmem:[%s2102_s2 + $0x108] sm:$0xff]   ;;  %s1416_s23 = sshll.u32 %s2110_s28, 1 }
   0xf   : > { %1515 = vmatpush3.bf16.msra.mxu0 %v1615_v9  ;;  %v1632_v26 = vld [vmem:[%s2102_s2 + $0xf0] sm:$0xff]   ;;  %v1636_v31 = vld [vmem:[%s2102_s2 + $0xf8] sm:$0xff]   ;;  %v1643_v50 = vld [vmem:[%s2103_s3] ss:$8 sps:$4 sm:$0xff]   ;;  %s317_s9 = scalar_lea.vmem %s2101_s1, %s1416_s23  ;;  %s1509_s29 = sshll.u32 %s2110_s28, 3 }
  0x10   : > { %1516 = vmatprep.subr.bf16.mxu0 %v1618_v12  ;;  %v1633_v27 = vld [vmem:[%s2102_s2 + $0xb0] sm:$0xff]   ;;  %s1877_s30 = scalar_lea.vmem %s2100_s0, %s1593_s17  ;;  %v1637_v33 = vld [vmem:[%s2102_s2 + $0xb8] sm:$0xff]   ;;  %v1645_v51 = vld [vmem:[%s2103_s3 + $0x4] ss:$8 sps:$4 sm:$0xff]  }
  0x11   : > { %1537 = vmatpush3.bf16.msra.mxu1 %v1617_v11  ;;  %v326_v32 = vld [vmem:[%s1877_s30] sm:$0xff]  ;;  %v1641_v47 = vld [vmem:[%s2102_s2 + $0x110] sm:$0xff]   ;;  %v1642_v48 = vld [vmem:[%s2102_s2 + $0x118] sm:$0xff]  }
  0x12   : > { %1538 = vmatprep.subr.bf16.mxu1 %v1620_v14  ;;  %v406_v39 = vcombine.high %v326_v32, %v326_v32  ;;  %v413_v41 = vrot.slane %v326_v32, %v412_v40  ;;  %v1419_v49 = vld.sshfl [vmem:[%s1877_s30 + $0x8] sm:$0x3 pattern:$0x76325410]  ;;  %v1648_v52 = vld [vmem:[%s2103_s3 + $0x14] ss:$8 sps:$4 sm:$0xff]   ;;  %s322_s30 = scalar_lea.vmem %s2108_s8, %s1509_s29 }
  0x13   : > { %1517 = vmatpush3.bf16.msra.mxu0 %v1619_v13  ;;  %v1646_v53 = vld [vmem:[%s2103_s3 + $0x10] ss:$8 sps:$4 sm:$0xff]   ;;  %v1651_v54 = vld [vmem:[%s2103_s3 + $0x24] ss:$8 sps:$4 sm:$0xff]   ;;  %v1649_v55 = vld [vmem:[%s2103_s3 + $0x20] ss:$8 sps:$4 sm:$0xff]  }
  0x14   : > { %1518 = vmatprep.subr.bf16.mxu0 %v1622_v16  ;;  %v420_v42 = vrot.slane %v406_v39, %v412_v40  ;;  %v421_v44 = vcombine.high %v413_v41, %v413_v41  ;;  %v1654_v56 = vld [vmem:[%s2103_s3 + $0x34] ss:$8 sps:$4 sm:$0xff]   ;;  %v1652_v57 = vld [vmem:[%s2103_s3 + $0x30] ss:$8 sps:$4 sm:$0xff]   ;;  %v1655_v59 = vld [vmem:[%s2105_s5 + $0x40] sm:$0xff]  }
  0x15   : > { %1539 = vmatpush3.bf16.msra.mxu1 %v1621_v15  ;;  %v1941_v61 = vld [vmem:[%s2107_s7] sm:$0xff]  ;;  %v1668_v30 = vld [vmem:[%s2105_s5 + $0x30] sm:$0xff]   ;;  %v1670_v32 = vld [vmem:[%s2105_s5 + $0x38] sm:$0xff]  }
  0x16   : > { %1540 = vmatprep.subr.bf16.mxu1 %v1624_v18  ;;  %v422_v45 = vcombine.high %v420_v42, %v420_v42  ;;  %686 = vmatprep.mubr.bf16.mxu0 %v421_v44  ;;  %v403_v63 = vrot.slane %v1941_v61, %v1936_v60  ;;  %v1676_v36 = vld [vmem:[%s2104_s4 + $0x14] ss:$8 sps:$4 sm:$0xff]   ;;  %v1674_v37 = vld [vmem:[%s2104_s4 + $0x10] ss:$8 sps:$4 sm:$0xff]   ;;  %v1679_v38 = vld [vmem:[%s2104_s4 + $0x24] ss:$8 sps:$4 sm:$0xff]  }
  0x17   : > { %1519 = vmatpush3.bf16.msra.mxu0 %v1623_v17  ;;  %v1656_v17 = vld [vmem:[%s2105_s5] sm:$0xff]   ;;  %v1682_v40 = vld [vmem:[%s2104_s4 + $0x34] ss:$8 sps:$4 sm:$0xff]  }
  0x18   : > { %1520 = vmatprep.subr.bf16.mxu0 %v1626_v20  ;;  %726 = vmatprep.mubr.bf16.mxu1 %v422_v45  ;;  %v1658_v20 = vld [vmem:[%s2105_s5 + $0x8] sm:$0xff]   ;;  %v1688_v44 = vld [vmem:[%s2104_s4 + $0x54] ss:$8 sps:$4 sm:$0xff]   ;;  %v1686_v45 = vld [vmem:[%s2104_s4 + $0x50] ss:$8 sps:$4 sm:$0xff]  }
  0x19   : > { %1541 = vmatpush3.bf16.msra.mxu1 %v1625_v19  ;;  %v1657_v19 = vld [vmem:[%s2105_s5 + $0x48] sm:$0xff]  }
  0x1a   : > { %1542 = vmatprep.subr.bf16.mxu1 %v1628_v22  ;;  %v1660_v22 = vld [vmem:[%s2105_s5 + $0x10] sm:$0xff]   ;;  %v1677_v39 = vld [vmem:[%s2104_s4 + $0x20] ss:$8 sps:$4 sm:$0xff]  }
  0x1b   : > { %1521 = vmatpush3.bf16.msra.mxu0 %v1627_v21  ;;  %v1659_v21 = vld [vmem:[%s2105_s5 + $0x50] sm:$0xff]  }
  0x1c   : > { %1522 = vmatprep.subr.bf16.mxu0 %v1630_v24  ;;  %v1662_v24 = vld [vmem:[%s2105_s5 + $0x18] sm:$0xff]  }
  0x1d   : > { %1543 = vmatpush3.bf16.msra.mxu1 %v1629_v23  ;;  %v1661_v23 = vld [vmem:[%s2105_s5 + $0x58] sm:$0xff]  }
  0x1e   : > { %1544 = vmatprep.subr.bf16.mxu1 %v1632_v26  ;;  %v1664_v26 = vld [vmem:[%s2105_s5 + $0x20] sm:$0xff]  }
  0x1f   : > { %1523 = vmatpush3.bf16.msra.mxu0 %v1631_v25  ;;  %v1663_v25 = vld [vmem:[%s2105_s5 + $0x60] sm:$0xff]  }
  0x20   : > { %1524 = vmatprep.subr.bf16.mxu0 %v1634_v28  ;;  %v1666_v28 = vld [vmem:[%s2105_s5 + $0x28] sm:$0xff]  }
  0x21   : > { %1545 = vmatpush3.bf16.msra.mxu1 %v1633_v27  ;;  %v1665_v27 = vld [vmem:[%s2105_s5 + $0x68] sm:$0xff]  }
  0x22   : > { %1546 = vmatprep.subr.bf16.mxu1 %v1636_v31  ;;  %v1669_v31 = vld [vmem:[%s2105_s5 + $0x78] sm:$0xff]  }
  0x23   : > { %1525 = vmatpush3.bf16.msra.mxu0 %v1635_v29  ;;  %v1667_v29 = vld [vmem:[%s2105_s5 + $0x70] sm:$0xff]  }
  0x24   : > { %1581 = vmatprep.subr.bf16.mxu0 %v1723_v34 }
  0x25   : > { %1547 = vmatpush3.bf16.msra.mxu1 %v1637_v33  ;;  %v1671_v33 = vld [vmem:[%s2104_s4] ss:$8 sps:$4 sm:$0xff]  }
  0x26   : > { %687 = vmatmul.mubr.bf16.vlgmr.msra.gmra.mrb[0].mxu0 %v413_v41  ;;  %835 = vmatprep.subr.bf16.mxu1 %v1645_v51  ;;  %v1680_v41 = vld [vmem:[%s2104_s4 + $0x30] ss:$8 sps:$4 sm:$0xff]   ;;  %v876_v51 = vld [vmem:[%s317_s9] sm:$0x3] }
  0x27   : > { %1582 = vmatpush3.bf16.msra.mxu0 %v1639_v43  ;;  %1589 = vmatprep.mubr.msk.bf16.mxu0 %vm1725_vm0, %v1723_v34  ;;  %v1683_v43 = vld [vmem:[%s2104_s4 + $0x40] ss:$8 sps:$4 sm:$0xff]  }
  0x28   : > { %727 = vmatmul.mubr.bf16.vlgmr.msra.gmra.mrb[0].mxu1 %v420_v42  ;;  %1583 = vmatprep.subr.bf16.mxu0 %v1723_v34  ;;  %v1685_v42 = vld [vmem:[%s2104_s4 + $0x44] ss:$8 sps:$4 sm:$0xff]  }
  0x29   : > { %836 = vmatpush1.bf16.msra.mxu1 %v1643_v50  ;;  %867 = vmatprep.mubr.bf16.mxu1 %v1726_v58  ;;  %v1697_v50 = vld [vmem:[%s2106_s6 + $0x4] ss:$8 sps:$4 sm:$0xff]  }
  0x2a   : > { %837 = vmatprep.subr.bf16.mxu1 %v1648_v52  ;;  %v1695_v52 = vld [vmem:[%s2106_s6] ss:$8 sps:$4 sm:$0xff]  }
  0x2b   : > { %1584 = vmatpush3.bf16.msra.mxu0 %v1640_v46  ;;  %v1691_v46 = vld [vmem:[%s2104_s4 + $0x64] ss:$8 sps:$4 sm:$0xff]  }
  0x2c   : > { %1585 = vmatprep.subr.bf16.mxu0 %v1723_v34 }
  0x2d   : > { %838 = vmatpush1.bf16.msra.mxu1 %v1646_v53  ;;  %v1700_v53 = vld [vmem:[%s2106_s6 + $0x14] ss:$8 sps:$4 sm:$0xff]  }
  0x2e   : > { %839 = vmatprep.subr.bf16.mxu1 %v1651_v54  ;;  %v1698_v54 = vld [vmem:[%s2106_s6 + $0x10] ss:$8 sps:$4 sm:$0xff]  }
  0x2f   : > { %1586 = vmatpush3.bf16.msra.mxu0 %v1641_v47  ;;  %v1689_v47 = vld [vmem:[%s2104_s4 + $0x60] ss:$8 sps:$4 sm:$0xff]  }
  0x30   : > { %1587 = vmatprep.subr.bf16.mxu0 %v1723_v34  ;;  %v1673_v34 = vld [vmem:[%s2104_s4 + $0x4] ss:$8 sps:$4 sm:$0xff]  }
  0x31   : > { %840 = vmatpush1.bf16.msra.mxu1 %v1649_v55  ;;  %v786_v55 = vsub.s32 1, %v1889_v35 }
  0x32   : > { %841 = vmatprep.subr.bf16.mxu1 %v1654_v56  ;;  %v2060_v56 = vld [vmem:[%s2107_s7 + $0x8] sm:$0xff] }
  0x33   : > { %1588 = vmatpush3.bf16.msra.mxu0 %v1642_v48  ;;  %v1694_v48 = vld [vmem:[%s2104_s4 + $0x74] ss:$8 sps:$4 sm:$0xff]  }
  0x34   : > { %981 = vmatprep.subr.bf16.mxu0 %v1673_v34 }
  0x35   : > { %842 = vmatpush1.bf16.msra.mxu1 %v1652_v57  ;;  %v787_v57 = vrot.slane %v1941_v61, %v786_v55 }
  0x36   : > { %1590 = vmatmul.mubr.msk.bf16.vlgmr.msra.gmra.mrb[4].mxu0 %vm650_vm1, %v1419_v49  ;;  %1559 = vmatprep.subr.bf16.mxu1 %v1655_v59  ;;  %v1692_v49 = vld [vmem:[%s2104_s4 + $0x70] ss:$8 sps:$4 sm:$0xff]   ;;  %v791_v59 = vrot.slane %v2060_v56, %v786_v55  ;;  %v895_v55 = vsub.s32 2, %v1889_v35 }
  0x37   : > { %1013 = vmatprep.mubr.bf16.mxu0 %v1726_v58  ;;  %982 = vmatpush1.bf16.msra.mxu0 %v1671_v33 }
  0x38   : > { %983 = vmatprep.subr.bf16.mxu0 %v1676_v36 }
  0x3b   : > { %984 = vmatpush1.bf16.msra.mxu0 %v1674_v37 }
  0x3c   : > { %985 = vmatprep.subr.bf16.mxu0 %v1679_v38 }
  0x3f   : > { %986 = vmatpush1.bf16.msra.mxu0 %v1677_v39  ;;  %v1264_v39 = vrot.slane %v1941_v61, 4 }
  0x40   : > { %987 = vmatprep.subr.bf16.mxu0 %v1682_v40  ;;  %v1265_v40 = vrot.slane %v2060_v56, 4 }
  0x43   : > { %988 = vmatpush1.bf16.msra.mxu0 %v1680_v41 }
  0x44   : > { %989 = vmatprep.subr.bf16.mxu0 %v1685_v42 }
  0x47   : > { %990 = vmatpush1.bf16.msra.mxu0 %v1683_v43 }
  0x48   : > { %991 = vmatprep.subr.bf16.mxu0 %v1688_v44 }
  0x4b   : > { %992 = vmatpush1.bf16.msra.mxu0 %v1686_v45 }
  0x4c   : > { %993 = vmatprep.subr.bf16.mxu0 %v1691_v46 }
  0x4f   : > { %994 = vmatpush1.bf16.msra.mxu0 %v1689_v47 }
  0x50   : > { %995 = vmatprep.subr.bf16.mxu0 %v1694_v48 }
  0x53   : > { %996 = vmatpush1.bf16.msra.mxu0 %v1692_v49 }
  0x54   : > { %1271 = vmatprep.subr.bf16.mxu0 %v1697_v50 }
  0x56   : > { %1014 = vmatmul.mubr.bf16.vlgmr.msra.gmra.mrb[8].mxu0 %v876_v51 }
  0x57   : > { %1272 = vmatpush1.bf16.msra.mxu0 %v1695_v52  ;;  %1303 = vmatprep.mubr.bf16.mxu0 %v1726_v58 }
  0x58   : > { %1273 = vmatprep.subr.bf16.mxu0 %v1700_v53 }
  0x5b   : > { %1274 = vmatpush1.bf16.msra.mxu0 %v1698_v54 }
  0xf9   : > { %v1526_v62 = vpop.f32.mrb[0].mxu0 }
  0xfa   : > { %v1527_v1 = vpop.f32.mrb[1].mxu0 }
  0xfb   : > { %v1548_v0 = vpop.f32.mrb[0].mxu1  ;;  %v1528_v3 = vadd.f32 %v1527_v1, %v1526_v62  ;;  %v1529_v4 = vpop.f32.mrb[2].mxu0 }
  0xfc   : > { %v1549_v2 = vpop.f32.mrb[1].mxu1  ;;  %v1530_v7 = vpop.f32.mrb[3].mxu0 }
  0xfd   : > { %v1550_v5 = vadd.f32 %v1549_v2, %v1548_v0  ;;  %v1551_v6 = vpop.f32.mrb[2].mxu1  ;;  %v689_v9 = vadd.f32 %v1528_v3, %v403_v63 }
  0xfe   : > { %v1552_v8 = vpop.f32.mrb[3].mxu1 }
  0xff   : > { %v729_v10 = vadd.f32 %v1550_v5, %v689_v9 }
 0x109   : > { %v768_v11 = vpop.f32.mrb[4].mxu0 }
 0x10a   : > { %v769_v12 = vadd.f32 %v768_v11, %v729_v10  ;;  %v1591_v13 = vpop.f32.mrb[5].mxu0 }
 0x10b   : > { %v771_v14 = vpop.f32.mrb[6].mxu0 }
 0x10c   : > { %v774_v15 = vmax.f32 %v769_v12, 0.0  ;;  %v1592_v16 = vpop.f32.mrb[7].mxu0 }
 0x10e   : > { %v775_v18 = vpack.c.bf16 %v774_v15, %v774_v15 }
 0x110   : > { %1465 = vmatmul.mubr.msk.bf16.vlgmr.msra.gmra.mrb[4].mxu1 %vm650_vm1, %v775_v18 }
 0x111   : > { %1560 = vmatpush3.bf16.msra.mxu1 %v1656_v17 }
 0x112   : > { %1561 = vmatprep.subr.bf16.mxu1 %v1657_v19 }
 0x115   : > { %1562 = vmatpush3.bf16.msra.mxu1 %v1658_v20 }
 0x116   : > { %1563 = vmatprep.subr.bf16.mxu1 %v1659_v21  ;;  %v1703_v21 = vld [vmem:[%s2106_s6 + $0x24] ss:$8 sps:$4 sm:$0xff]  }
 0x117   : > { %1275 = vmatprep.subr.bf16.mxu0 %v1703_v21 }
 0x119   : > { %1564 = vmatpush3.bf16.msra.mxu1 %v1660_v22  ;;  %v1701_v22 = vld [vmem:[%s2106_s6 + $0x20] ss:$8 sps:$4 sm:$0xff]  }
 0x11a   : > { %1565 = vmatprep.subr.bf16.mxu1 %v1661_v23  ;;  %1276 = vmatpush1.bf16.msra.mxu0 %v1701_v22  ;;  %v1706_v23 = vld [vmem:[%s2106_s6 + $0x34] ss:$8 sps:$4 sm:$0xff]  }
 0x11b   : > { %1277 = vmatprep.subr.bf16.mxu0 %v1706_v23 }
 0x11d   : > { %1566 = vmatpush3.bf16.msra.mxu1 %v1662_v24  ;;  %v1704_v24 = vld [vmem:[%s2106_s6 + $0x30] ss:$8 sps:$4 sm:$0xff]  }
 0x11e   : > { %1567 = vmatprep.subr.bf16.mxu1 %v1663_v25  ;;  %1278 = vmatpush1.bf16.msra.mxu0 %v1704_v24 }
 0x121   : > { %1568 = vmatpush3.bf16.msra.mxu1 %v1664_v26 }
 0x122   : > { %1569 = vmatprep.subr.bf16.mxu1 %v1665_v27 }
 0x125   : > { %1570 = vmatpush3.bf16.msra.mxu1 %v1666_v28 }
 0x126   : > { %1571 = vmatprep.subr.bf16.mxu1 %v1667_v29 }
 0x129   : > { %1572 = vmatpush3.bf16.msra.mxu1 %v1668_v30  ;;  %v1015_v25 = vpop.f32.mrb[8].mxu0  ;;  %v1171_v30 = vrot.slane %v1941_v61, 3 }
 0x12a   : > { %1573 = vmatprep.subr.bf16.mxu1 %v1669_v31  ;;  %v1017_v26 = vpop.f32.mrb[9].mxu0 }
 0x12b   : > { %v1019_v27 = vpop.f32.mrb[10].mxu0 }
 0x12c   : > { %v1020_v28 = vpop.f32.mrb[11].mxu0 }
 0x12d   : > { %1574 = vmatpush3.bf16.msra.mxu1 %v1670_v32 }
 0x1e3   : > { %v869_v62 = vpop.f32.mrb[4].mxu1 }
 0x1e4   : > { %v2064_v63 = vadd.f32 %v869_v62, %v787_v57  ;;  %v871_v0 = vpop.f32.mrb[5].mxu1  ;;  %v896_v57 = vrot.slane %v1941_v61, %v895_v55  ;;  %v900_v62 = vrot.slane %v2060_v56, %v895_v55 }
 0x1e5   : > { %v2066_v1 = vadd.f32 %v871_v0, %v791_v59  ;;  %v873_v58 = vpop.f32.mrb[6].mxu1 }
 0x1e6   : > { %v1023_v2 = vsel %vm1022_vm2, %v2064_v63, 0.0  ;;  %v874_v3 = vpop.f32.mrb[7].mxu1 }
 0x1e7   : > { %v1024_v4 = vrot.slane %v1023_v2, 4  ;;  %v1030_v5 = vsel %vm1022_vm2, %v2066_v1, 0.0  ;;  %v1016_v3 = vadd.f32 %v1015_v25, %v896_v57 }
 0x1e8   : > { %v1031_v6 = vrot.slane %v1030_v5, 4 }
 0x1e9   : > { %v1025_v7 = vadd.f32 %v1024_v4, %v1023_v2 }
 0x1ea   : > { %v1032_v8 = vadd.f32 %v1031_v6, %v1030_v5  ;;  %v1018_v5 = vadd.f32 %v1017_v26, %v900_v62 }
 0x1eb   : > { %v1026_v9 = vrot.slane %v1025_v7, 2 }
 0x1ec   : > { %v1033_v10 = vrot.slane %v1032_v8, 2 }
 0x1ed   : > { %v1027_v11 = vadd.f32 %v1026_v9, %v1025_v7 }
 0x1ee   : > { %v1034_v12 = vadd.f32 %v1033_v10, %v1032_v8 }
 0x1ef   : > { %v1028_v13 = vrot.slane %v1027_v11, 1 }
 0x1f0   : > { %v1035_v14 = vrot.slane %v1034_v12, 1 }
 0x1f1   : > { %v1029_v15 = vadd.f32 %v1028_v13, %v1027_v11 }
 0x1f2   : > { %v1036_v16 = vadd.f32 %v1035_v14, %v1034_v12 }
 0x1f3   : > { %v1038_v17 = vmul.f32 0.25, %v1029_v15 }
 0x1f4   : > { %v1039_v18 = vmul.f32 0.25, %v1036_v16 }
 0x1f5   : > { %v1040_v20 = vpack.c.bf16 %v1038_v17, %v1038_v17 }
 0x1f6   : > { %v1041_v19 = vpack.c.bf16 %v1039_v18, %v1039_v18 }
 0x1f8   : > { %1205 = vmatprep.mubr.bf16.mxu1 %v1041_v19 }
 0x1f9   : > { %1206 = vmatmul.mubr.bf16.vlgmr.msra.gmra.mrb[8].mxu1 %v1040_v20 }
 0x2cc   : > { %v1575_v29 = vpop.f32.mrb[8].mxu1 }
 0x2cd   : > { %v1576_v31 = vpop.f32.mrb[9].mxu1 }
 0x2ce   : > { %v1577_v32 = vadd.f32 %v1576_v31, %v1575_v29  ;;  %v1578_v33 = vpop.f32.mrb[10].mxu1 }
 0x2cf   : > { %v1579_v34 = vpop.f32.mrb[11].mxu1 }
 0x2d0   : > { %v1208_v36 = vadd.f32 %v1577_v32, %v1171_v30 }
 0x2d2   : > { %v1213_v37 = vmax.f32 %v1208_v36, 0.0 }
 0x2d4   : > { %v1214_v38 = vpack.c.bf16 %v1213_v37, %v1213_v37 }
 0x2d6   : > { %1506 = vmatmul.mubr.msk.bf16.vlgmr.msra.gmra.mrb[12].mxu0 %vm650_vm1, %v1214_v38 }
 0x3a9   : > { %v1305_v41 = vpop.f32.mrb[12].mxu0 }
 0x3aa   : > { %v1306_v42 = vadd.f32 %v1305_v41, %v1264_v39  ;;  %v1307_v43 = vpop.f32.mrb[13].mxu0 }
 0x3ab   : > { %v1308_v44 = vadd.f32 %v1307_v43, %v1265_v40  ;;  %v1309_v45 = vpop.f32.mrb[14].mxu0 }
 0x3ac   : > { %v1312_v46 = vsub.f32 0.0, %v1306_v42  ;;  %v1310_v47 = vpop.f32.mrb[15].mxu0 }
 0x3ad   : > { %v1313_v48 = vsub.f32 0.0, %v1308_v44 }
 0x3ae   : > { %v1314_v49 = vmul.f32 1.442695, %v1312_v46 }
 0x3af   : > { %v1316_v50 = vmul.f32 1.442695, %v1313_v48 }
 0x3b0   : > { %1707 = vpow2.f32 %v1314_v49 }
 0x3b1   : > { %1709 = vpow2.f32 %v1316_v50 }
 0x3ba   : > { %v1708_v51 = vpop.eup %1707 }
 0x3bb   : > { %v1710_v52 = vpop.eup %1709  ;;  %v1318_v53 = vadd.f32 1.0, %v1708_v51 }
 0x3bc   : > { %v1319_v54 = vadd.f32 1.0, %v1710_v52 }
 0x3bd   : > { %1711 = vrcp.f32 %v1318_v53 }
 0x3be   : > { %1713 = vrcp.f32 %v1319_v54 }
 0x3c7   : > { %v1712_v59 = vpop.eup %1711 }
 0x3c8   : > { %v1714_v0 = vpop.eup %1713  ;;  %v1327_v58 = vrot.slane %v1712_v59, %v1936_v60 }
 0x3c9   : > { %v1331_v2 = vrot.slane %v1714_v0, %v1936_v60 }
 0x3ca   : > { %v1332_v4 = vmul.f32 %v1327_v58, %v2064_v63 }
 0x3cb   : > { %v1333_v6 = vmul.f32 %v1331_v2, %v2066_v1 }
 0x3cc   : > { %v1334_v7 = vadd.f32 %v1332_v4, %v1016_v3 }
 0x3cd   : > { %v1335_v8 = vadd.f32 %v1333_v6, %v1018_v5 }
 0x3ce   : > { %v1336_v35 = vmax.f32 %v1334_v7, 0.0 }
 0x3cf   : > { %v1337_v9 = vmax.f32 %v1335_v8, 0.0 }
 0x3d1   : > { %v1340_v61 = vcombine.low %v1336_v35, %v1337_v9 }
 0x3d3   : > { %1342 = vst [vmem:[%s322_s30] sm:$0xff] %v1340_v61 }
 0x3d4 PF: > { %s18_s27 = sadd.s32 1, %s1721_s27  }
 0x3d5   : > { %p15_p4 = scmp.ge.s32.totalorder %s18_s27, 4  }
 0x3d7   :  { %17 = sbr.rel (!%p15_p4) target bundleno = 1 (0x1), region = 85 }

</bundles_post_ra>
